<compile_context>
chip_gen: v7x
topology: tpu7x:2x2x1
jax: 0.10.0
libtpu: 0.0.40
codegen_flags: <defaults>
</compile_context>

<pallas_src>
import math

import jax
import jax.numpy as jnp
from jax import lax
from jax.experimental import pallas as pl
from jax.experimental.pallas import tpu as pltpu

H = 768          # encoder hidden size (cls 768 + mean-pooled 768 = 1536 = dense1 in)
D_IN = 2 * H     # 1536
D1 = 512
D2 = 256
LN_EPS = 1e-5


def _layernorm(x, gamma, beta):
    mu = jnp.mean(x, axis=-1, keepdims=True)
    var = jnp.mean((x - mu) ** 2, axis=-1, keepdims=True)
    return (x - mu) * lax.rsqrt(var + LN_EPS) * gamma + beta


def _gelu_exact(x):
    # nn.GELU() default = exact erf-based GELU
    return 0.5 * x * (1.0 + lax.erf(x * (1.0 / math.sqrt(2.0))))


def spam_head_kernel(hs_ref, mask_ref,
                     w1c_ref, w1m_ref, b1_ref, g1_ref, be1_ref,
                     w2_ref, b2_ref, g2_ref, be2_ref,
                     out_ref,
                     cls_sc, sum_emb_sc, sum_mask_sc):
    s = pl.program_id(1)
    ns = pl.num_programs(1)

    hs = hs_ref[...]              # [TB, TS, H] bf16
    mask = mask_ref[...]          # [TB, TS]    f32

    @pl.when(s == 0)
    def _init():
        sum_emb_sc[...] = jnp.zeros_like(sum_emb_sc)
        sum_mask_sc[...] = jnp.zeros_like(sum_mask_sc)
        # CLS token is sequence position 0 -> lives in the s == 0 block.
        cls_sc[...] = hs[:, 0, :].astype(jnp.float32)

    # Masked sum over this sequence chunk on the MXU (f32 accumulation):
    #   sum_s mask[b, s] * hs[b, s, h]
    mask_b = mask.astype(hs.dtype)[:, None, :]                       # [TB, 1, TS]
    chunk_sum = jnp.einsum("bqs,bsh->bqh", mask_b, hs,
                           preferred_element_type=jnp.float32)       # [TB, 1, H]
    sum_emb_sc[...] += chunk_sum[:, 0, :]
    sum_mask_sc[...] += jnp.sum(mask, axis=1, keepdims=True)         # [TB, 1]

    @pl.when(s == ns - 1)
    def _finalize():
        cls_out = cls_sc[...]                                        # [TB, H]
        denom = jnp.maximum(sum_mask_sc[...], 1e-9)                  # [TB, 1]
        mean_pooled = sum_emb_sc[...] * pl.reciprocal(denom, approx=False)

        # dense1 on concat([cls, mean]) == cls @ W1[:H] + mean @ W1[H:]
        x = (jnp.dot(cls_out, w1c_ref[...], preferred_element_type=jnp.float32)
             + jnp.dot(mean_pooled, w1m_ref[...], preferred_element_type=jnp.float32)
             + b1_ref[...])                                          # [TB, 512]
        x = _gelu_exact(_layernorm(x, g1_ref[...], be1_ref[...]))
        # dropout1: identity (eval mode)

        x = jnp.dot(x, w2_ref[...], preferred_element_type=jnp.float32) + b2_ref[...]
        x = _gelu_exact(_layernorm(x, g2_ref[...], be2_ref[...]))    # [TB, 256]
        # dropout2: identity (eval mode)

        out_ref[...] = x.astype(out_ref.dtype)


def _pick_batch_tile(B, max_tb=8):
    # mask/out blocks need TB % 8 == 0 or TB == B
    if B <= max_tb:
        return B
    for tb in range(max_tb, 0, -1):
        if tb % 8 == 0 and B % tb == 0:
            return tb
    return B


def _pick_seq_tile(S, max_ts=512):
    # mask block needs TS % 128 == 0 or TS == S
    if S <= max_ts:
        return S
    for ts in range(max_ts, 0, -1):
        if ts % 128 == 0 and S % ts == 0:
            return ts
    return S


def spam_user_classification_head(last_hidden_state, attention_mask, params,
                                  *, max_batch_tile=8, max_seq_tile=512):
    B, S, h = last_hidden_state.shape
    assert h == H
    TB = _pick_batch_tile(B, max_batch_tile)
    TS = _pick_seq_tile(S, max_seq_tile)
    nb, ns = B // TB, S // TS

    # Stream the big tensor as bf16 (halves HBM traffic); all accumulation is f32.
    hs = last_hidden_state.astype(jnp.bfloat16)
    mask = attention_mask.astype(jnp.float32)

    def const(shape):
        return pl.BlockSpec(shape, lambda b, s: (0, 0))

    grid_spec = pltpu.PrefetchScalarGridSpec(
        num_scalar_prefetch=0,
        grid=(nb, ns),
        in_specs=[
            pl.BlockSpec((TB, TS, H), lambda b, s: (b, s, 0)),   # hidden states
            pl.BlockSpec((TB, TS), lambda b, s: (b, s)),         # attention mask
            const((H, D1)),    # w1_cls
            const((H, D1)),    # w1_mean
            const((1, D1)),    # b1
            const((1, D1)),    # gamma1
            const((1, D1)),    # beta1
            const((D1, D2)),   # w2
            const((1, D2)),    # b2
            const((1, D2)),    # gamma2
            const((1, D2)),    # beta2
        ],
        out_specs=pl.BlockSpec((TB, D2), lambda b, s: (b, 0)),
        scratch_shapes=[
            pltpu.VMEM((TB, H), jnp.float32),   # cls token
            pltpu.VMEM((TB, H), jnp.float32),   # masked-sum accumulator
            pltpu.VMEM((TB, 1), jnp.float32),   # mask-count accumulator
        ],
    )

    return pl.pallas_call(
        spam_head_kernel,
        out_shape=jax.ShapeDtypeStruct((B, D2), jnp.float32),
        grid_spec=grid_spec,
        compiler_params=pltpu.CompilerParams(
            dimension_semantics=("parallel", "arbitrary"),
            vmem_limit_bytes=48 * 1024 * 1024,
        ),
    )(hs, mask,
      params["w1_cls"], params["w1_mean"], params["b1"], params["g1"], params["be1"],
      params["w2"], params["b2"], params["g2"], params["be2"])


def init_params(key):
    k1, k2 = jax.random.split(key)

    def xavier_uniform(k, fan_in, fan_out):
        bound = math.sqrt(6.0 / (fan_in + fan_out))
        # stored as [in, out]
        return jax.random.uniform(k, (fan_in, fan_out), jnp.float32, -bound, bound)

    w1 = xavier_uniform(k1, D_IN, D1)   # rows ordered [cls | mean_pooled]
    return {
        "w1_cls": w1[:H],
        "w1_mean": w1[H:],
        "b1": jnp.zeros((1, D1), jnp.float32),
        "g1": jnp.ones((1, D1), jnp.float32),
        "be1": jnp.zeros((1, D1), jnp.float32),
        "w2": xavier_uniform(k2, D1, D2),
        "b2": jnp.zeros((1, D2), jnp.float32),
        "g2": jnp.ones((1, D2), jnp.float32),
        "be2": jnp.zeros((1, D2), jnp.float32),
    }


def reference_head(last_hidden_state, attention_mask, params):
    # Pure-JAX reference (same bf16 cast of hs as the kernel uses).
    hs = last_hidden_state.astype(jnp.bfloat16).astype(jnp.float32)
    mask = attention_mask.astype(jnp.float32)
    cls_out = hs[:, 0, :]
    m = mask[:, :, None]
    sum_emb = jnp.sum(hs * m, axis=1)
    sum_mask = jnp.maximum(jnp.sum(m, axis=1), 1e-9)
    mean_pooled = sum_emb / sum_mask
    x = cls_out @ params["w1_cls"] + mean_pooled @ params["w1_mean"] + params["b1"]
    x = _gelu_exact(_layernorm(x, params["g1"], params["be1"]))
    x = x @ params["w2"] + params["b2"]
    x = _gelu_exact(_layernorm(x, params["g2"], params["be2"]))
    return x


if __name__ == "__main__":
    key = jax.random.PRNGKey(0)
    k_hs, k_hs2, k_params = jax.random.split(key, 3)
    params = init_params(k_params)

    # Test 1: small shape, single grid step.
    B, S = 4, 8
    last_hidden_state = jax.random.normal(k_hs, (B, S, H), jnp.float32)
    lengths = jnp.array([8, 5, 3, 7], jnp.int32)
    attention_mask = (jnp.arange(S)[None, :] < lengths[:, None]).astype(jnp.float32)

    out = spam_user_classification_head(last_hidden_state, attention_mask, params)
    out = jax.block_until_ready(out)
    assert out.shape == (B, D2) and out.dtype == jnp.float32
    assert bool(jnp.all(jnp.isfinite(out)))
    ref = reference_head(last_hidden_state, attention_mask, params)
    assert bool(jnp.allclose(out, ref, atol=2e-2, rtol=2e-2))

    # Test 2: exercises the batch grid (parallel) and the sequence-reduction
    # accumulator path (2 batch tiles x 2 sequence tiles).
    B2, S2 = 16, 256
    hs2 = jax.random.normal(k_hs2, (B2, S2, H), jnp.float32)
    len2 = (jnp.arange(B2, dtype=jnp.int32) * 15) % S2 + 1
    mask2 = (jnp.arange(S2)[None, :] < len2[:, None]).astype(jnp.float32)

    out2 = spam_user_classification_head(hs2, mask2, params, max_seq_tile=128)
    out2 = jax.block_until_ready(out2)
    assert out2.shape == (B2, D2) and bool(jnp.all(jnp.isfinite(out2)))
    ref2 = reference_head(hs2, mask2, params)
    assert bool(jnp.allclose(out2, ref2, atol=2e-2, rtol=2e-2))

    print("KERNEL_OK")
</pallas_src>

<mosaic_0001>
module attributes {stable_mosaic.version = 11 : i64} {
  func.func @spam_head_kernel(%arg0: i32, %arg1: i32, %arg2: memref<4x8x768xbf16, #tpu.memory_space<vmem>>, %arg3: memref<4x8xf32, #tpu.memory_space<vmem>>, %arg4: memref<768x512xf32, #tpu.memory_space<vmem>>, %arg5: memref<768x512xf32, #tpu.memory_space<vmem>>, %arg6: memref<1x512xf32, #tpu.memory_space<vmem>>, %arg7: memref<1x512xf32, #tpu.memory_space<vmem>>, %arg8: memref<1x512xf32, #tpu.memory_space<vmem>>, %arg9: memref<512x256xf32, #tpu.memory_space<vmem>>, %arg10: memref<1x256xf32, #tpu.memory_space<vmem>>, %arg11: memref<1x256xf32, #tpu.memory_space<vmem>>, %arg12: memref<1x256xf32, #tpu.memory_space<vmem>>, %arg13: memref<4x256xf32, #tpu.memory_space<vmem>>, %arg14: memref<4x768xf32, #tpu.memory_space<vmem>>, %arg15: memref<4x768xf32, #tpu.memory_space<vmem>>, %arg16: memref<4x1xf32, #tpu.memory_space<vmem>>) attributes {dimension_semantics = [#tpu.dimension_semantics<parallel>, #tpu.dimension_semantics<arbitrary>], iteration_bounds = array<i64: 1, 1>, scalar_prefetch = 0 : i64, scratch_operands = 3 : i64, tpu.core_type = #tpu.core_type<tc>, window_params = [{transform_indices = @transform_0, window_bounds = array<i64: 4, 8, 768>}, {transform_indices = @transform_1, window_bounds = array<i64: 4, 8>}, {pipeline_mode = #tpu.pipeline_mode<synchronous>, transform_indices = @transform_2, window_bounds = array<i64: 768, 512>}, {pipeline_mode = #tpu.pipeline_mode<synchronous>, transform_indices = @transform_3, window_bounds = array<i64: 768, 512>}, {pipeline_mode = #tpu.pipeline_mode<synchronous>, transform_indices = @transform_4, window_bounds = array<i64: 1, 512>}, {pipeline_mode = #tpu.pipeline_mode<synchronous>, transform_indices = @transform_5, window_bounds = array<i64: 1, 512>}, {pipeline_mode = #tpu.pipeline_mode<synchronous>, transform_indices = @transform_6, window_bounds = array<i64: 1, 512>}, {pipeline_mode = #tpu.pipeline_mode<synchronous>, transform_indices = @transform_7, window_bounds = array<i64: 512, 256>}, {pipeline_mode = #tpu.pipeline_mode<synchronous>, transform_indices = @transform_8, window_bounds = array<i64: 1, 256>}, {pipeline_mode = #tpu.pipeline_mode<synchronous>, transform_indices = @transform_9, window_bounds = array<i64: 1, 256>}, {pipeline_mode = #tpu.pipeline_mode<synchronous>, transform_indices = @transform_10, window_bounds = array<i64: 1, 256>}, {transform_indices = @transform_11, window_bounds = array<i64: 4, 256>}]} {
    %c0 = arith.constant 0 : index
    %c0_0 = arith.constant 0 : index
    %c0_1 = arith.constant 0 : index
    %0 = vector.load %arg2[%c0, %c0_0, %c0_1] : memref<4x8x768xbf16, #tpu.memory_space<vmem>>, vector<4x8x768xbf16>
    %c0_2 = arith.constant 0 : index
    %c0_3 = arith.constant 0 : index
    %1 = vector.load %arg3[%c0_2, %c0_3] : memref<4x8xf32, #tpu.memory_space<vmem>>, vector<4x8xf32>
    %c0_i32 = arith.constant 0 : i32
    %2 = arith.cmpi eq, %arg1, %c0_i32 : i32
    %3 = arith.extui %2 : i1 to i32
    %c0_i32_4 = arith.constant 0 : i32
    %4 = arith.cmpi ne, %3, %c0_i32_4 : i32
    scf.if %4 {
      %cst_16 = arith.constant 0.000000e+00 : f32
      %20 = vector.broadcast %cst_16 : f32 to vector<4x768xf32>
      %c0_17 = arith.constant 0 : index
      %c0_18 = arith.constant 0 : index
      %21 = vector.load %arg15[%c0_17, %c0_18] : memref<4x768xf32, #tpu.memory_space<vmem>>, vector<4x768xf32>
      tpu.vector_store %arg15[%c0_17, %c0_18], %20 {strides = array<i32>} : memref<4x768xf32, #tpu.memory_space<vmem>>, vector<4x768xf32>,
      %cst_19 = arith.constant 0.000000e+00 : f32
      %22 = vector.broadcast %cst_19 : f32 to vector<4x1xf32>
      %c0_20 = arith.constant 0 : index
      %c0_21 = arith.constant 0 : index
      %23 = vector.load %arg16[%c0_20, %c0_21] : memref<4x1xf32, #tpu.memory_space<vmem>>, vector<4x1xf32>
      tpu.vector_store %arg16[%c0_20, %c0_21], %22 {strides = array<i32>} : memref<4x1xf32, #tpu.memory_space<vmem>>, vector<4x1xf32>,
      %24 = vector.extract_strided_slice %0 {offsets = [0, 0, 0], sizes = [4, 1, 768], strides = [1, 1, 1]} : vector<4x8x768xbf16> to vector<4x1x768xbf16>
      %25 = vector.shape_cast %24 : vector<4x1x768xbf16> to vector<4x768xbf16>
      %26 = arith.extf %25 : vector<4x768xbf16> to vector<4x768xf32>
      %c0_22 = arith.constant 0 : index
      %c0_23 = arith.constant 0 : index
      %27 = vector.load %arg14[%c0_22, %c0_23] : memref<4x768xf32, #tpu.memory_space<vmem>>, vector<4x768xf32>
      tpu.vector_store %arg14[%c0_22, %c0_23], %26 {strides = array<i32>} : memref<4x768xf32, #tpu.memory_space<vmem>>, vector<4x768xf32>,
    } else {
    }
    %5 = arith.truncf %1 : vector<4x8xf32> to vector<4x8xbf16>
    %6 = vector.shape_cast %5 : vector<4x8xbf16> to vector<4x1x8xbf16>
    "tpu.trace_start"() <{level = 10 : i32, message = "bqs,bsh->bqh"}> : () -> ()
    %cst = arith.constant dense<0.000000e+00> : vector<4x1x768xf32>
    %7 = tpu.matmul %6, %0, %cst {dimension_numbers = #tpu.dot_dimension_numbers<[2], [1], [1], [2], [0, 0, 0, 1, 1, 2], [0], [0]>} : vector<4x1x8xbf16>, vector<4x8x768xbf16>, vector<4x1x768xf32> -> vector<4x1x768xf32>
    "tpu.trace_stop"() : () -> ()
    %c0_5 = arith.constant 0 : index
    %c0_6 = arith.constant 0 : index
    %8 = vector.load %arg15[%c0_5, %c0_6] : memref<4x768xf32, #tpu.memory_space<vmem>>, vector<4x768xf32>
    %9 = vector.shape_cast %7 : vector<4x1x768xf32> to vector<4x768xf32>
    %10 = arith.addf %8, %9 : vector<4x768xf32>
    %c0_7 = arith.constant 0 : index
    %c0_8 = arith.constant 0 : index
    %11 = vector.load %arg15[%c0_7, %c0_8] : memref<4x768xf32, #tpu.memory_space<vmem>>, vector<4x768xf32>
    tpu.vector_store %arg15[%c0_7, %c0_8], %10 {strides = array<i32>} : memref<4x768xf32, #tpu.memory_space<vmem>>, vector<4x768xf32>,
    %c0_9 = arith.constant 0 : index
    %c0_10 = arith.constant 0 : index
    %12 = vector.load %arg16[%c0_9, %c0_10] : memref<4x1xf32, #tpu.memory_space<vmem>>, vector<4x1xf32>
    %cst_11 = arith.constant dense<0.000000e+00> : vector<4xf32>
    %13 = vector.multi_reduction <add>, %1, %cst_11 [1] : vector<4x8xf32> to vector<4xf32>
    %14 = vector.shape_cast %13 : vector<4xf32> to vector<4x1xf32>
    %15 = arith.addf %12, %14 : vector<4x1xf32>
    %c0_12 = arith.constant 0 : index
    %c0_13 = arith.constant 0 : index
    %16 = vector.load %arg16[%c0_12, %c0_13] : memref<4x1xf32, #tpu.memory_space<vmem>>, vector<4x1xf32>
    tpu.vector_store %arg16[%c0_12, %c0_13], %15 {strides = array<i32>} : memref<4x1xf32, #tpu.memory_space<vmem>>, vector<4x1xf32>,
    %c0_i32_14 = arith.constant 0 : i32
    %17 = arith.cmpi eq, %arg1, %c0_i32_14 : i32
    %18 = arith.extui %17 : i1 to i32
    %c0_i32_15 = arith.constant 0 : i32
    %19 = arith.cmpi ne, %18, %c0_i32_15 : i32
    scf.if %19 {
      %c0_16 = arith.constant 0 : index
      %c0_17 = arith.constant 0 : index
      %20 = vector.load %arg14[%c0_16, %c0_17] : memref<4x768xf32, #tpu.memory_space<vmem>>, vector<4x768xf32>
      %c0_18 = arith.constant 0 : index
      %c0_19 = arith.constant 0 : index
      %21 = vector.load %arg16[%c0_18, %c0_19] : memref<4x1xf32, #tpu.memory_space<vmem>>, vector<4x1xf32>
      %cst_20 = arith.constant 9.99999971E-10 : f32
      %22 = vector.broadcast %cst_20 : f32 to vector<4x1xf32>
      %23 = arith.maximumf %21, %22 : vector<4x1xf32>
      %c0_21 = arith.constant 0 : index
      %c0_22 = arith.constant 0 : index
      %24 = vector.load %arg15[%c0_21, %c0_22] : memref<4x768xf32, #tpu.memory_space<vmem>>, vector<4x768xf32>
      %25 = tpu.reciprocal %23 : vector<4x1xf32> -> vector<4x1xf32>
      %26 = vector.broadcast %25 : vector<4x1xf32> to vector<4x768xf32>
      %27 = arith.mulf %24, %26 : vector<4x768xf32>
      %c0_23 = arith.constant 0 : index
      %c0_24 = arith.constant 0 : index
      %28 = vector.load %arg4[%c0_23, %c0_24] : memref<768x512xf32, #tpu.memory_space<vmem>>, vector<768x512xf32>
      %cst_25 = arith.constant dense<0.000000e+00> : vector<4x512xf32>
      %29 = tpu.matmul %20, %28, %cst_25 {dimension_numbers = #tpu.dot_dimension_numbers<[1], [0], [0], [1], [0, 0, 1, 1], [], []>} : vector<4x768xf32>, vector<768x512xf32>, vector<4x512xf32> -> vector<4x512xf32>
      %c0_26 = arith.constant 0 : index
      %c0_27 = arith.constant 0 : index
      %30 = vector.load %arg5[%c0_26, %c0_27] : memref<768x512xf32, #tpu.memory_space<vmem>>, vector<768x512xf32>
      %cst_28 = arith.constant dense<0.000000e+00> : vector<4x512xf32>
      %31 = tpu.matmul %27, %30, %cst_28 {dimension_numbers = #tpu.dot_dimension_numbers<[1], [0], [0], [1], [0, 0, 1, 1], [], []>} : vector<4x768xf32>, vector<768x512xf32>, vector<4x512xf32> -> vector<4x512xf32>
      %32 = arith.addf %29, %31 : vector<4x512xf32>
      %c0_29 = arith.constant 0 : index
      %c0_30 = arith.constant 0 : index
      %33 = vector.load %arg6[%c0_29, %c0_30] : memref<1x512xf32, #tpu.memory_space<vmem>>, vector<1x512xf32>
      %34 = vector.broadcast %33 : vector<1x512xf32> to vector<4x512xf32>
      %35 = arith.addf %32, %34 : vector<4x512xf32>
      %c0_31 = arith.constant 0 : index
      %c0_32 = arith.constant 0 : index
      %36 = vector.load %arg7[%c0_31, %c0_32] : memref<1x512xf32, #tpu.memory_space<vmem>>, vector<1x512xf32>
      %c0_33 = arith.constant 0 : index
      %c0_34 = arith.constant 0 : index
      %37 = vector.load %arg8[%c0_33, %c0_34] : memref<1x512xf32, #tpu.memory_space<vmem>>, vector<1x512xf32>
      %cst_35 = arith.constant dense<0.000000e+00> : vector<4xf32>
      %38 = vector.multi_reduction <add>, %35, %cst_35 [1] : vector<4x512xf32> to vector<4xf32>
      %39 = vector.shape_cast %38 : vector<4xf32> to vector<4x1xf32>
      %cst_36 = arith.constant 5.120000e+02 : f32
      %40 = vector.broadcast %cst_36 : f32 to vector<4x1xf32>
      %41 = arith.divf %39, %40 : vector<4x1xf32>
      %42 = vector.broadcast %41 : vector<4x1xf32> to vector<4x512xf32>
      %43 = arith.subf %35, %42 : vector<4x512xf32>
      %44 = arith.mulf %43, %43 : vector<4x512xf32>
      %cst_37 = arith.constant dense<0.000000e+00> : vector<4xf32>
      %45 = vector.multi_reduction <add>, %44, %cst_37 [1] : vector<4x512xf32> to vector<4xf32>
      %46 = vector.shape_cast %45 : vector<4xf32> to vector<4x1xf32>
      %cst_38 = arith.constant 5.120000e+02 : f32
      %47 = vector.broadcast %cst_38 : f32 to vector<4x1xf32>
      %48 = arith.divf %46, %47 : vector<4x1xf32>
      %49 = vector.broadcast %41 : vector<4x1xf32> to vector<4x512xf32>
      %50 = arith.subf %35, %49 : vector<4x512xf32>
      %cst_39 = arith.constant 9.99999974E-6 : f32
      %51 = vector.broadcast %cst_39 : f32 to vector<4x1xf32>
      %52 = arith.addf %48, %51 : vector<4x1xf32>
      %53 = math.rsqrt %52 : vector<4x1xf32>
      %54 = vector.broadcast %53 : vector<4x1xf32> to vector<4x512xf32>
      %55 = arith.mulf %50, %54 : vector<4x512xf32>
      %56 = vector.broadcast %36 : vector<1x512xf32> to vector<4x512xf32>
      %57 = arith.mulf %55, %56 : vector<4x512xf32>
      %58 = vector.broadcast %37 : vector<1x512xf32> to vector<4x512xf32>
      %59 = arith.addf %57, %58 : vector<4x512xf32>
      %cst_40 = arith.constant 5.000000e-01 : f32
      %60 = vector.broadcast %cst_40 : f32 to vector<4x512xf32>
      %61 = arith.mulf %60, %59 : vector<4x512xf32>
      %cst_41 = arith.constant 0.707106769 : f32
      %62 = vector.broadcast %cst_41 : f32 to vector<4x512xf32>
      %63 = arith.mulf %59, %62 : vector<4x512xf32>
      %64 = math.erf %63 : vector<4x512xf32>
      %cst_42 = arith.constant 1.000000e+00 : f32
      %65 = vector.broadcast %cst_42 : f32 to vector<4x512xf32>
      %66 = arith.addf %65, %64 : vector<4x512xf32>
      %67 = arith.mulf %61, %66 : vector<4x512xf32>
      %c0_43 = arith.constant 0 : index
      %c0_44 = arith.constant 0 : index
      %68 = vector.load %arg9[%c0_43, %c0_44] : memref<512x256xf32, #tpu.memory_space<vmem>>, vector<512x256xf32>
      %cst_45 = arith.constant dense<0.000000e+00> : vector<4x256xf32>
      %69 = tpu.matmul %67, %68, %cst_45 {dimension_numbers = #tpu.dot_dimension_numbers<[1], [0], [0], [1], [0, 0, 1, 1], [], []>} : vector<4x512xf32>, vector<512x256xf32>, vector<4x256xf32> -> vector<4x256xf32>
      %c0_46 = arith.constant 0 : index
      %c0_47 = arith.constant 0 : index
      %70 = vector.load %arg10[%c0_46, %c0_47] : memref<1x256xf32, #tpu.memory_space<vmem>>, vector<1x256xf32>
      %71 = vector.broadcast %70 : vector<1x256xf32> to vector<4x256xf32>
      %72 = arith.addf %69, %71 : vector<4x256xf32>
      %c0_48 = arith.constant 0 : index
      %c0_49 = arith.constant 0 : index
      %73 = vector.load %arg11[%c0_48, %c0_49] : memref<1x256xf32, #tpu.memory_space<vmem>>, vector<1x256xf32>
      %c0_50 = arith.constant 0 : index
      %c0_51 = arith.constant 0 : index
      %74 = vector.load %arg12[%c0_50, %c0_51] : memref<1x256xf32, #tpu.memory_space<vmem>>, vector<1x256xf32>
      %cst_52 = arith.constant dense<0.000000e+00> : vector<4xf32>
      %75 = vector.multi_reduction <add>, %72, %cst_52 [1] : vector<4x256xf32> to vector<4xf32>
      %76 = vector.shape_cast %75 : vector<4xf32> to vector<4x1xf32>
      %cst_53 = arith.constant 2.560000e+02 : f32
      %77 = vector.broadcast %cst_53 : f32 to vector<4x1xf32>
      %78 = arith.divf %76, %77 : vector<4x1xf32>
      %79 = vector.broadcast %78 : vector<4x1xf32> to vector<4x256xf32>
      %80 = arith.subf %72, %79 : vector<4x256xf32>
      %81 = arith.mulf %80, %80 : vector<4x256xf32>
      %cst_54 = arith.constant dense<0.000000e+00> : vector<4xf32>
      %82 = vector.multi_reduction <add>, %81, %cst_54 [1] : vector<4x256xf32> to vector<4xf32>
      %83 = vector.shape_cast %82 : vector<4xf32> to vector<4x1xf32>
      %cst_55 = arith.constant 2.560000e+02 : f32
      %84 = vector.broadcast %cst_55 : f32 to vector<4x1xf32>
      %85 = arith.divf %83, %84 : vector<4x1xf32>
      %86 = vector.broadcast %78 : vector<4x1xf32> to vector<4x256xf32>
      %87 = arith.subf %72, %86 : vector<4x256xf32>
      %cst_56 = arith.constant 9.99999974E-6 : f32
      %88 = vector.broadcast %cst_56 : f32 to vector<4x1xf32>
      %89 = arith.addf %85, %88 : vector<4x1xf32>
      %90 = math.rsqrt %89 : vector<4x1xf32>
      %91 = vector.broadcast %90 : vector<4x1xf32> to vector<4x256xf32>
      %92 = arith.mulf %87, %91 : vector<4x256xf32>
      %93 = vector.broadcast %73 : vector<1x256xf32> to vector<4x256xf32>
      %94 = arith.mulf %92, %93 : vector<4x256xf32>
      %95 = vector.broadcast %74 : vector<1x256xf32> to vector<4x256xf32>
      %96 = arith.addf %94, %95 : vector<4x256xf32>
      %cst_57 = arith.constant 5.000000e-01 : f32
      %97 = vector.broadcast %cst_57 : f32 to vector<4x256xf32>
      %98 = arith.mulf %97, %96 : vector<4x256xf32>
      %cst_58 = arith.constant 0.707106769 : f32
      %99 = vector.broadcast %cst_58 : f32 to vector<4x256xf32>
      %100 = arith.mulf %96, %99 : vector<4x256xf32>
      %101 = math.erf %100 : vector<4x256xf32>
      %cst_59 = arith.constant 1.000000e+00 : f32
      %102 = vector.broadcast %cst_59 : f32 to vector<4x256xf32>
      %103 = arith.addf %102, %101 : vector<4x256xf32>
      %104 = arith.mulf %98, %103 : vector<4x256xf32>
      %c0_60 = arith.constant 0 : index
      %c0_61 = arith.constant 0 : index
      %105 = vector.load %arg13[%c0_60, %c0_61] : memref<4x256xf32, #tpu.memory_space<vmem>>, vector<4x256xf32>
      tpu.vector_store %arg13[%c0_60, %c0_61], %104 {strides = array<i32>} : memref<4x256xf32, #tpu.memory_space<vmem>>, vector<4x256xf32>,
    } else {
    }
    return
  }
  func.func @transform_0(%arg0: i32, %arg1: i32) -> (i32, i32, i32) {
    %c0_i32 = arith.constant 0 : i32
    %c0_i32_0 = arith.constant 0 : i32
    return %arg0, %arg1, %c0_i32 : i32, i32, i32
  }
  func.func @transform_1(%arg0: i32, %arg1: i32) -> (i32, i32) {
    %c0_i32 = arith.constant 0 : i32
    return %arg0, %arg1 : i32, i32
  }
  func.func @transform_2(%arg0: i32, %arg1: i32) -> (i32, i32) {
    %c0_i32 = arith.constant 0 : i32
    %c0_i32_0 = arith.constant 0 : i32
    %c0_i32_1 = arith.constant 0 : i32
    return %c0_i32, %c0_i32_0 : i32, i32
  }
  func.func @transform_3(%arg0: i32, %arg1: i32) -> (i32, i32) {
    %c0_i32 = arith.constant 0 : i32
    %c0_i32_0 = arith.constant 0 : i32
    %c0_i32_1 = arith.constant 0 : i32
    return %c0_i32, %c0_i32_0 : i32, i32
  }
  func.func @transform_4(%arg0: i32, %arg1: i32) -> (i32, i32) {
    %c0_i32 = arith.constant 0 : i32
    %c0_i32_0 = arith.constant 0 : i32
    %c0_i32_1 = arith.constant 0 : i32
    return %c0_i32, %c0_i32_0 : i32, i32
  }
  func.func @transform_5(%arg0: i32, %arg1: i32) -> (i32, i32) {
    %c0_i32 = arith.constant 0 : i32
    %c0_i32_0 = arith.constant 0 : i32
    %c0_i32_1 = arith.constant 0 : i32
    return %c0_i32, %c0_i32_0 : i32, i32
  }
  func.func @transform_6(%arg0: i32, %arg1: i32) -> (i32, i32) {
    %c0_i32 = arith.constant 0 : i32
    %c0_i32_0 = arith.constant 0 : i32
    %c0_i32_1 = arith.constant 0 : i32
    return %c0_i32, %c0_i32_0 : i32, i32
  }
  func.func @transform_7(%arg0: i32, %arg1: i32) -> (i32, i32) {
    %c0_i32 = arith.constant 0 : i32
    %c0_i32_0 = arith.constant 0 : i32
    %c0_i32_1 = arith.constant 0 : i32
    return %c0_i32, %c0_i32_0 : i32, i32
  }
  func.func @transform_8(%arg0: i32, %arg1: i32) -> (i32, i32) {
    %c0_i32 = arith.constant 0 : i32
    %c0_i32_0 = arith.constant 0 : i32
    %c0_i32_1 = arith.constant 0 : i32
    return %c0_i32, %c0_i32_0 : i32, i32
  }
  func.func @transform_9(%arg0: i32, %arg1: i32) -> (i32, i32) {
    %c0_i32 = arith.constant 0 : i32
    %c0_i32_0 = arith.constant 0 : i32
    %c0_i32_1 = arith.constant 0 : i32
    return %c0_i32, %c0_i32_0 : i32, i32
  }
  func.func @transform_10(%arg0: i32, %arg1: i32) -> (i32, i32) {
    %c0_i32 = arith.constant 0 : i32
    %c0_i32_0 = arith.constant 0 : i32
    %c0_i32_1 = arith.constant 0 : i32
    return %c0_i32, %c0_i32_0 : i32, i32
  }
  func.func @transform_11(%arg0: i32, %arg1: i32) -> (i32, i32) {
    %c0_i32 = arith.constant 0 : i32
    %c0_i32_0 = arith.constant 0 : i32
    return %arg0, %c0_i32 : i32, i32
  }
}

</mosaic_0001>

<bundles_post_ra>
// kernel: tpu_custom_call.1
= control target key start
LH: loop header
LB: loop body
LE: loop exit
PB: predicated region body
PF: predicated region fallthrough
CT: control target
= control target key end

     0   :  { %16 = vsyncpa [#allocation6], 0  ;;  %s5073_s0 = inlined_call_operand.hbm [shape: bf16[4,8,768], index: 0, kind: input, shape index: {}]   ;;  %s5074_s1 = inlined_call_operand.hbm [shape: f32[4,8], index: 1, kind: input, shape index: {}]   ;;  %s5075_s2 = inlined_call_operand.hbm [shape: f32[768,512], index: 2, kind: input, shape index: {}]   ;;  %s5076_s3 = inlined_call_operand.hbm [shape: f32[768,512], index: 3, kind: input, shape index: {}]   ;;  %s5077_s4 = inlined_call_operand.hbm [shape: f32[1,512], index: 4, kind: input, shape index: {}]   ;;  %s5078_s5 = inlined_call_operand.hbm [shape: f32[1,512], index: 5, kind: input, shape index: {}]   ;;  %s5079_s6 = inlined_call_operand.hbm [shape: f32[1,512], index: 6, kind: input, shape index: {}]   ;;  %s5080_s7 = inlined_call_operand.hbm [shape: f32[512,256], index: 7, kind: input, shape index: {}]   ;;  %s5081_s8 = inlined_call_operand.hbm [shape: f32[1,256], index: 8, kind: input, shape index: {}]   ;;  %s5082_s9 = inlined_call_operand.hbm [shape: f32[1,256], index: 9, kind: input, shape index: {}]   ;;  %s5083_s10 = inlined_call_operand.hbm [shape: f32[1,256], index: 10, kind: input, shape index: {}]   ;;  %s5084_s11 = inlined_call_operand.hbm [shape: f32[4,256], index: 11, kind: output, shape index: {}]  }
   0x1   :  { %17 = vsyncpa [#allocation9], 0 }
   0x2   :  { %18 = vsyncpa [#allocation12], 0 }
   0x3   :  { %19 = vsyncpa [#allocation15], 0 }
   0x4   :  { %20 = vsyncpa [#allocation18], 0 }
   0x5   :  { %21 = vsyncpa [#allocation21], 0 }
   0x6   :  { %22 = vsyncpa [#allocation7], 0  ;;  %s4557_s17 = smov [#allocation8]   ;;  %s4279_s21 = scalar_lea.hbm %s5074_s1, 64 }
   0x7   :  { %s41_s18 = sshll.u32 %s4557_s17, 4  ;;  %p4280_p0 = scmp.ne.s32.totalorder %s5074_s1, %s4279_s21  ;;  %s42_s18 = int_to_ptr.vmem [resolvable:$true] %s41_s18 }
   0x8   :  { %p4283_p1 = scmp.lt.u32.totalorder %s4279_s21, %s5074_s1 }
   0xa   :  { %p4285_p2 = pnand %p4283_p1, %p4280_p0 }
   0xc   :  { %4288 = shalt.err (!%p4285_p2)
}
   0xd   :  { %s4289_s26 = scalar_lea.vmem %s42_s18, 64  ;;  %p4294_p4 = scmp.lt.s32.totalorder %s42_s18, %s42_s18 }
   0xe   :  { %p4290_p3 = scmp.ne.s32.totalorder %s42_s18, %s4289_s26  ;;  %p4295_p5 = scmp.lt.s32.totalorder %s4289_s26, %s4289_s26 }
  0x10   :  { %p4296_p6 = por %p4295_p5, %p4294_p4 }
  0x12   :  { %p4297_p7 = pnand %p4296_p6, %p4290_p3 }
  0x14   :  { %4300 = shalt.err (!%p4297_p7)
}
  0x15   :  { %44 = dma.hbm_to_vmem [thread:$0]  %s5074_s1, 64, %s42_s18, [#allocation9]  }
  0x16   :  { %s4558_s29 = smov [#allocation11]   ;;  %s4559_s12 = smov [#allocation14]  }
  0x17   :  { %s62_s30 = sshll.u32 %s4558_s29, 4  ;;  %s85_s13 = sshll.u32 %s4559_s12, 4  ;;  %s63_s30 = int_to_ptr.vmem [resolvable:$true] %s62_s30  ;;  %s86_s13 = int_to_ptr.vmem [resolvable:$true] %s85_s13 }
  0x18   :  { %s4301_s16 = scalar_lea.hbm %s5076_s3, 49152 }
  0x19   :  { %p4302_p8 = scmp.ne.s32.totalorder %s5076_s3, %s4301_s16  ;;  %p4305_p9 = scmp.lt.u32.totalorder %s4301_s16, %s5076_s3 }
  0x1b   :  { %p4307_p10 = pnand %p4305_p9, %p4302_p8 }
  0x1d   :  { %4310 = shalt.err (!%p4307_p10)
}
  0x1e   :  { %s4311_s1 = scalar_lea.vmem %s63_s30, 49152  ;;  %p4316_p12 = scmp.lt.s32.totalorder %s63_s30, %s63_s30 }
  0x1f   :  { %p4312_p11 = scmp.ne.s32.totalorder %s63_s30, %s4311_s1  ;;  %p4317_p13 = scmp.lt.s32.totalorder %s4311_s1, %s4311_s1 }
  0x21   :  { %p4318_p0 = por %p4317_p13, %p4316_p12 }
  0x23   :  { %p4319_p1 = pnand %p4318_p0, %p4312_p11 }
  0x25   :  { %4322 = shalt.err (!%p4319_p1)
}
  0x26   :  { %s4560_s18 = smov 512   ;;  %s4561_s22 = smov 32  }
  0x27   :  { %68 = dma.hbm_to_vmem [thread:$0]  %s5076_s3, 49152, %s63_s30, [#allocation12], %s4560_s18, %s4560_s18, %s4561_s22  }
  0x28   :  { %s4323_s27 = scalar_lea.hbm %s5078_s5, 64 }
  0x29   :  { %p4324_p2 = scmp.ne.s32.totalorder %s5078_s5, %s4323_s27  ;;  %p4327_p3 = scmp.lt.u32.totalorder %s4323_s27, %s5078_s5 }
  0x2b   :  { %p4329_p4 = pnand %p4327_p3, %p4324_p2 }
  0x2d   :  { %4332 = shalt.err (!%p4329_p4)
}
  0x2e   :  { %s4333_s15 = scalar_lea.vmem %s86_s13, 64  ;;  %p4338_p6 = scmp.lt.s32.totalorder %s86_s13, %s86_s13 }
  0x2f   :  { %p4334_p5 = scmp.ne.s32.totalorder %s86_s13, %s4333_s15  ;;  %p4339_p7 = scmp.lt.s32.totalorder %s4333_s15, %s4333_s15 }
  0x31   :  { %p4340_p8 = por %p4339_p7, %p4338_p6 }
  0x33   :  { %p4341_p9 = pnand %p4340_p8, %p4334_p5 }
  0x35   :  { %4344 = shalt.err (!%p4341_p9)
}
  0x36   :  { %88 = dma.hbm_to_vmem [thread:$0]  %s5078_s5, 64, %s86_s13, [#allocation15]  }
  0x37   :  { %s4562_s16 = smov [#allocation17]   ;;  %s4345_s21 = scalar_lea.hbm %s5080_s7, 16384 }
  0x38   :  { %s104_s17 = sshll.u32 %s4562_s16, 4  ;;  %p4346_p10 = scmp.ne.s32.totalorder %s5080_s7, %s4345_s21  ;;  %s105_s17 = int_to_ptr.vmem [resolvable:$true] %s104_s17 }
  0x39   :  { %p4349_p11 = scmp.lt.u32.totalorder %s4345_s21, %s5080_s7 }
  0x3b   :  { %p4351_p12 = pnand %p4349_p11, %p4346_p10 }
  0x3d   :  { %4354 = shalt.err (!%p4351_p12)
}
  0x3e   :  { %s4355_s26 = scalar_lea.vmem %s105_s17, 16384  ;;  %p4360_p0 = scmp.lt.s32.totalorder %s105_s17, %s105_s17 }
  0x3f   :  { %p4356_p13 = scmp.ne.s32.totalorder %s105_s17, %s4355_s26  ;;  %p4361_p1 = scmp.lt.s32.totalorder %s4355_s26, %s4355_s26 }
  0x41   :  { %p4362_p2 = por %p4361_p1, %p4360_p0 }
  0x43   :  { %p4363_p3 = pnand %p4362_p2, %p4356_p13 }
  0x45   :  { %4366 = shalt.err (!%p4363_p3)
}
  0x46   :  { %s4563_s5 = smov 256   ;;  %s4564_s13 = smov 16  }
  0x47   :  { %110 = dma.hbm_to_vmem [thread:$0]  %s5080_s7, 16384, %s105_s17, [#allocation18], %s4563_s5, %s4563_s5, %s4564_s13  }
  0x48   :  { %s4565_s29 = smov [#allocation20]   ;;  %s4566_s14 = smov [#allocation5]  }
  0x49   :  { %s127_s12 = sshll.u32 %s4565_s29, 4  ;;  %s28_s15 = sshll.u32 %s4566_s14, 4  ;;  %s128_s12 = int_to_ptr.vmem [resolvable:$true] %s127_s12  ;;  %s4690_s15 = int_to_ptr.vmem [resolvable:$true] %s28_s15 }
  0x4a   :  { %s4367_s16 = scalar_lea.hbm %s5082_s9, 32 }
  0x4b   :  { %p4368_p4 = scmp.ne.s32.totalorder %s5082_s9, %s4367_s16  ;;  %p4371_p5 = scmp.lt.u32.totalorder %s4367_s16, %s5082_s9 }
  0x4d   :  { %p4373_p6 = pnand %p4371_p5, %p4368_p4 }
  0x4f   :  { %4376 = shalt.err (!%p4373_p6)
}
  0x50   :  { %s4377_s7 = scalar_lea.vmem %s128_s12, 32  ;;  %p4382_p8 = scmp.lt.s32.totalorder %s128_s12, %s128_s12 }
  0x51   :  { %p4378_p7 = scmp.ne.s32.totalorder %s128_s12, %s4377_s7  ;;  %p4383_p9 = scmp.lt.s32.totalorder %s4377_s7, %s4377_s7 }
  0x53   :  { %p4384_p10 = por %p4383_p9, %p4382_p8 }
  0x55   :  { %p4385_p11 = pnand %p4384_p10, %p4378_p7 }
  0x57   :  { %4388 = shalt.err (!%p4385_p11)
}
  0x58   :  { %130 = dma.hbm_to_vmem [thread:$0]  %s5082_s9, 32, %s128_s12, [#allocation21]  }
  0x59   :  { %s4389_s26 = scalar_lea.hbm %s5073_s0, 1536 }
  0x5a   :  { %p4390_p12 = scmp.ne.s32.totalorder %s5073_s0, %s4389_s26  ;;  %p4393_p13 = scmp.lt.u32.totalorder %s4389_s26, %s5073_s0 }
  0x5c   :  { %p4395_p0 = pnand %p4393_p13, %p4390_p12 }
  0x5e   :  { %4398 = shalt.err (!%p4395_p0)
}
  0x5f   :  { %s4399_s29 = scalar_lea.vmem %s4690_s15, 1536  ;;  %p4404_p2 = scmp.lt.s32.totalorder %s4690_s15, %s4690_s15 }
  0x60   :  { %p4400_p1 = scmp.ne.s32.totalorder %s4690_s15, %s4399_s29  ;;  %p4405_p3 = scmp.lt.s32.totalorder %s4399_s29, %s4399_s29 }
  0x62   :  { %p4406_p4 = por %p4405_p3, %p4404_p2 }
  0x64   :  { %p4407_p5 = pnand %p4406_p4, %p4400_p1 }
  0x66   :  { %4410 = shalt.err (!%p4407_p5)
}
  0x67   :  { %s4567_s9 = smov 384   ;;  %s4568_s12 = smov 24  }
  0x68   :  { %34 = dma.hbm_to_vmem [thread:$0]  %s5073_s0, 1536, %s4690_s15, [#allocation6], %s4567_s9, %s4567_s9, %s4568_s12  }
  0x69   :  { %s4569_s30 = smov [#allocation10]   ;;  %s4570_s19 = smov [#allocation13]  }
  0x6a   :  { %s50_s16 = sshll.u32 %s4569_s30, 4  ;;  %s75_s20 = sshll.u32 %s4570_s19, 4  ;;  %s51_s16 = int_to_ptr.vmem [resolvable:$true] %s50_s16  ;;  %s76_s20 = int_to_ptr.vmem [resolvable:$true] %s75_s20 }
  0x6b   :  { %s4411_s7 = scalar_lea.hbm %s5075_s2, 49152 }
  0x6c   :  { %p4412_p6 = scmp.ne.s32.totalorder %s5075_s2, %s4411_s7  ;;  %p4415_p7 = scmp.lt.u32.totalorder %s4411_s7, %s5075_s2 }
  0x6e   :  { %p4417_p8 = pnand %p4415_p7, %p4412_p6 }
  0x70   :  { %4420 = shalt.err (!%p4417_p8)
}
  0x71   :  { %s4421_s0 = scalar_lea.vmem %s51_s16, 49152  ;;  %p4426_p10 = scmp.lt.s32.totalorder %s51_s16, %s51_s16 }
  0x72   :  { %p4422_p9 = scmp.ne.s32.totalorder %s51_s16, %s4421_s0  ;;  %p4427_p11 = scmp.lt.s32.totalorder %s4421_s0, %s4421_s0 }
  0x74   :  { %p4428_p12 = por %p4427_p11, %p4426_p10 }
  0x76   :  { %p4429_p13 = pnand %p4428_p12, %p4422_p9 }
  0x78   :  { %4432 = shalt.err (!%p4429_p13)
}
  0x79   :  { %56 = dma.hbm_to_vmem [thread:$0]  %s5075_s2, 49152, %s51_s16, [#allocation9], %s4560_s18, %s4560_s18, %s4561_s22  }
  0x7a   :  { %s4433_s27 = scalar_lea.hbm %s5077_s4, 64 }
  0x7b   :  { %p4434_p0 = scmp.ne.s32.totalorder %s5077_s4, %s4433_s27  ;;  %p4437_p1 = scmp.lt.u32.totalorder %s4433_s27, %s5077_s4 }
  0x7d   :  { %p4439_p2 = pnand %p4437_p1, %p4434_p0 }
  0x7f   :  { %4442 = shalt.err (!%p4439_p2)
}
  0x80   :  { %s4443_s14 = scalar_lea.vmem %s76_s20, 64  ;;  %p4448_p4 = scmp.lt.s32.totalorder %s76_s20, %s76_s20 }
  0x81   :  { %p4444_p3 = scmp.ne.s32.totalorder %s76_s20, %s4443_s14  ;;  %p4449_p5 = scmp.lt.s32.totalorder %s4443_s14, %s4443_s14 }
  0x83   :  { %p4450_p6 = por %p4449_p5, %p4448_p4 }
  0x85   :  { %p4451_p7 = pnand %p4450_p6, %p4444_p3 }
  0x87   :  { %4454 = shalt.err (!%p4451_p7)
}
  0x88   :  { %78 = dma.hbm_to_vmem [thread:$0]  %s5077_s4, 64, %s76_s20, [#allocation12]  }
  0x89   :  { %s4571_s22 = smov [#allocation16]   ;;  %s4572_s30 = smov [#allocation19]  }
  0x8a   :  { %s95_s3 = sshll.u32 %s4571_s22, 4  ;;  %s117_s16 = sshll.u32 %s4572_s30, 4  ;;  %s96_s3 = int_to_ptr.vmem [resolvable:$true] %s95_s3  ;;  %s118_s16 = int_to_ptr.vmem [resolvable:$true] %s117_s16 }
  0x8b   :  { %s4455_s1 = scalar_lea.hbm %s5079_s6, 64 }
  0x8c   :  { %p4456_p8 = scmp.ne.s32.totalorder %s5079_s6, %s4455_s1  ;;  %p4459_p9 = scmp.lt.u32.totalorder %s4455_s1, %s5079_s6 }
  0x8e   :  { %p4461_p10 = pnand %p4459_p9, %p4456_p8 }
  0x90   :  { %4464 = shalt.err (!%p4461_p10)
}
  0x91   :  { %s4465_s4 = scalar_lea.vmem %s96_s3, 64  ;;  %p4470_p12 = scmp.lt.s32.totalorder %s96_s3, %s96_s3 }
  0x92   :  { %p4466_p11 = scmp.ne.s32.totalorder %s96_s3, %s4465_s4  ;;  %p4471_p13 = scmp.lt.s32.totalorder %s4465_s4, %s4465_s4 }
  0x94   :  { %p4472_p0 = por %p4471_p13, %p4470_p12 }
  0x96   :  { %p4473_p1 = pnand %p4472_p0, %p4466_p11 }
  0x98   :  { %4476 = shalt.err (!%p4473_p1)
}
  0x99   :  { %98 = dma.hbm_to_vmem [thread:$0]  %s5079_s6, 64, %s96_s3, [#allocation15]  }
  0x9a   :  { %s4477_s26 = scalar_lea.hbm %s5081_s8, 32 }
  0x9b   :  { %p4478_p2 = scmp.ne.s32.totalorder %s5081_s8, %s4477_s26  ;;  %p4481_p3 = scmp.lt.u32.totalorder %s4477_s26, %s5081_s8 }
  0x9d   :  { %p4483_p4 = pnand %p4481_p3, %p4478_p2 }
  0x9f   :  { %4486 = shalt.err (!%p4483_p4)
}
  0xa0   :  { %s4487_s29 = scalar_lea.vmem %s118_s16, 32  ;;  %p4492_p6 = scmp.lt.s32.totalorder %s118_s16, %s118_s16 }
  0xa1   :  { %p4488_p5 = scmp.ne.s32.totalorder %s118_s16, %s4487_s29  ;;  %p4493_p7 = scmp.lt.s32.totalorder %s4487_s29, %s4487_s29 }
  0xa3   :  { %p4494_p8 = por %p4493_p7, %p4492_p6 }
  0xa5   :  { %p4495_p9 = pnand %p4494_p8, %p4488_p5 }
  0xa7   :  { %4498 = shalt.err (!%p4495_p9)
}
  0xa8   :  { %120 = dma.hbm_to_vmem [thread:$0]  %s5081_s8, 32, %s118_s16, [#allocation18]  }
  0xa9   :  { %s4573_s12 = smov [#allocation22]   ;;  %s4499_s22 = scalar_lea.hbm %s5083_s10, 32 }
  0xaa   :  { %s137_s14 = sshll.u32 %s4573_s12, 4  ;;  %p4500_p10 = scmp.ne.s32.totalorder %s5083_s10, %s4499_s22  ;;  %s138_s14 = int_to_ptr.vmem [resolvable:$true] %s137_s14 }
  0xab   :  { %p4503_p11 = scmp.lt.u32.totalorder %s4499_s22, %s5083_s10 }
  0xad   :  { %p4505_p12 = pnand %p4503_p11, %p4500_p10 }
  0xaf   :  { %4508 = shalt.err (!%p4505_p12)
}
  0xb0   :  { %s4509_s1 = scalar_lea.vmem %s138_s14, 32  ;;  %p4514_p0 = scmp.lt.s32.totalorder %s138_s14, %s138_s14 }
  0xb1   :  { %p4510_p13 = scmp.ne.s32.totalorder %s138_s14, %s4509_s1  ;;  %p4515_p1 = scmp.lt.s32.totalorder %s4509_s1, %s4509_s1 }
  0xb3   :  { %p4516_p2 = por %p4515_p1, %p4514_p0 }
  0xb5   :  { %p4517_p3 = pnand %p4516_p2, %p4510_p13 }
  0xb7   :  { %4520 = shalt.err (!%p4517_p3)
}
  0xb8   :  { %140 = dma.hbm_to_vmem [thread:$0]  %s5083_s10, 32, %s138_s14, [#allocation21]  }
  0xb9   :  { %4543 = dma.done.wait [#allocation6], 1536  }
  0xba   :  { %4544 = vsyncadd [#allocation6], 4294965760 }
  0xbb   :  { %4545 = dma.done.wait [#allocation9], 49216  }
  0xbc   :  { %4546 = vsyncadd [#allocation9], 4294918080 }
  0xbd   :  { %4547 = dma.done.wait [#allocation12], 49216  }
  0xbe   :  { %4548 = vsyncadd [#allocation12], 4294918080 }
  0xbf   :  { %4549 = dma.done.wait [#allocation15], 128  }
  0xc0   :  { %4550 = vsyncadd [#allocation15], 4294967168 }
  0xc1   :  { %4551 = dma.done.wait [#allocation18], 16416  }
  0xc2   :  { %4552 = vsyncadd [#allocation18], 4294950880 }
  0xc3   :  { %4553 = dma.done.wait [#allocation21], 64  }
  0xc4   :  { %4554 = vsyncadd [#allocation21], 4294967232  ;;  %v301_v0 = vlaneseq  ;;  %v4574_v1 = vmov 1966171168   ;;  %vm195_vm0 = vcmask 3072   ;;  %v4575_v4 = vmov 0  }
  0xc5   :  { %v299_v2 = vunpack.c.l.s4 %v4574_v1  ;;  %399 = vmatprep.mubr.bf16.mxu0 %v4575_v4  ;;  %440 = vmatprep.mubr.bf16.mxu1 %v4575_v4  ;;  %v4576_v6 = vmov 0.0   ;;  %vm1064_vm1 = vcmask 60416   ;;  %v187_v8 = vld [vmem:[#allocation8] sm:$0xf]  ;;  %v177_v10 = vld [vmem:[#allocation5 + $0x10] sm:$0xff]  ;;  %vm348_vm2 = vcmask 1043456  }
  0xc6   :  { %v4784_v3 = vshrl.u32 %v301_v0, 7  ;;  %196 = vst.msk [vmem:[#allocation4] sm:$0xf] %vm195_vm0, %v4576_v6  ;;  %4227 = vset.pattern.permute.xlu0 %v4575_v4  ;;  %v4793_v9 = vld [vmem:[#allocation5] sm:$0xff]  ;;  %v1065_v11 = vsel %vm1064_vm1, %v187_v8, 0.0  ;;  %v296_v12 = vpack.c.bf16 %v187_v8, %v187_v8  ;;  %v176_v15 = vld [vmem:[#allocation5 + $0x8] sm:$0xff]  ;;  %v3241_v17 = vcombine.high %v177_v10, %v177_v10 }
  0xc7   :  { %v300_v5 = vunpack.c.0.s8 %v299_v2  ;;  %1066 = vadd.xlane.f32.xlu0 %v1065_v11  ;;  %v3237_v13 = vcombine.high %v4793_v9, %v4793_v9  ;;  %v3236_v14 = vcombine.low %v4793_v9, %v4793_v9  ;;  %v3240_v21 = vcombine.low %v177_v10, %v177_v10  ;;  %v179_v24 = vld [vmem:[#allocation5 + $0x20] sm:$0xff]  ;;  %v4808_v26 = vld [vmem:[#allocation5 + $0x18] sm:$0xff]  ;;  %v180_v34 = vld [vmem:[#allocation5 + $0x28] sm:$0xff]  ;;  %s4578_s10 = smov [#allocation23]  }
  0xc8   :  { %v4803_v19 = vsub.s32 0, %v4784_v3  ;;  %v3239_v22 = vcombine.high %v176_v15, %v176_v15  ;;  %v3238_v23 = vcombine.low %v176_v15, %v176_v15  ;;  %vm344_vm3 = vcmask 64512   ;;  %v4824_v37 = vld [vmem:[#allocation5 + $0x30] sm:$0xff]  ;;  %v182_v41 = vld [vmem:[#allocation5 + $0x38] sm:$0xff]  ;;  %v183_v49 = vld [vmem:[#allocation5 + $0x40] sm:$0xff]  ;;  %s3221_s7 = sshll.u32 %s4578_s10, 4  ;;  %s3222_s7 = int_to_ptr.vmem [resolvable:$true] %s3221_s7 }
  0xc9   :  { %v4791_v7 = vsub.s32 %v300_v5, %v4784_v3  ;;  %3242 = vmatprep.subr.msk.bf16.mxu0 %vm348_vm2, %v3237_v13  ;;  %v350_v18 = vsel %vm348_vm2, %v3236_v14, 0  ;;  %v362_v29 = vsel %vm348_vm2, %v3240_v21, 0  ;;  %v3251_v30 = vcombine.high %v179_v24, %v179_v24  ;;  %v184_v52 = vld [vmem:[#allocation5 + $0x48] sm:$0xff]  ;;  %v185_v59 = vld [vmem:[#allocation5 + $0x50] sm:$0xff]  ;;  %v186_v62 = vld [vmem:[#allocation5 + $0x58] sm:$0xff]  ;;  %s4521_s17 = scalar_lea.vmem %s3222_s7, 128  ;;  %p4526_p5 = scmp.lt.s32.totalorder %s3222_s7, %s3222_s7 }
  0xca   :  { %368 = vmatpush1.bf16.msra.mxu0 %v350_v18  ;;  %3244 = vmatprep.subr.msk.bf16.mxu1 %vm348_vm2, %v3239_v22  ;;  %v356_v27 = vsel %vm348_vm2, %v3238_v23, 0  ;;  %v3249_v31 = vcombine.high %v4808_v26, %v4808_v26  ;;  %v3248_v33 = vcombine.low %v4808_v26, %v4808_v26  ;;  %v3250_v35 = vcombine.low %v179_v24, %v179_v24  ;;  %v1611_v10 = vld [vmem:[#allocation11 + $0x408] sm:$0xff]  ;;  %v1614_v21 = vld [vmem:[#allocation11 + $0x420] sm:$0xff]  ;;  %p4522_p4 = scmp.ne.s32.totalorder %s3222_s7, %s4521_s17  ;;  %p4527_p6 = scmp.lt.s32.totalorder %s4521_s17, %s4521_s17 }
  0xcb   :  { %v304_v16 = vrot.slane %v296_v12, %v4791_v7  ;;  %3246 = vmatprep.subr.msk.bf16.mxu0 %vm348_vm2, %v3241_v17  ;;  %409 = vmatpush1.bf16.msra.mxu1 %v356_v27  ;;  %v3253_v38 = vcombine.high %v180_v34, %v180_v34  ;;  %v3252_v40 = vcombine.low %v180_v34, %v180_v34  ;;  %v1483_v11 = vld [vmem:[#allocation11 + $0x8] sm:$0xff]  ;;  %v1482_v24 = vld [vmem:[#allocation11] sm:$0xff]  ;;  %vm258_vm4 = vcmask 1041409  }
  0xcc   :  { %v514_v36 = vsel %vm348_vm2, %v3248_v33, 0  ;;  %3254 = vmatprep.subr.msk.bf16.mxu1 %vm348_vm2, %v3249_v31  ;;  %v520_v42 = vsel %vm348_vm2, %v3250_v35, 0  ;;  %v3262_v43 = vcombine.high %v4824_v37, %v4824_v37  ;;  %v3264_v47 = vcombine.high %v182_v41, %v182_v41  ;;  %v1487_v12 = vld [vmem:[#allocation11 + $0x28] sm:$0xff]  ;;  %v1494_v33 = vld [vmem:[#allocation11 + $0x60] sm:$0xff]  ;;  %p4528_p7 = por %p4527_p6, %p4526_p5 }
  0xcd   :  { %v312_v20 = vrot.slane %v304_v16, %v4791_v7  ;;  %v305_v44 = vcombine.high %v304_v16, %v304_v16  ;;  %v526_v46 = vsel %vm348_vm2, %v3252_v40, 0  ;;  %v3261_v48 = vcombine.low %v4824_v37, %v4824_v37  ;;  %v1615_v13 = vld [vmem:[#allocation11 + $0x428] sm:$0xff]  ;;  %v1618_v34 = vld [vmem:[#allocation11 + $0x440] sm:$0xff] }
  0xce   :  { %v3263_v51 = vcombine.low %v182_v41, %v182_v41  ;;  %v3266_v54 = vcombine.high %v183_v49, %v183_v49  ;;  %v3274_v57 = vcombine.high %v184_v52, %v184_v52  ;;  %v3265_v58 = vcombine.low %v183_v49, %v183_v49  ;;  %v1619_v22 = vld [vmem:[#allocation11 + $0x448] sm:$0xff]  ;;  %v1630_v49 = vld [vmem:[#allocation11 + $0x4a0] sm:$0xff]  ;;  %p4529_p8 = pnand %p4528_p7, %p4522_p4 }
  0xcf   :  { %v3235_v25 = vpack.i.b16 %v312_v20, %v312_v20  ;;  %v321_v32 = vunpack.i.h.s16 %v312_v20  ;;  %v319_v50 = vrot.slane %v305_v44, %v4791_v7  ;;  %v678_v53 = vsel %vm348_vm2, %v3261_v48, 0  ;;  %v1610_v20 = vld [vmem:[#allocation11 + $0x400] sm:$0xff]  ;;  %v1623_v23 = vld [vmem:[#allocation11 + $0x468] sm:$0xff] }
  0xd0   :  { %v684_v56 = vsel %vm348_vm2, %v3263_v51, 0  ;;  %v3273_v61 = vcombine.low %v184_v52, %v184_v52  ;;  %v690_v63 = vsel %vm348_vm2, %v3265_v58, 0  ;;  %v3276_v0 = vcombine.high %v185_v59, %v185_v59  ;;  %v1503_v40 = vld [vmem:[#allocation11 + $0xa8] sm:$0xff] }
  0xd1   :  { %v328_v28 = vrot.slane %v3235_v25, %v4803_v19  ;;  %v490_v39 = vpack.i.b16 %v321_v32, %v321_v32  ;;  %v3260_v55 = vpack.i.b16 %v319_v50, %v319_v50  ;;  %v323_v1 = vunpack.i.h.s16 %v319_v50  ;;  %v1486_v25 = vld [vmem:[#allocation11 + $0x20] sm:$0xff]  ;;  %v1627_v41 = vld [vmem:[#allocation11 + $0x488] sm:$0xff] }
  0xd2   :  { %v842_v2 = vsel %vm348_vm2, %v3273_v61, 0  ;;  %v3278_v5 = vcombine.high %v186_v62, %v186_v62  ;;  %v3275_v6 = vcombine.low %v185_v59, %v185_v59  ;;  %v3277_v8 = vcombine.low %v186_v62, %v186_v62  ;;  %v1507_v51 = vld [vmem:[#allocation11 + $0xc8] sm:$0xff]  ;;  %v1638_v61 = vld [vmem:[#allocation11 + $0x4e0] sm:$0xff] }
  0xd3   :  { %3243 = vmatmul.mubr.msk.bf16.vlgmr.msra.gmra.mrb[0].mxu0 %vm344_vm3, %v328_v28  ;;  %3245 = vmatmul.mubr.msk.bf16.vlgmr.msra.gmra.mrb[0].mxu1 %vm344_vm3, %v328_v28  ;;  %v494_v45 = vrot.slane %v490_v39, %v4803_v19  ;;  %v658_v60 = vrot.slane %v3260_v55, %v4803_v19  ;;  %v818_v7 = vpack.i.b16 %v323_v1, %v323_v1  ;;  %v1499_v39 = vld [vmem:[#allocation11 + $0x88] sm:$0xff]  ;;  %vm260_vm5 = vcmask 1045509  }
  0xd4   :  { %450 = vmatpush1.bf16.msra.mxu0 %v362_v29  ;;  %481 = vmatprep.mubr.bf16.mxu0 %v4575_v4  ;;  %v848_v14 = vsel %vm348_vm2, %v3275_v6, 0  ;;  %v3349_v15 = vpack.c.bf16 %v1615_v13, %v1611_v10  ;;  %v854_v17 = vsel %vm348_vm2, %v3277_v8, 0  ;;  %v3285_v18 = vpack.c.bf16 %v1487_v12, %v1483_v11  ;;  %v1495_v29 = vld [vmem:[#allocation11 + $0x68] sm:$0xff]  ;;  %v1514_v6 = vld [vmem:[#allocation11 + $0x100] sm:$0xff] }
  0xd5   :  { %3256 = vmatprep.subr.msk.bf16.mxu0 %vm348_vm2, %v3251_v30  ;;  %563 = vmatprep.mubr.bf16.mxu1 %v4575_v4  ;;  %v822_v16 = vrot.slane %v818_v7, %v4803_v19  ;;  %v3351_v27 = vpack.c.bf16 %v1614_v21, %v1610_v20  ;;  %v3353_v30 = vpack.c.bf16 %v1623_v23, %v1619_v22  ;;  %v1511_v52 = vld [vmem:[#allocation11 + $0xe8] sm:$0xff]  ;;  %v1518_v7 = vld [vmem:[#allocation11 + $0x120] sm:$0xff]  ;;  %vm263_vm6 = vcmask 1042434  }
  0xd6   :  { %532 = vmatpush1.bf16.msra.mxu1 %v514_v36  ;;  %v3287_v31 = vpack.c.bf16 %v1486_v25, %v1482_v24  ;;  %v1622_v36 = vld [vmem:[#allocation11 + $0x460] sm:$0xff]  ;;  %v1639_v55 = vld [vmem:[#allocation11 + $0x4e8] sm:$0xff]  ;;  %v3303_v10 = vpack.c.bf16 %v1518_v7, %v1514_v6  ;;  %vm265_vm7 = vcmask 1046534   ;;  %vm268_vm8 = vcmask 1043459  }
  0xd7   :  { %3258 = vmatprep.subr.msk.bf16.mxu1 %vm348_vm2, %v3253_v38  ;;  %v3355_v38 = vpack.c.bf16 %v1622_v36, %v1618_v34  ;;  %v1643_v1 = vld [vmem:[#allocation11 + $0x508] sm:$0xff]  ;;  %v1642_v11 = vld [vmem:[#allocation11 + $0x500] sm:$0xff]  ;;  %vm270_vm9 = vcmask 1047559  }
  0xd8   :  { %v1646_v12 = vld [vmem:[#allocation11 + $0x520] sm:$0xff] }
  0xd9   :  { %v3367_v13 = vpack.c.bf16 %v1646_v12, %v1642_v11  ;;  %v1522_v20 = vld [vmem:[#allocation11 + $0x140] sm:$0xff] }
  0xda   :  { %v1526_v21 = vld [vmem:[#allocation11 + $0x160] sm:$0xff] }
  0xdb   :  { %3247 = vmatmul.mubr.msk.bf16.vlgmr.msra.gmra.mrb[4].mxu0 %vm344_vm3, %v328_v28  ;;  %3255 = vmatmul.mubr.msk.bf16.vlgmr.msra.gmra.mrb[4].mxu1 %vm344_vm3, %v494_v45  ;;  %v1491_v28 = vld [vmem:[#allocation11 + $0x48] sm:$0xff]  ;;  %v3307_v23 = vpack.c.bf16 %v1526_v21, %v1522_v20  ;;  %v1650_v24 = vld [vmem:[#allocation11 + $0x540] sm:$0xff] }
  0xdc   :  { %573 = vmatpush1.bf16.msra.mxu0 %v520_v42  ;;  %604 = vmatprep.mubr.bf16.mxu0 %v4575_v4  ;;  %v3289_v32 = vpack.c.bf16 %v1495_v29, %v1491_v28  ;;  %v3293_v42 = vpack.c.bf16 %v1503_v40, %v1499_v39  ;;  %v1654_v25 = vld [vmem:[#allocation11 + $0x560] sm:$0xff]  ;;  %v1531_v28 = vld [vmem:[#allocation11 + $0x188] sm:$0xff] }
  0xdd   :  { %3267 = vmatprep.subr.msk.bf16.mxu0 %vm348_vm2, %v3262_v43  ;;  %614 = vmatpush1.bf16.msra.mxu1 %v526_v46  ;;  %v1631_v43 = vld [vmem:[#allocation11 + $0x4a8] sm:$0xff]  ;;  %v1502_v46 = vld [vmem:[#allocation11 + $0xa0] sm:$0xff] }
  0xde   :  { %645 = vmatprep.mubr.bf16.mxu1 %v4575_v4  ;;  %3269 = vmatprep.subr.msk.bf16.mxu1 %vm348_vm2, %v3264_v47  ;;  %v3357_v44 = vpack.c.bf16 %v1631_v43, %v1627_v41  ;;  %v1626_v47 = vld [vmem:[#allocation11 + $0x480] sm:$0xff]  ;;  %v1535_v29 = vld [vmem:[#allocation11 + $0x1a8] sm:$0xff] }
  0xdf   :  { %v3359_v50 = vpack.c.bf16 %v1630_v49, %v1626_v47  ;;  %v1658_v36 = vld [vmem:[#allocation11 + $0x580] sm:$0xff]  ;;  %v1539_v40 = vld [vmem:[#allocation11 + $0x1c8] sm:$0xff] }
  0xe0   :  { %v1543_v41 = vld [vmem:[#allocation11 + $0x1e8] sm:$0xff]  ;;  %v1666_v49 = vld [vmem:[#allocation11 + $0x5c0] sm:$0xff] }
  0xe1   :  { %v3313_v43 = vpack.c.bf16 %v1543_v41, %v1539_v40  ;;  %v1558_v11 = vld [vmem:[#allocation11 + $0x260] sm:$0xff]  ;;  %v1567_v20 = vld [vmem:[#allocation11 + $0x2a8] sm:$0xff] }
  0xe2   :  { %v1691_v21 = vld [vmem:[#allocation11 + $0x688] sm:$0xff]  ;;  %v1698_v40 = vld [vmem:[#allocation11 + $0x6c0] sm:$0xff] }
  0xe3   :  { %3257 = vmatmul.mubr.msk.bf16.vlgmr.msra.gmra.mrb[8].mxu0 %vm344_vm3, %v494_v45  ;;  %3259 = vmatmul.mubr.msk.bf16.vlgmr.msra.gmra.mrb[8].mxu1 %vm344_vm3, %v494_v45  ;;  %v1498_v45 = vld [vmem:[#allocation11 + $0x80] sm:$0xff] }
  0xe4   :  { %696 = vmatpush1.bf16.msra.mxu0 %v678_v53  ;;  %727 = vmatprep.mubr.bf16.mxu0 %v4575_v4  ;;  %v3295_v48 = vpack.c.bf16 %v1502_v46, %v1498_v45  ;;  %v1635_v53 = vld [vmem:[#allocation11 + $0x4c8] sm:$0xff]  ;;  %v1538_v45 = vld [vmem:[#allocation11 + $0x1c0] sm:$0xff] }
  0xe5   :  { %3271 = vmatprep.subr.msk.bf16.mxu0 %vm348_vm2, %v3266_v54  ;;  %737 = vmatpush1.bf16.msra.mxu1 %v684_v56  ;;  %v3297_v54 = vpack.c.bf16 %v1511_v52, %v1507_v51  ;;  %v1506_v56 = vld [vmem:[#allocation11 + $0xc0] sm:$0xff]  ;;  %v3361_v58 = vpack.c.bf16 %v1639_v55, %v1635_v53  ;;  %v1547_v52 = vld [vmem:[#allocation11 + $0x208] sm:$0xff] }
  0xe6   :  { %768 = vmatprep.mubr.bf16.mxu1 %v4575_v4  ;;  %3279 = vmatprep.subr.msk.bf16.mxu1 %vm348_vm2, %v3274_v57  ;;  %v1510_v57 = vld [vmem:[#allocation11 + $0xe0] sm:$0xff]  ;;  %v1551_v53 = vld [vmem:[#allocation11 + $0x228] sm:$0xff] }
  0xe7   :  { %v3299_v59 = vpack.c.bf16 %v1510_v57, %v1506_v56  ;;  %v1542_v46 = vld [vmem:[#allocation11 + $0x1e0] sm:$0xff]  ;;  %v3317_v55 = vpack.c.bf16 %v1551_v53, %v1547_v52  ;;  %v1679_v56 = vld [vmem:[#allocation11 + $0x628] sm:$0xff] }
  0xe8   :  { %v1546_v57 = vld [vmem:[#allocation11 + $0x200] sm:$0xff] }
  0xe9   :  { %v1702_v41 = vld [vmem:[#allocation11 + $0x6e0] sm:$0xff] }
  0xea   :  { %v1706_v52 = vld [vmem:[#allocation11 + $0x700] sm:$0xff] }
  0xeb   :  { %3268 = vmatmul.mubr.msk.bf16.vlgmr.msra.gmra.mrb[12].mxu0 %vm344_vm3, %v658_v60  ;;  %3270 = vmatmul.mubr.msk.bf16.vlgmr.msra.gmra.mrb[12].mxu1 %vm344_vm3, %v658_v60  ;;  %v1710_v53 = vld [vmem:[#allocation11 + $0x720] sm:$0xff] }
  0xec   :  { %778 = vmatpush1.bf16.msra.mxu0 %v690_v63  ;;  %809 = vmatprep.mubr.bf16.mxu0 %v4575_v4  ;;  %v1515_v63 = vld [vmem:[#allocation11 + $0x108] sm:$0xff] }
  0xed   :  { %3281 = vmatprep.subr.msk.bf16.mxu0 %vm348_vm2, %v3276_v0  ;;  %860 = vmatpush1.bf16.msra.mxu1 %v842_v2  ;;  %v1519_v0 = vld [vmem:[#allocation11 + $0x128] sm:$0xff] }
  0xee   :  { %891 = vmatprep.mubr.bf16.mxu1 %v4575_v4  ;;  %3283 = vmatprep.subr.msk.bf16.mxu1 %vm348_vm2, %v3278_v5  ;;  %v3301_v2 = vpack.c.bf16 %v1519_v0, %v1515_v63  ;;  %v1647_v5 = vld [vmem:[#allocation11 + $0x528] sm:$0xff]  ;;  %v1063_v63 = vld [vmem:[#allocation4] sm:$0xf] }
  0xef   :  { %v3365_v8 = vpack.c.bf16 %v1647_v5, %v1643_v1  ;;  %v1555_v1 = vld [vmem:[#allocation11 + $0x248] sm:$0xff] }
  0xf0   :  { %v1683_v5 = vld [vmem:[#allocation11 + $0x648] sm:$0xff] }
  0xf3   :  { %3272 = vmatmul.mubr.msk.bf16.vlgmr.msra.gmra.mrb[16].mxu0 %vm344_vm3, %v658_v60  ;;  %3280 = vmatmul.mubr.msk.bf16.vlgmr.msra.gmra.mrb[16].mxu1 %vm344_vm3, %v822_v16  ;;  %v1634_v60 = vld [vmem:[#allocation11 + $0x4c0] sm:$0xff] }
  0xf4   :  { %901 = vmatpush1.bf16.msra.mxu0 %v848_v14  ;;  %932 = vmatprep.mubr.bf16.mxu0 %v4575_v4  ;;  %v3363_v62 = vpack.c.bf16 %v1638_v61, %v1634_v60  ;;  %v1523_v14 = vld [vmem:[#allocation11 + $0x148] sm:$0xff]  ;;  %v1674_v61 = vld [vmem:[#allocation11 + $0x600] sm:$0xff] }
  0xf5   :  { %3350 = vmatprep.subr.bf16.mxu0 %v3349_v15  ;;  %942 = vmatpush1.bf16.msra.mxu1 %v854_v17  ;;  %v1527_v15 = vld [vmem:[#allocation11 + $0x168] sm:$0xff] }
  0xf6   :  { %973 = vmatprep.mubr.bf16.mxu1 %v4575_v4  ;;  %3286 = vmatprep.subr.bf16.mxu1 %v3285_v18  ;;  %v1490_v4 = vld [vmem:[#allocation11 + $0x40] sm:$0xff]  ;;  %v3305_v17 = vpack.c.bf16 %v1527_v15, %v1523_v14  ;;  %v1655_v18 = vld [vmem:[#allocation11 + $0x568] sm:$0xff] }
  0xf7   :  { %v3291_v35 = vpack.c.bf16 %v1494_v33, %v1490_v4  ;;  %v1530_v4 = vld [vmem:[#allocation11 + $0x180] sm:$0xff] }
  0xf8   :  { %v1534_v33 = vld [vmem:[#allocation11 + $0x1a0] sm:$0xff] }
  0xf9   :  { %v1682_v15 = vld [vmem:[#allocation11 + $0x640] sm:$0xff] }
  0xfb   :  { %3282 = vmatmul.mubr.msk.bf16.vlgmr.msra.gmra.mrb[20].mxu0 %vm344_vm3, %v822_v16  ;;  %3284 = vmatmul.mubr.msk.bf16.vlgmr.msra.gmra.mrb[20].mxu1 %vm344_vm3, %v822_v16  ;;  %v1651_v16 = vld [vmem:[#allocation11 + $0x548] sm:$0xff] }
  0xfc   :  { %3352 = vmatpush1.bf16.msra.mxu0 %v3351_v27  ;;  %3288 = vmatpush1.bf16.msra.mxu1 %v3287_v31  ;;  %v3369_v22 = vpack.c.bf16 %v1655_v18, %v1651_v16  ;;  %v3371_v27 = vpack.c.bf16 %v1654_v25, %v1650_v24  ;;  %v3309_v31 = vpack.c.bf16 %v1535_v29, %v1531_v28  ;;  %v1686_v16 = vld [vmem:[#allocation11 + $0x660] sm:$0xff] }
  0xfd   :  { %3354 = vmatprep.subr.bf16.mxu0 %v3353_v30  ;;  %3290 = vmatprep.subr.bf16.mxu1 %v3289_v32  ;;  %v1659_v30 = vld [vmem:[#allocation11 + $0x588] sm:$0xff]  ;;  %v3387_v18 = vpack.c.bf16 %v1686_v16, %v1682_v15  ;;  %v1562_v25 = vld [vmem:[#allocation11 + $0x280] sm:$0xff] }
  0xfe   :  { %v1663_v32 = vld [vmem:[#allocation11 + $0x5a8] sm:$0xff]  ;;  %v1690_v28 = vld [vmem:[#allocation11 + $0x680] sm:$0xff] }
  0xff   :  { %v3373_v34 = vpack.c.bf16 %v1663_v32, %v1659_v30  ;;  %v1694_v30 = vld [vmem:[#allocation11 + $0x6a0] sm:$0xff]  ;;  %v1575_v32 = vld [vmem:[#allocation11 + $0x2e8] sm:$0xff] }
 0x100   :  { %3292 = vmatpush1.bf16.msra.mxu1 %v3291_v35  ;;  %3356 = vmatpush1.bf16.msra.mxu0 %v3355_v38  ;;  %v3311_v35 = vpack.c.bf16 %v1534_v33, %v1530_v4  ;;  %v1662_v38 = vld [vmem:[#allocation11 + $0x5a0] sm:$0xff]  ;;  %v3391_v4 = vpack.c.bf16 %v1694_v30, %v1690_v28  ;;  %v1735_v28 = vld [vmem:[#allocation11 + $0x7e8] sm:$0xff] }
 0x101   :  { %3294 = vmatprep.subr.bf16.mxu1 %v3293_v42  ;;  %3358 = vmatprep.subr.bf16.mxu0 %v3357_v44  ;;  %v3375_v39 = vpack.c.bf16 %v1662_v38, %v1658_v36  ;;  %v1667_v42 = vld [vmem:[#allocation11 + $0x5c8] sm:$0xff]  ;;  %v1570_v36 = vld [vmem:[#allocation11 + $0x2c0] sm:$0xff] }
 0x102   :  { %v1671_v44 = vld [vmem:[#allocation11 + $0x5e8] sm:$0xff]  ;;  %v1594_v15 = vld [vmem:[#allocation11 + $0x380] sm:$0xff] }
 0x103   :  { %v3377_v47 = vpack.c.bf16 %v1671_v44, %v1667_v42  ;;  %v1583_v44 = vld [vmem:[#allocation11 + $0x328] sm:$0xff]  ;;  %v1598_v16 = vld [vmem:[#allocation11 + $0x3a0] sm:$0xff] }
 0x104   :  { %3296 = vmatpush1.bf16.msra.mxu1 %v3295_v48  ;;  %3360 = vmatpush1.bf16.msra.mxu0 %v3359_v50  ;;  %v3315_v48 = vpack.c.bf16 %v1542_v46, %v1538_v45  ;;  %v1670_v50 = vld [vmem:[#allocation11 + $0x5e0] sm:$0xff]  ;;  %v1707_v45 = vld [vmem:[#allocation11 + $0x708] sm:$0xff]  ;;  %v3395_v46 = vpack.c.bf16 %v1702_v41, %v1698_v40  ;;  %v1489_v40 = vld [vmem:[#allocation11 + $0x38] sm:$0xff] }
 0x105   :  { %3298 = vmatprep.subr.bf16.mxu1 %v3297_v54  ;;  %3362 = vmatprep.subr.bf16.mxu0 %v3361_v58  ;;  %v3379_v51 = vpack.c.bf16 %v1670_v50, %v1666_v49  ;;  %v1675_v54 = vld [vmem:[#allocation11 + $0x608] sm:$0xff]  ;;  %v1550_v58 = vld [vmem:[#allocation11 + $0x220] sm:$0xff] }
 0x106   :  { %v3319_v60 = vpack.c.bf16 %v1550_v58, %v1546_v57  ;;  %v1578_v49 = vld [vmem:[#allocation11 + $0x300] sm:$0xff]  ;;  %v1715_v57 = vld [vmem:[#allocation11 + $0x748] sm:$0xff] }
 0x107   :  { %v1582_v50 = vld [vmem:[#allocation11 + $0x320] sm:$0xff] }
 0x108   :  { %3300 = vmatpush1.bf16.msra.mxu1 %v3299_v59  ;;  %3364 = vmatpush1.bf16.msra.mxu0 %v3363_v62  ;;  %v3381_v59 = vpack.c.bf16 %v1679_v56, %v1675_v54  ;;  %v1678_v62 = vld [vmem:[#allocation11 + $0x620] sm:$0xff]  ;;  %v1587_v54 = vld [vmem:[#allocation11 + $0x348] sm:$0xff] }
 0x109   :  { %3302 = vmatprep.subr.bf16.mxu1 %v3301_v2  ;;  %3366 = vmatprep.subr.bf16.mxu0 %v3365_v8  ;;  %v3383_v0 = vpack.c.bf16 %v1678_v62, %v1674_v61  ;;  %v1559_v2 = vld [vmem:[#allocation11 + $0x268] sm:$0xff]  ;;  %v3399_v61 = vpack.c.bf16 %v1710_v53, %v1706_v52  ;;  %v1606_v30 = vld [vmem:[#allocation11 + $0x3e0] sm:$0xff] }
 0x10a   :  { %v3321_v7 = vpack.c.bf16 %v1559_v2, %v1555_v1  ;;  %v1687_v8 = vld [vmem:[#allocation11 + $0x668] sm:$0xff]  ;;  %v1714_v1 = vld [vmem:[#allocation11 + $0x740] sm:$0xff] }
 0x10b   :  { %v1591_v56 = vld [vmem:[#allocation11 + $0x368] sm:$0xff] }
 0x10c   :  { %3304 = vmatpush1.bf16.msra.mxu1 %v3303_v10  ;;  %3368 = vmatpush1.bf16.msra.mxu0 %v3367_v13  ;;  %v1554_v10 = vld [vmem:[#allocation11 + $0x240] sm:$0xff]  ;;  %v3385_v13 = vpack.c.bf16 %v1687_v8, %v1683_v5  ;;  %v3337_v62 = vpack.c.bf16 %v1591_v56, %v1587_v54  ;;  %v1723_v8 = vld [vmem:[#allocation11 + $0x788] sm:$0xff] }
 0x10d   :  { %3306 = vmatprep.subr.bf16.mxu1 %v3305_v17  ;;  %3370 = vmatprep.subr.bf16.mxu0 %v3369_v22  ;;  %v3323_v14 = vpack.c.bf16 %v1558_v11, %v1554_v10  ;;  %v1563_v17 = vld [vmem:[#allocation11 + $0x288] sm:$0xff]  ;;  %v1718_v5 = vld [vmem:[#allocation11 + $0x760] sm:$0xff] }
 0x10e   :  { %v1695_v22 = vld [vmem:[#allocation11 + $0x6a8] sm:$0xff] }
 0x10f   :  { %v3389_v24 = vpack.c.bf16 %v1695_v22, %v1691_v21  ;;  %v1727_v10 = vld [vmem:[#allocation11 + $0x7a8] sm:$0xff] }
 0x110   :  { %3308 = vmatpush1.bf16.msra.mxu1 %v3307_v23  ;;  %3372 = vmatpush1.bf16.msra.mxu0 %v3371_v27  ;;  %v3325_v23 = vpack.c.bf16 %v1567_v20, %v1563_v17  ;;  %v1566_v27 = vld [vmem:[#allocation11 + $0x2a0] sm:$0xff] }
 0x111   :  { %3310 = vmatprep.subr.bf16.mxu1 %v3309_v31  ;;  %3374 = vmatprep.subr.bf16.mxu0 %v3373_v34  ;;  %v3327_v29 = vpack.c.bf16 %v1566_v27, %v1562_v25  ;;  %v1571_v31 = vld [vmem:[#allocation11 + $0x2c8] sm:$0xff]  ;;  %v1722_v17 = vld [vmem:[#allocation11 + $0x780] sm:$0xff] }
 0x112   :  { %v3329_v33 = vpack.c.bf16 %v1575_v32, %v1571_v31  ;;  %v1699_v34 = vld [vmem:[#allocation11 + $0x6c8] sm:$0xff]  ;;  %v1726_v20 = vld [vmem:[#allocation11 + $0x7a0] sm:$0xff] }
 0x113   :  { %v3407_v21 = vpack.c.bf16 %v1726_v20, %v1722_v17  ;;  %v1731_v25 = vld [vmem:[#allocation11 + $0x7c8] sm:$0xff] }
 0x114   :  { %3312 = vmatpush1.bf16.msra.mxu1 %v3311_v35  ;;  %3376 = vmatpush1.bf16.msra.mxu0 %v3375_v39  ;;  %v1703_v35 = vld [vmem:[#allocation11 + $0x6e8] sm:$0xff]  ;;  %v1574_v39 = vld [vmem:[#allocation11 + $0x2e0] sm:$0xff]  ;;  %v3409_v31 = vpack.c.bf16 %v1735_v28, %v1731_v25 }
 0x115   :  { %3314 = vmatprep.subr.bf16.mxu1 %v3313_v43  ;;  %3378 = vmatprep.subr.bf16.mxu0 %v3377_v47  ;;  %v3393_v38 = vpack.c.bf16 %v1703_v35, %v1699_v34  ;;  %v3331_v42 = vpack.c.bf16 %v1574_v39, %v1570_v36  ;;  %v1579_v43 = vld [vmem:[#allocation11 + $0x308] sm:$0xff] }
 0x116   :  { %v3333_v47 = vpack.c.bf16 %v1583_v44, %v1579_v43  ;;  %v1739_v35 = vld [vmem:[#allocation11 + $0x808] sm:$0xff] }
 0x117   :  { %v1743_v36 = vld [vmem:[#allocation11 + $0x828] sm:$0xff] }
 0x118   :  { %3316 = vmatpush1.bf16.msra.mxu1 %v3315_v48  ;;  %3380 = vmatpush1.bf16.msra.mxu0 %v3379_v51  ;;  %v1711_v48 = vld [vmem:[#allocation11 + $0x728] sm:$0xff]  ;;  %v3413_v39 = vpack.c.bf16 %v1743_v36, %v1739_v35 }
 0x119   :  { %3318 = vmatprep.subr.bf16.mxu1 %v3317_v55  ;;  %3382 = vmatprep.subr.bf16.mxu0 %v3381_v59  ;;  %v3397_v51 = vpack.c.bf16 %v1711_v48, %v1707_v45  ;;  %v3335_v59 = vpack.c.bf16 %v1582_v50, %v1578_v49 }
 0x11c   :  { %3320 = vmatpush1.bf16.msra.mxu1 %v3319_v60  ;;  %3384 = vmatpush1.bf16.msra.mxu0 %v3383_v0  ;;  %v1719_v60 = vld [vmem:[#allocation11 + $0x768] sm:$0xff]  ;;  %v1590_v0 = vld [vmem:[#allocation11 + $0x360] sm:$0xff] }
 0x11d   :  { %3322 = vmatprep.subr.bf16.mxu1 %v3321_v7  ;;  %3386 = vmatprep.subr.bf16.mxu0 %v3385_v13  ;;  %v3401_v2 = vpack.c.bf16 %v1719_v60, %v1715_v57  ;;  %v1599_v7 = vld [vmem:[#allocation11 + $0x3a8] sm:$0xff] }
 0x120   :  { %3324 = vmatpush1.bf16.msra.mxu1 %v3323_v14  ;;  %3388 = vmatpush1.bf16.msra.mxu0 %v3387_v18  ;;  %v3405_v14 = vpack.c.bf16 %v1727_v10, %v1723_v8  ;;  %v3343_v18 = vpack.c.bf16 %v1598_v16, %v1594_v15 }
 0x121   :  { %3326 = vmatprep.subr.bf16.mxu1 %v3325_v23  ;;  %3390 = vmatprep.subr.bf16.mxu0 %v3389_v24  ;;  %v1603_v23 = vld [vmem:[#allocation11 + $0x3c8] sm:$0xff] }
 0x122   :  { %v1607_v24 = vld [vmem:[#allocation11 + $0x3e8] sm:$0xff] }
 0x123   :  { %v3345_v27 = vpack.c.bf16 %v1607_v24, %v1603_v23 }
 0x124   :  { %3328 = vmatpush1.bf16.msra.mxu1 %v3327_v29  ;;  %3392 = vmatpush1.bf16.msra.mxu0 %v3391_v4  ;;  %v1602_v29 = vld [vmem:[#allocation11 + $0x3c0] sm:$0xff] }
 0x125   :  { %3330 = vmatprep.subr.bf16.mxu1 %v3329_v33  ;;  %3394 = vmatprep.subr.bf16.mxu0 %v3393_v38  ;;  %v3347_v32 = vpack.c.bf16 %v1606_v30, %v1602_v29  ;;  %v1730_v4 = vld [vmem:[#allocation11 + $0x7c0] sm:$0xff]  ;;  %v1485_v38 = vld [vmem:[#allocation11 + $0x18] sm:$0xff] }
 0x126   :  { %v1734_v33 = vld [vmem:[#allocation11 + $0x7e0] sm:$0xff]  ;;  %v3477_v41 = vpack.c.bf16 %v1489_v40, %v1485_v38 }
 0x127   :  { %v3411_v34 = vpack.c.bf16 %v1734_v33, %v1730_v4 }
 0x128   :  { %3332 = vmatpush1.bf16.msra.mxu1 %v3331_v42  ;;  %3396 = vmatpush1.bf16.msra.mxu0 %v3395_v46 }
 0x129   :  { %3334 = vmatprep.subr.bf16.mxu1 %v3333_v47  ;;  %3398 = vmatprep.subr.bf16.mxu0 %v3397_v51 }
 0x12c   :  { %3336 = vmatpush1.bf16.msra.mxu1 %v3335_v59  ;;  %3400 = vmatpush1.bf16.msra.mxu0 %v3399_v61 }
 0x12d   :  { %3338 = vmatprep.subr.bf16.mxu1 %v3337_v62  ;;  %3402 = vmatprep.subr.bf16.mxu0 %v3401_v2 }
 0x154   :  { %v1067_v6 = vpop.xlane.xlu0 %1066 }
 0x155   :  { %v1068_v12 = vadd.f32 %v1067_v6, %v1063_v63  ;;  %v1586_v63 = vld [vmem:[#allocation11 + $0x340] sm:$0xff]  ;;  %v1595_v6 = vld [vmem:[#allocation11 + $0x388] sm:$0xff] }
 0x156   :  { %v3339_v11 = vpack.c.bf16 %v1590_v0, %v1586_v63  ;;  %v3341_v13 = vpack.c.bf16 %v1599_v7, %v1595_v6 }
 0x157   :  { %1070 = vst.msk [vmem:[#allocation4] sm:$0xf] %vm195_vm0, %v1068_v12  ;;  %v3403_v12 = vpack.c.bf16 %v1718_v5, %v1714_v1 }
 0x158   :  { %3340 = vmatpush1.bf16.msra.mxu1 %v3339_v11 }
 0x159   :  { %3404 = vmatpush1.bf16.msra.mxu0 %v3403_v12  ;;  %3342 = vmatprep.subr.bf16.mxu1 %v3341_v13 }
 0x15a   :  { %3406 = vmatprep.subr.bf16.mxu0 %v3405_v14 }
 0x15c   :  { %3344 = vmatpush1.bf16.msra.mxu1 %v3343_v18 }
 0x15d   :  { %3408 = vmatpush1.bf16.msra.mxu0 %v3407_v21  ;;  %3346 = vmatprep.subr.bf16.mxu1 %v3345_v27 }
 0x15e   :  { %v1077_v55 = vld [vmem:[#allocation4] sm:$0xf]  ;;  %3410 = vmatprep.subr.bf16.mxu0 %v3409_v31 }
 0x15f   :  { %v1078_v58 = vmax.f32 %v1077_v55, 1e-09 }
 0x160   :  { %3348 = vmatpush1.bf16.msra.mxu1 %v3347_v32 }
 0x161   :  { %4252 = vrcp.f32 %v1078_v58  ;;  %3412 = vmatpush1.bf16.msra.mxu0 %v3411_v34  ;;  %3478 = vmatprep.subr.bf16.mxu1 %v3477_v41 }
 0x162   :  { %3414 = vmatprep.subr.bf16.mxu0 %v3413_v39 }
 0x16b   :  { %v4253_v22 = vpop.eup %4252 }
 0x16c   :  { %1085 = vperm.xlu0 %4227, %v4253_v22  }
 0x1a6   :  { %v401_v42 = vpop.f32.mrb[0].mxu0  ;;  %v442_v46 = vpop.f32.mrb[0].mxu1 }
 0x1a7   :  { %v403_v43 = vpop.f32.mrb[1].mxu0  ;;  %v444_v48 = vpop.f32.mrb[1].mxu1 }
 0x1a8   :  { %v1009_v44 = vcombine.low %v401_v42, %v403_v43  ;;  %v405_v45 = vpop.f32.mrb[2].mxu0  ;;  %v1010_v49 = vcombine.low %v442_v46, %v444_v48  ;;  %v446_v50 = vpop.f32.mrb[2].mxu1 }
 0x1a9   :  { %v406_v47 = vpop.f32.mrb[3].mxu0  ;;  %v447_v51 = vpop.f32.mrb[3].mxu1 }
 0x1ae   :  { %v483_v52 = vpop.f32.mrb[4].mxu0  ;;  %v565_v56 = vpop.f32.mrb[4].mxu1 }
 0x1af   :  { %v485_v53 = vpop.f32.mrb[5].mxu0  ;;  %v567_v58 = vpop.f32.mrb[5].mxu1 }
 0x1b0   :  { %v1011_v54 = vcombine.low %v483_v52, %v485_v53  ;;  %v487_v55 = vpop.f32.mrb[6].mxu0  ;;  %v1012_v59 = vcombine.low %v565_v56, %v567_v58  ;;  %v569_v60 = vpop.f32.mrb[6].mxu1 }
 0x1b1   :  { %v488_v57 = vpop.f32.mrb[7].mxu0  ;;  %v570_v61 = vpop.f32.mrb[7].mxu1 }
 0x1b2   :  { %v1021_v62 = vrot.slane %v1012_v59, 7 }
 0x1b4   :  { %v1023_v63 = vsel %vm258_vm4, %v1021_v62, %v1009_v44 }
 0x1b5   :  { %v1025_v1 = vsel %vm260_vm5, %v1021_v62, %v1023_v63 }
 0x1b6   :  { %v606_v0 = vpop.f32.mrb[8].mxu0  ;;  %v647_v7 = vpop.f32.mrb[8].mxu1 }
 0x1b7   :  { %v608_v2 = vpop.f32.mrb[9].mxu0  ;;  %v649_v10 = vpop.f32.mrb[9].mxu1 }
 0x1b8   :  { %v1013_v5 = vcombine.low %v606_v0, %v608_v2  ;;  %v610_v6 = vpop.f32.mrb[10].mxu0  ;;  %v1014_v12 = vcombine.low %v647_v7, %v649_v10  ;;  %v651_v13 = vpop.f32.mrb[10].mxu1  ;;  %v204_v10 = vunpack.c.h.bf16 %v4808_v26 }
 0x1b9   :  { %v611_v8 = vpop.f32.mrb[11].mxu0  ;;  %v652_v14 = vpop.f32.mrb[11].mxu1  ;;  %v197_v13 = vunpack.c.l.bf16 %v4793_v9 }
 0x1ba   :  { %v1036_v11 = vrot.slane %v1013_v5, 7  ;;  %v1045_v16 = vrot.slane %v1014_v12, 7  ;;  %v203_v8 = vunpack.c.l.bf16 %v4808_v26  ;;  %v198_v14 = vunpack.c.h.bf16 %v4793_v9  ;;  %v1738_v26 = vld [vmem:[#allocation11 + $0x800] sm:$0xff] }
 0x1bc   :  { %v1037_v15 = vsel %vm258_vm4, %v1036_v11, %v1010_v49  ;;  %v1046_v18 = vsel %vm258_vm4, %v1045_v16, %v1011_v54 }
 0x1bd   :  { %v1038_v17 = vsel %vm260_vm5, %v1036_v11, %v1037_v15  ;;  %v1047_v21 = vsel %vm260_vm5, %v1045_v16, %v1046_v18  ;;  %v4577_v11 = vmov 839922192   ;;  %v248_v15 = vcombine.low %v203_v8, %v204_v10  ;;  %v1766_v8 = vld [vmem:[#allocation11 + $0x8e0] sm:$0xff] }
 0x1be   :  { %v729_v20 = vpop.f32.mrb[12].mxu0  ;;  %v770_v25 = vpop.f32.mrb[12].mxu1  ;;  %v1088_v12 = vunpack.c.l.s4 %v4577_v11  ;;  %v210_v18 = vunpack.c.h.bf16 %v4824_v37 }
 0x1bf   :  { %v731_v22 = vpop.f32.mrb[13].mxu0  ;;  %v772_v28 = vpop.f32.mrb[13].mxu1 }
 0x1c0   :  { %v1015_v23 = vcombine.low %v729_v20, %v731_v22  ;;  %v733_v24 = vpop.f32.mrb[14].mxu0  ;;  %v1016_v30 = vcombine.low %v770_v25, %v772_v28  ;;  %v774_v31 = vpop.f32.mrb[14].mxu1  ;;  %v1089_v16 = vunpack.c.0.s8 %v1088_v12  ;;  %v245_v20 = vcombine.low %v197_v13, %v198_v14  ;;  %v1742_v28 = vld [vmem:[#allocation11 + $0x820] sm:$0xff]  ;;  %v1508_v12 = vld [vmem:[#allocation11 + $0xd0] sm:$0xff]  ;;  %v1771_v14 = vld [vmem:[#allocation11 + $0x908] sm:$0xff] }
 0x1c1   :  { %v734_v27 = vpop.f32.mrb[15].mxu0  ;;  %v775_v32 = vpop.f32.mrb[15].mxu1  ;;  %v1512_v13 = vld [vmem:[#allocation11 + $0xf0] sm:$0xff] }
 0x1c2   :  { %v1026_v29 = vrot.slane %v1015_v23, 6  ;;  %v1039_v33 = vrot.slane %v1016_v30, 6  ;;  %v1092_v22 = vsub.s32 %v1089_v16, %v4784_v3  ;;  %v1488_v30 = vld [vmem:[#allocation11 + $0x30] sm:$0xff]  ;;  %v1517_v16 = vld [vmem:[#allocation11 + $0x118] sm:$0xff] }
 0x1c4   :  { %v1028_v4 = vsel %vm263_vm6, %v1026_v29, %v1025_v1  ;;  %v1040_v35 = vsel %vm263_vm6, %v1039_v33, %v1038_v17  ;;  %v209_v17 = vunpack.c.l.bf16 %v4824_v37  ;;  %v1747_v37 = vld [vmem:[#allocation11 + $0x848] sm:$0xff] }
 0x1c5   :  { %v1030_v34 = vsel %vm265_vm7, %v1026_v29, %v1028_v4  ;;  %v1041_v38 = vsel %vm265_vm7, %v1039_v33, %v1040_v35  ;;  %v1484_v29 = vld [vmem:[#allocation11 + $0x10] sm:$0xff]  ;;  %v1493_v35 = vld [vmem:[#allocation11 + $0x58] sm:$0xff] }
 0x1c6   :  { %v811_v36 = vpop.f32.mrb[16].mxu0  ;;  %v893_v42 = vpop.f32.mrb[16].mxu1  ;;  %v251_v23 = vcombine.low %v209_v17, %v210_v18  ;;  %v1521_v17 = vld [vmem:[#allocation11 + $0x138] sm:$0xff] }
 0x1c7   :  { %v813_v39 = vpop.f32.mrb[17].mxu0  ;;  %v895_v44 = vpop.f32.mrb[17].mxu1 }
 0x1c8   :  { %v1017_v40 = vcombine.low %v811_v36, %v813_v39  ;;  %v815_v41 = vpop.f32.mrb[18].mxu0  ;;  %v1018_v46 = vcombine.low %v893_v42, %v895_v44  ;;  %v897_v47 = vpop.f32.mrb[18].mxu1  ;;  %v262_v31 = vrot.slane %v251_v23, 6  ;;  %v1497_v36 = vld [vmem:[#allocation11 + $0x78] sm:$0xff]  ;;  %v3479_v42 = vpack.c.bf16 %v1488_v30, %v1484_v29  ;;  %v1750_v44 = vld [vmem:[#allocation11 + $0x860] sm:$0xff] }
 0x1c9   :  { %v816_v43 = vpop.f32.mrb[19].mxu0  ;;  %v898_v48 = vpop.f32.mrb[19].mxu1  ;;  %v3415_v41 = vpack.c.bf16 %v1742_v28, %v1738_v26  ;;  %v1755_v47 = vld [vmem:[#allocation11 + $0x888] sm:$0xff]  ;;  %v1520_v26 = vld [vmem:[#allocation11 + $0x130] sm:$0xff]  ;;  %v1525_v29 = vld [vmem:[#allocation11 + $0x158] sm:$0xff] }
 0x1ca   :  { %v1048_v45 = vrot.slane %v1017_v40, 6  ;;  %v1031_v50 = vrot.slane %v1018_v46, 5  ;;  %v1746_v43 = vld [vmem:[#allocation11 + $0x840] sm:$0xff]  ;;  %v1496_v46 = vld [vmem:[#allocation11 + $0x70] sm:$0xff]  ;;  %v1783_v28 = vld [vmem:[#allocation11 + $0x968] sm:$0xff] }
 0x1cb   :  { %v1529_v30 = vld [vmem:[#allocation11 + $0x178] sm:$0xff] }
 0x1cc   :  { %v1049_v49 = vsel %vm263_vm6, %v1048_v45, %v1047_v21  ;;  %v1033_v53 = vsel %vm268_vm8, %v1031_v50, %v1030_v34  ;;  %v257_v21 = vrot.slane %v248_v15, 7  ;;  %v1751_v34 = vld [vmem:[#allocation11 + $0x868] sm:$0xff] }
 0x1cd   :  { %v1050_v51 = vsel %vm265_vm7, %v1048_v45, %v1049_v49  ;;  %v1035_v55 = vsel %vm270_vm9, %v1031_v50, %v1033_v53  ;;  %v1492_v45 = vld [vmem:[#allocation11 + $0x50] sm:$0xff]  ;;  %v3417_v49 = vpack.c.bf16 %v1751_v34, %v1747_v37  ;;  %v3481_v50 = vpack.c.bf16 %v1497_v36, %v1493_v35  ;;  %v1505_v53 = vld [vmem:[#allocation11 + $0xb8] sm:$0xff]  ;;  %v1775_v15 = vld [vmem:[#allocation11 + $0x928] sm:$0xff] }
 0x1ce   :  { %v934_v52 = vpop.f32.mrb[20].mxu0  ;;  %v975_v57 = vpop.f32.mrb[20].mxu1  ;;  %v259_v27 = vsel %vm258_vm4, %v257_v21, %v245_v20  ;;  %v3491_v20 = vpack.c.bf16 %v1512_v13, %v1508_v12  ;;  %v3429_v23 = vpack.c.bf16 %v1775_v15, %v1771_v14  ;;  %v1778_v37 = vld [vmem:[#allocation11 + $0x940] sm:$0xff]  ;;  %v3497_v36 = vpack.c.bf16 %v1529_v30, %v1525_v29  ;;  %v1556_v29 = vld [vmem:[#allocation11 + $0x250] sm:$0xff] }
 0x1cf   :  { %v936_v54 = vpop.f32.mrb[21].mxu0  ;;  %v977_v59 = vpop.f32.mrb[21].mxu1  ;;  %v261_v9 = vsel %vm260_vm5, %v257_v21, %v259_v27  ;;  %v1770_v21 = vld [vmem:[#allocation11 + $0x900] sm:$0xff]  ;;  %v1779_v27 = vld [vmem:[#allocation11 + $0x948] sm:$0xff]  ;;  %v1560_v30 = vld [vmem:[#allocation11 + $0x270] sm:$0xff] }
 0x1d0   :  { %v1019_v56 = vcombine.low %v934_v52, %v936_v54  ;;  %v938_v58 = vpop.f32.mrb[22].mxu0  ;;  %v1020_v62 = vcombine.low %v975_v57, %v977_v59  ;;  %v979_v63 = vpop.f32.mrb[22].mxu1  ;;  %v1501_v52 = vld [vmem:[#allocation11 + $0x98] sm:$0xff]  ;;  %v1754_v57 = vld [vmem:[#allocation11 + $0x880] sm:$0xff]  ;;  %v3433_v35 = vpack.c.bf16 %v1783_v28, %v1779_v27 }
 0x1d1   :  { %v939_v60 = vpop.f32.mrb[23].mxu0  ;;  %v980_v0 = vpop.f32.mrb[23].mxu1  ;;  %v1758_v58 = vld [vmem:[#allocation11 + $0x8a0] sm:$0xff]  ;;  %v1763_v63 = vld [vmem:[#allocation11 + $0x8c8] sm:$0xff] }
 0x1d2   :  { %v1042_v61 = vrot.slane %v1019_v56, 5  ;;  %v1051_v2 = vrot.slane %v1020_v62, 5  ;;  %v3483_v56 = vpack.c.bf16 %v1496_v46, %v1492_v45  ;;  %v3485_v60 = vpack.c.bf16 %v1505_v53, %v1501_v52  ;;  %v1504_v62 = vld [vmem:[#allocation11 + $0xb0] sm:$0xff]  ;;  %v1767_v0 = vld [vmem:[#allocation11 + $0x8e8] sm:$0xff]  ;;  %v1782_v34 = vld [vmem:[#allocation11 + $0x960] sm:$0xff] }
 0x1d3   :  { %v3425_v10 = vpack.c.bf16 %v1767_v0, %v1763_v63  ;;  %v3435_v45 = vpack.c.bf16 %v1782_v34, %v1778_v37  ;;  %v1532_v52 = vld [vmem:[#allocation11 + $0x190] sm:$0xff]  ;;  %v1802_v12 = vld [vmem:[#allocation11 + $0xa00] sm:$0xff]  ;;  %v1565_v37 = vld [vmem:[#allocation11 + $0x298] sm:$0xff] }
 0x1d4   :  { %v1043_v1 = vsel %vm268_vm8, %v1042_v61, %v1041_v38  ;;  %v1052_v6 = vsel %vm268_vm8, %v1051_v2, %v1050_v51  ;;  %v264_v38 = vsel %vm263_vm6, %v262_v31, %v261_v9  ;;  %v1759_v51 = vld [vmem:[#allocation11 + $0x8a8] sm:$0xff]  ;;  %v1536_v53 = vld [vmem:[#allocation11 + $0x1b0] sm:$0xff]  ;;  %v1806_v13 = vld [vmem:[#allocation11 + $0xa20] sm:$0xff] }
 0x1d5   :  { %v1044_v5 = vsel %vm270_vm9, %v1042_v61, %v1043_v1  ;;  %v1053_v7 = vsel %vm270_vm9, %v1051_v2, %v1052_v6  ;;  %v4909_v48 = vsel %vm265_vm7, %v262_v31, %v264_v38  ;;  %v3421_v59 = vpack.c.bf16 %v1759_v51, %v1755_v47  ;;  %v1500_v61 = vld [vmem:[#allocation11 + $0x90] sm:$0xff]  ;;  %v1509_v1 = vld [vmem:[#allocation11 + $0xd8] sm:$0xff]  ;;  %v1786_v47 = vld [vmem:[#allocation11 + $0x980] sm:$0xff] }
 0x1d6   :  { %v1513_v2 = vld [vmem:[#allocation11 + $0xf8] sm:$0xff]  ;;  %v3487_v6 = vpack.c.bf16 %v1504_v62, %v1500_v61  ;;  %v1524_v38 = vld [vmem:[#allocation11 + $0x150] sm:$0xff]  ;;  %v1794_v61 = vld [vmem:[#allocation11 + $0x9c0] sm:$0xff] }
 0x1d7   :  { %v3489_v11 = vpack.c.bf16 %v1513_v2, %v1509_v1  ;;  %v1798_v62 = vld [vmem:[#allocation11 + $0x9e0] sm:$0xff]  ;;  %v1540_v1 = vld [vmem:[#allocation11 + $0x1d0] sm:$0xff]  ;;  %v1569_v34 = vld [vmem:[#allocation11 + $0x2b8] sm:$0xff] }
 0x1d8   :  { %v1544_v2 = vld [vmem:[#allocation11 + $0x1f0] sm:$0xff] }
 0x1eb   :  { %v1086_v24 = vpop.permute.xlu0 %1085 }
 0x1ec   :  { %v1093_v25 = vrot.slane %v1086_v24, %v1092_v22  ;;  %v1774_v22 = vld [vmem:[#allocation11 + $0x920] sm:$0xff]  ;;  %v3493_v24 = vpack.c.bf16 %v1521_v17, %v1517_v16  ;;  %v1548_v16 = vld [vmem:[#allocation11 + $0x210] sm:$0xff] }
 0x1ed   :  { %v3431_v9 = vpack.c.bf16 %v1774_v22, %v1770_v21  ;;  %v1552_v17 = vld [vmem:[#allocation11 + $0x230] sm:$0xff]  ;;  %v1557_v21 = vld [vmem:[#allocation11 + $0x258] sm:$0xff] }
 0x1ee   :  { %v4895_v32 = vmul.f32 %v1093_v25, %v1035_v55  ;;  %v4897_v4 = vmul.f32 %v1093_v25, %v1044_v5  ;;  %v4899_v33 = vmul.f32 %v1093_v25, %v1053_v7  ;;  %v3419_v55 = vpack.c.bf16 %v1750_v44, %v1746_v43  ;;  %v1762_v7 = vld [vmem:[#allocation11 + $0x8c0] sm:$0xff]  ;;  %v1516_v25 = vld [vmem:[#allocation11 + $0x110] sm:$0xff]  ;;  %v1533_v43 = vld [vmem:[#allocation11 + $0x198] sm:$0xff] }
 0x1ef   :  { %v3423_v5 = vpack.c.bf16 %v1758_v58, %v1754_v57  ;;  %v3427_v18 = vpack.c.bf16 %v1766_v8, %v1762_v7  ;;  %v3495_v31 = vpack.c.bf16 %v1520_v26, %v1516_v25  ;;  %v1537_v44 = vld [vmem:[#allocation11 + $0x1b8] sm:$0xff]  ;;  %v1810_v25 = vld [vmem:[#allocation11 + $0xa40] sm:$0xff] }
 0x1f0   :  { %v1869_v39 = vcombine.high %v4895_v32, %v4895_v32  ;;  %v4906_v40 = vcombine.high %v4897_v4, %v4897_v4  ;;  %v4916_v54 = vcombine.high %v4899_v33, %v4899_v33  ;;  %v3501_v51 = vpack.c.bf16 %v1537_v44, %v1533_v43  ;;  %v1541_v57 = vld [vmem:[#allocation11 + $0x1d8] sm:$0xff]  ;;  %v1814_v26 = vld [vmem:[#allocation11 + $0xa60] sm:$0xff]  ;;  %v1564_v43 = vld [vmem:[#allocation11 + $0x290] sm:$0xff] }
 0x1f1   :  { %v1545_v58 = vld [vmem:[#allocation11 + $0x1f8] sm:$0xff]  ;;  %v1568_v44 = vld [vmem:[#allocation11 + $0x2b0] sm:$0xff] }
 0x1f2   :  { %1939 = vmatprep.mubr.f32.mxu1 %v1869_v39  ;;  %2010 = vmatprep.mubr.f32.mxu0 %v4906_v40  ;;  %v3505_v0 = vpack.c.bf16 %v1545_v58, %v1541_v57  ;;  %v1549_v7 = vld [vmem:[#allocation11 + $0x218] sm:$0xff]  ;;  %v1572_v57 = vld [vmem:[#allocation11 + $0x2d0] sm:$0xff] }
 0x1f3   :  { %1940 = vmatmul.mubr.f32.vlgmr.msra.gmra.mrb[24].mxu1 %v4895_v32  ;;  %2011 = vmatmul.mubr.f32.vlgmr.msra.gmra.mrb[24].mxu0 %v4897_v4  ;;  %v1553_v8 = vld [vmem:[#allocation11 + $0x238] sm:$0xff]  ;;  %v1576_v58 = vld [vmem:[#allocation11 + $0x2f0] sm:$0xff] }
 0x1f4   :  { %3416 = vmatpush1.bf16.msra.mxu0 %v3415_v41  ;;  %3480 = vmatpush1.bf16.msra.mxu1 %v3479_v42  ;;  %v1787_v41 = vld [vmem:[#allocation11 + $0x988] sm:$0xff]  ;;  %v3509_v15 = vpack.c.bf16 %v1553_v8, %v1549_v7  ;;  %v1561_v22 = vld [vmem:[#allocation11 + $0x278] sm:$0xff]  ;;  %v1580_v7 = vld [vmem:[#allocation11 + $0x310] sm:$0xff] }
 0x1f5   :  { %2081 = vmatprep.mubr.f32.mxu0 %v4916_v54  ;;  %2152 = vmatprep.mubr.f32.mxu1 %v1869_v39  ;;  %v1528_v39 = vld [vmem:[#allocation11 + $0x170] sm:$0xff]  ;;  %v1791_v42 = vld [vmem:[#allocation11 + $0x9a8] sm:$0xff]  ;;  %v3513_v28 = vpack.c.bf16 %v1561_v22, %v1557_v21  ;;  %v4271_v22 = vld [vmem:[#allocation5 + $0x20] sm:$0xff] }
 0x1f6   :  { %3418 = vmatprep.subr.bf16.mxu0 %v3417_v49  ;;  %3482 = vmatprep.subr.bf16.mxu1 %v3481_v50  ;;  %v3499_v46 = vpack.c.bf16 %v1528_v39, %v1524_v38  ;;  %v1790_v49 = vld [vmem:[#allocation11 + $0x9a0] sm:$0xff]  ;;  %v3437_v50 = vpack.c.bf16 %v1791_v42, %v1787_v41  ;;  %v3517_v42 = vpack.c.bf16 %v1569_v34, %v1565_v37  ;;  %v1584_v8 = vld [vmem:[#allocation11 + $0x330] sm:$0xff] }
 0x1f7   :  { %v1818_v38 = vld [vmem:[#allocation11 + $0xa80] sm:$0xff] }
 0x1f8   :  { %3420 = vmatpush1.bf16.msra.mxu0 %v3419_v55  ;;  %3484 = vmatpush1.bf16.msra.mxu1 %v3483_v56  ;;  %v1795_v55 = vld [vmem:[#allocation11 + $0x9c8] sm:$0xff]  ;;  %v1822_v39 = vld [vmem:[#allocation11 + $0xaa0] sm:$0xff] }
 0x1f9   :  { %3422 = vmatprep.subr.bf16.mxu0 %v3421_v59  ;;  %3486 = vmatprep.subr.bf16.mxu1 %v3485_v60  ;;  %v1799_v56 = vld [vmem:[#allocation11 + $0x9e8] sm:$0xff]  ;;  %v3439_v59 = vpack.c.bf16 %v1790_v49, %v1786_v47  ;;  %v3503_v60 = vpack.c.bf16 %v1536_v53, %v1532_v52  ;;  %v1573_v47 = vld [vmem:[#allocation11 + $0x2d8] sm:$0xff]  ;;  %v1826_v52 = vld [vmem:[#allocation11 + $0xac0] sm:$0xff] }
 0x1fa   :  { %v3441_v63 = vpack.c.bf16 %v1799_v56, %v1795_v55  ;;  %v1577_v49 = vld [vmem:[#allocation11 + $0x2f8] sm:$0xff]  ;;  %v1830_v53 = vld [vmem:[#allocation11 + $0xae0] sm:$0xff] }
 0x1fb   :  { %v3521_v56 = vpack.c.bf16 %v1577_v49, %v1573_v47  ;;  %v4272_v37 = vld [vmem:[#allocation5 + $0x8] sm:$0xff]  ;;  %v1600_v47 = vld [vmem:[#allocation11 + $0x3b0] sm:$0xff] }
 0x1fc   :  { %3424 = vmatpush1.bf16.msra.mxu0 %v3423_v5  ;;  %3488 = vmatpush1.bf16.msra.mxu1 %v3487_v6  ;;  %v1803_v5 = vld [vmem:[#allocation11 + $0xa08] sm:$0xff]  ;;  %v199_v34 = vunpack.c.l.bf16 %v4272_v37 }
 0x1fd   :  { %3426 = vmatprep.subr.bf16.mxu0 %v3425_v10  ;;  %3490 = vmatprep.subr.bf16.mxu1 %v3489_v11  ;;  %v1807_v6 = vld [vmem:[#allocation11 + $0xa28] sm:$0xff]  ;;  %v3443_v10 = vpack.c.bf16 %v1798_v62, %v1794_v61  ;;  %v3507_v11 = vpack.c.bf16 %v1544_v2, %v1540_v1  ;;  %v1581_v61 = vld [vmem:[#allocation11 + $0x318] sm:$0xff]  ;;  %v1834_v1 = vld [vmem:[#allocation11 + $0xb00] sm:$0xff] }
 0x1fe   :  { %v3445_v14 = vpack.c.bf16 %v1807_v6, %v1803_v5  ;;  %v1585_v62 = vld [vmem:[#allocation11 + $0x338] sm:$0xff]  ;;  %v1838_v2 = vld [vmem:[#allocation11 + $0xb20] sm:$0xff]  ;;  %v1859_v49 = vld [vmem:[#allocation11 + $0xbc8] sm:$0xff] }
 0x1ff   :  { %v3525_v6 = vpack.c.bf16 %v1585_v62, %v1581_v61 }
 0x200   :  { %3428 = vmatpush1.bf16.msra.mxu0 %v3427_v18  ;;  %3492 = vmatpush1.bf16.msra.mxu1 %v3491_v20  ;;  %v1811_v18 = vld [vmem:[#allocation11 + $0xa48] sm:$0xff] }
 0x201   :  { %3430 = vmatprep.subr.bf16.mxu0 %v3429_v23  ;;  %3494 = vmatprep.subr.bf16.mxu1 %v3493_v24  ;;  %v1815_v20 = vld [vmem:[#allocation11 + $0xa68] sm:$0xff]  ;;  %v3447_v23 = vpack.c.bf16 %v1806_v13, %v1802_v12  ;;  %v3511_v24 = vpack.c.bf16 %v1552_v17, %v1548_v16  ;;  %v1589_v12 = vld [vmem:[#allocation11 + $0x358] sm:$0xff]  ;;  %v1842_v16 = vld [vmem:[#allocation11 + $0xb40] sm:$0xff] }
 0x202   :  { %v3449_v27 = vpack.c.bf16 %v1815_v20, %v1811_v18  ;;  %v1593_v13 = vld [vmem:[#allocation11 + $0x378] sm:$0xff]  ;;  %v1846_v17 = vld [vmem:[#allocation11 + $0xb60] sm:$0xff] }
 0x203   :  { %v4270_v18 = vld [vmem:[#allocation5 + $0x48] sm:$0xff] }
 0x204   :  { %3432 = vmatpush1.bf16.msra.mxu0 %v3431_v9  ;;  %3496 = vmatpush1.bf16.msra.mxu1 %v3495_v31  ;;  %v1819_v9 = vld [vmem:[#allocation11 + $0xa88] sm:$0xff]  ;;  %v215_v20 = vunpack.c.l.bf16 %v4270_v18  ;;  %v216_v21 = vunpack.c.h.bf16 %v4270_v18  ;;  %v1616_v18 = vld [vmem:[#allocation11 + $0x430] sm:$0xff] }
 0x205   :  { %3434 = vmatprep.subr.bf16.mxu0 %v3433_v35  ;;  %3498 = vmatprep.subr.bf16.mxu1 %v3497_v36  ;;  %v1823_v31 = vld [vmem:[#allocation11 + $0xaa8] sm:$0xff]  ;;  %v3451_v35 = vpack.c.bf16 %v1814_v26, %v1810_v25  ;;  %v3515_v36 = vpack.c.bf16 %v1560_v30, %v1556_v29  ;;  %v3529_v26 = vpack.c.bf16 %v1593_v13, %v1589_v12 }
 0x206   :  { %v3453_v41 = vpack.c.bf16 %v1823_v31, %v1819_v9  ;;  %v1851_v29 = vld [vmem:[#allocation11 + $0xb88] sm:$0xff]  ;;  %v1597_v9 = vld [vmem:[#allocation11 + $0x398] sm:$0xff] }
 0x207   :  { %v1855_v30 = vld [vmem:[#allocation11 + $0xba8] sm:$0xff]  ;;  %v1601_v31 = vld [vmem:[#allocation11 + $0x3b8] sm:$0xff] }
 0x208   :  { %3436 = vmatpush1.bf16.msra.mxu0 %v3435_v45  ;;  %3500 = vmatpush1.bf16.msra.mxu1 %v3499_v46  ;;  %v1827_v45 = vld [vmem:[#allocation11 + $0xac8] sm:$0xff] }
 0x209   :  { %3438 = vmatprep.subr.bf16.mxu0 %v3437_v50  ;;  %3502 = vmatprep.subr.bf16.mxu1 %v3501_v51  ;;  %v1831_v46 = vld [vmem:[#allocation11 + $0xae8] sm:$0xff]  ;;  %v3455_v50 = vpack.c.bf16 %v1822_v39, %v1818_v38  ;;  %v3519_v51 = vpack.c.bf16 %v1568_v44, %v1564_v43  ;;  %v1850_v38 = vld [vmem:[#allocation11 + $0xb80] sm:$0xff]  ;;  %v3469_v44 = vpack.c.bf16 %v1855_v30, %v1851_v29 }
 0x20a   :  { %v3457_v55 = vpack.c.bf16 %v1831_v46, %v1827_v45  ;;  %v1854_v39 = vld [vmem:[#allocation11 + $0xba0] sm:$0xff]  ;;  %v3533_v45 = vpack.c.bf16 %v1601_v31, %v1597_v9  ;;  %v1596_v46 = vld [vmem:[#allocation11 + $0x390] sm:$0xff] }
 0x20c   :  { %3440 = vmatpush1.bf16.msra.mxu0 %v3439_v59  ;;  %3504 = vmatpush1.bf16.msra.mxu1 %v3503_v60  ;;  %v1835_v59 = vld [vmem:[#allocation11 + $0xb08] sm:$0xff] }
 0x20d   :  { %3442 = vmatprep.subr.bf16.mxu0 %v3441_v63  ;;  %3506 = vmatprep.subr.bf16.mxu1 %v3505_v0  ;;  %v1839_v60 = vld [vmem:[#allocation11 + $0xb28] sm:$0xff]  ;;  %v3459_v63 = vpack.c.bf16 %v1830_v53, %v1826_v52  ;;  %v3523_v0 = vpack.c.bf16 %v1576_v58, %v1572_v57  ;;  %v1609_v52 = vld [vmem:[#allocation11 + $0x3f8] sm:$0xff]  ;;  %v3471_v57 = vpack.c.bf16 %v1854_v39, %v1850_v38  ;;  %v1110_v39 = vld [vmem:[#allocation10 + $0x60] sm:$0xff] }
 0x20e   :  { %v3461_v5 = vpack.c.bf16 %v1839_v60, %v1835_v59  ;;  %v4273_v53 = vld [vmem:[#allocation5 + $0x38] sm:$0xff]  ;;  %v3535_v58 = vpack.c.bf16 %v1600_v47, %v1596_v46  ;;  %v1858_v59 = vld [vmem:[#allocation11 + $0xbc0] sm:$0xff] }
 0x20f   :  { %v1862_v60 = vld [vmem:[#allocation11 + $0xbe0] sm:$0xff] }
 0x210   :  { %3444 = vmatpush1.bf16.msra.mxu0 %v3443_v10  ;;  %3508 = vmatpush1.bf16.msra.mxu1 %v3507_v11  ;;  %v1843_v10 = vld [vmem:[#allocation11 + $0xb48] sm:$0xff]  ;;  %v3475_v12 = vpack.c.bf16 %v1862_v60, %v1858_v59 }
 0x211   :  { %3446 = vmatprep.subr.bf16.mxu0 %v3445_v14  ;;  %3510 = vmatprep.subr.bf16.mxu1 %v3509_v15  ;;  %v1847_v11 = vld [vmem:[#allocation11 + $0xb68] sm:$0xff]  ;;  %v3463_v14 = vpack.c.bf16 %v1838_v2, %v1834_v1  ;;  %v3527_v15 = vpack.c.bf16 %v1584_v8, %v1580_v7  ;;  %v1604_v2 = vld [vmem:[#allocation11 + $0x3d0] sm:$0xff]  ;;  %v1617_v7 = vld [vmem:[#allocation11 + $0x438] sm:$0xff] }
 0x212   :  { %v3465_v25 = vpack.c.bf16 %v1847_v11, %v1843_v10  ;;  %v1099_v8 = vld [vmem:[#allocation10 + $0x8] sm:$0xff] }
 0x213   :  { %v1103_v10 = vld [vmem:[#allocation10 + $0x28] sm:$0xff] }
 0x214   :  { %3448 = vmatpush1.bf16.msra.mxu0 %v3447_v23  ;;  %3512 = vmatpush1.bf16.msra.mxu1 %v3511_v24  ;;  %v205_v23 = vunpack.c.l.bf16 %v4271_v22  ;;  %v206_v24 = vunpack.c.h.bf16 %v4271_v22 }
 0x215   :  { %3450 = vmatprep.subr.bf16.mxu0 %v3449_v27  ;;  %3514 = vmatprep.subr.bf16.mxu1 %v3513_v28  ;;  %v1588_v27 = vld [vmem:[#allocation11 + $0x350] sm:$0xff] }
 0x216   :  { %v1592_v28 = vld [vmem:[#allocation11 + $0x370] sm:$0xff]  ;;  %v249_v43 = vcombine.low %v205_v23, %v206_v24  ;;  %v1102_v23 = vld [vmem:[#allocation10 + $0x20] sm:$0xff]  ;;  %v1621_v24 = vld [vmem:[#allocation11 + $0x458] sm:$0xff] }
 0x218   :  { %3452 = vmatpush1.bf16.msra.mxu0 %v3451_v35  ;;  %3516 = vmatpush1.bf16.msra.mxu1 %v3515_v36  ;;  %v3467_v35 = vpack.c.bf16 %v1846_v17, %v1842_v16  ;;  %v3531_v36 = vpack.c.bf16 %v1592_v28, %v1588_v27  ;;  %v3669_v16 = vpack.c.bf16 %v1103_v10, %v1099_v8  ;;  %v1612_v17 = vld [vmem:[#allocation11 + $0x410] sm:$0xff]  ;;  %v1107_v27 = vld [vmem:[#allocation10 + $0x48] sm:$0xff] }
 0x219   :  { %3454 = vmatprep.subr.bf16.mxu0 %v3453_v41  ;;  %3518 = vmatprep.subr.bf16.mxu1 %v3517_v42  ;;  %v254_v41 = vcombine.low %v215_v20, %v216_v21  ;;  %v200_v42 = vunpack.c.h.bf16 %v4272_v37  ;;  %v1098_v20 = vld [vmem:[#allocation10] sm:$0xff]  ;;  %v1111_v28 = vld [vmem:[#allocation10 + $0x68] sm:$0xff]  ;;  %v3543_v30 = vpack.c.bf16 %v1616_v18, %v1612_v17  ;;  %v1653_v17 = vld [vmem:[#allocation11 + $0x558] sm:$0xff] }
 0x21a   :  { %v3671_v31 = vpack.c.bf16 %v1102_v23, %v1098_v20  ;;  %v3673_v38 = vpack.c.bf16 %v1111_v28, %v1107_v27  ;;  %v1657_v18 = vld [vmem:[#allocation11 + $0x578] sm:$0xff]  ;;  %v1139_v20 = vld [vmem:[#allocation10 + $0x148] sm:$0xff]  ;;  %v1138_v27 = vld [vmem:[#allocation10 + $0x140] sm:$0xff] }
 0x21b   :  { %v267_v61 = vrot.slane %v254_v41, 5  ;;  %v246_v62 = vcombine.low %v199_v34, %v200_v42  ;;  %v1620_v34 = vld [vmem:[#allocation11 + $0x450] sm:$0xff]  ;;  %v1629_v41 = vld [vmem:[#allocation11 + $0x498] sm:$0xff] }
 0x21c   :  { %3456 = vmatpush1.bf16.msra.mxu0 %v3455_v50  ;;  %3520 = vmatpush1.bf16.msra.mxu1 %v3519_v51  ;;  %v1863_v50 = vld [vmem:[#allocation11 + $0xbe8] sm:$0xff]  ;;  %v1605_v51 = vld [vmem:[#allocation11 + $0x3d8] sm:$0xff] }
 0x21d   :  { %3458 = vmatprep.subr.bf16.mxu0 %v3457_v55  ;;  %3522 = vmatprep.subr.bf16.mxu1 %v3521_v56  ;;  %v211_v55 = vunpack.c.l.bf16 %v4273_v53  ;;  %v212_v56 = vunpack.c.h.bf16 %v4273_v53  ;;  %v3537_v1 = vpack.c.bf16 %v1609_v52, %v1605_v51  ;;  %v1633_v42 = vld [vmem:[#allocation11 + $0x4b8] sm:$0xff]  ;;  %v1632_v51 = vld [vmem:[#allocation11 + $0x4b0] sm:$0xff]  ;;  %v1114_v52 = vld [vmem:[#allocation10 + $0x80] sm:$0xff] }
 0x21f   :  { %v252_v11 = vcombine.low %v211_v55, %v212_v56  ;;  %v1118_v55 = vld [vmem:[#allocation10 + $0xa0] sm:$0xff]  ;;  %v1637_v56 = vld [vmem:[#allocation11 + $0x4d8] sm:$0xff] }
 0x220   :  { %3460 = vmatpush1.bf16.msra.mxu0 %v3459_v63  ;;  %3524 = vmatpush1.bf16.msra.mxu1 %v3523_v0  ;;  %v272_v63 = vrot.slane %v249_v43, 7  ;;  %v3473_v0 = vpack.c.bf16 %v1863_v50, %v1859_v49  ;;  %v3549_v49 = vpack.c.bf16 %v1633_v42, %v1629_v41  ;;  %v1628_v50 = vld [vmem:[#allocation11 + $0x490] sm:$0xff]  ;;  %v1146_v42 = vld [vmem:[#allocation10 + $0x180] sm:$0xff] }
 0x221   :  { %3462 = vmatprep.subr.bf16.mxu0 %v3461_v5  ;;  %3526 = vmatprep.subr.bf16.mxu1 %v3525_v6  ;;  %v1608_v5 = vld [vmem:[#allocation11 + $0x3f0] sm:$0xff]  ;;  %v1613_v6 = vld [vmem:[#allocation11 + $0x418] sm:$0xff]  ;;  %v275_v22 = vrot.slane %v252_v11, 6  ;;  %v3551_v59 = vpack.c.bf16 %v1632_v51, %v1628_v50  ;;  %v1159_v50 = vld [vmem:[#allocation10 + $0x1e8] sm:$0xff] }
 0x222   :  { %v3539_v13 = vpack.c.bf16 %v1608_v5, %v1604_v2  ;;  %v273_v21 = vsel %vm258_vm4, %v272_v63, %v246_v62  ;;  %v1640_v62 = vld [vmem:[#allocation11 + $0x4f0] sm:$0xff]  ;;  %v1645_v2 = vld [vmem:[#allocation11 + $0x518] sm:$0xff] }
 0x223   :  { %v1649_v5 = vld [vmem:[#allocation11 + $0x538] sm:$0xff]  ;;  %v1664_v41 = vld [vmem:[#allocation11 + $0x5b0] sm:$0xff] }
 0x224   :  { %3464 = vmatpush1.bf16.msra.mxu0 %v3463_v14  ;;  %3528 = vmatpush1.bf16.msra.mxu1 %v3527_v15  ;;  %v269_v14 = vsel %vm268_vm8, %v267_v61, %v4909_v48  ;;  %v3541_v15 = vpack.c.bf16 %v1617_v7, %v1613_v6  ;;  %v1131_v6 = vld [vmem:[#allocation10 + $0x108] sm:$0xff]  ;;  %v3557_v11 = vpack.c.bf16 %v1649_v5, %v1645_v2  ;;  %v1680_v2 = vld [vmem:[#allocation11 + $0x630] sm:$0xff]  ;;  %v1162_v5 = vld [vmem:[#allocation10 + $0x200] sm:$0xff] }
 0x225   :  { %3466 = vmatprep.subr.bf16.mxu0 %v3465_v25  ;;  %3530 = vmatprep.subr.bf16.mxu1 %v3529_v26  ;;  %v1625_v25 = vld [vmem:[#allocation11 + $0x478] sm:$0xff]  ;;  %v274_v26 = vsel %vm260_vm5, %v272_v63, %v273_v21  ;;  %v4924_v29 = vsel %vm270_vm9, %v267_v61, %v269_v14  ;;  %v1636_v61 = vld [vmem:[#allocation11 + $0x4d0] sm:$0xff]  ;;  %v1122_v63 = vld [vmem:[#allocation10 + $0xc0] sm:$0xff] }
 0x226   :  { %v276_v48 = vsel %vm263_vm6, %v275_v22, %v274_v26  ;;  %v3545_v37 = vpack.c.bf16 %v1625_v25, %v1621_v24  ;;  %v4932_v43 = vcombine.high %v4924_v29, %v4924_v29  ;;  %v1135_v7 = vld [vmem:[#allocation10 + $0x128] sm:$0xff]  ;;  %v3555_v8 = vpack.c.bf16 %v1640_v62, %v1636_v61  ;;  %v1130_v14 = vld [vmem:[#allocation10 + $0x100] sm:$0xff]  ;;  %v1652_v25 = vld [vmem:[#allocation11 + $0x550] sm:$0xff] }
 0x227   :  { %v4928_v9 = vsel %vm265_vm7, %v275_v22, %v276_v48  ;;  %v1143_v21 = vld [vmem:[#allocation10 + $0x168] sm:$0xff]  ;;  %v3561_v24 = vpack.c.bf16 %v1657_v18, %v1653_v17  ;;  %v1656_v26 = vld [vmem:[#allocation11 + $0x570] sm:$0xff]  ;;  %v1142_v48 = vld [vmem:[#allocation10 + $0x160] sm:$0xff] }
 0x228   :  { %3468 = vmatpush1.bf16.msra.mxu0 %v3467_v35  ;;  %3532 = vmatpush1.bf16.msra.mxu1 %v3531_v36  ;;  %v1624_v35 = vld [vmem:[#allocation11 + $0x470] sm:$0xff]  ;;  %v1106_v36 = vld [vmem:[#allocation10 + $0x40] sm:$0xff]  ;;  %v3689_v28 = vpack.c.bf16 %v1143_v21, %v1139_v20  ;;  %v1167_v61 = vld [vmem:[#allocation10 + $0x228] sm:$0xff] }
 0x229   :  { %3470 = vmatprep.subr.bf16.mxu0 %v3469_v44  ;;  %3534 = vmatprep.subr.bf16.mxu1 %v3533_v45  ;;  %v1115_v44 = vld [vmem:[#allocation10 + $0x88] sm:$0xff]  ;;  %v3547_v46 = vpack.c.bf16 %v1624_v35, %v1620_v34  ;;  %v3675_v47 = vpack.c.bf16 %v1110_v39, %v1106_v36  ;;  %v3563_v35 = vpack.c.bf16 %v1656_v26, %v1652_v25  ;;  %v1660_v39 = vld [vmem:[#allocation11 + $0x590] sm:$0xff]  ;;  %v1170_v18 = vld [vmem:[#allocation10 + $0x240] sm:$0xff] }
 0x22a   :  { %v1119_v45 = vld [vmem:[#allocation10 + $0xa8] sm:$0xff]  ;;  %v3691_v36 = vpack.c.bf16 %v1142_v48, %v1138_v27  ;;  %v3567_v51 = vpack.c.bf16 %v1664_v41, %v1660_v39  ;;  %v1688_v17 = vld [vmem:[#allocation11 + $0x670] sm:$0xff]  ;;  %v1174_v21 = vld [vmem:[#allocation10 + $0x260] sm:$0xff] }
 0x22b   :  { %v3677_v53 = vpack.c.bf16 %v1119_v45, %v1115_v44  ;;  %v1151_v34 = vld [vmem:[#allocation10 + $0x1a8] sm:$0xff]  ;;  %v1150_v45 = vld [vmem:[#allocation10 + $0x1a0] sm:$0xff]  ;;  %v3707_v27 = vpack.c.bf16 %v1174_v21, %v1170_v18  ;;  %v1692_v48 = vld [vmem:[#allocation11 + $0x690] sm:$0xff] }
 0x22c   :  { %3472 = vmatpush1.bf16.msra.mxu0 %v3471_v57  ;;  %3536 = vmatpush1.bf16.msra.mxu1 %v3535_v58  ;;  %v1641_v57 = vld [vmem:[#allocation11 + $0x4f8] sm:$0xff]  ;;  %v1127_v58 = vld [vmem:[#allocation10 + $0xe8] sm:$0xff]  ;;  %v1206_v18 = vld [vmem:[#allocation10 + $0x360] sm:$0xff] }
 0x22d   :  { %3474 = vmatprep.subr.bf16.mxu0 %v3473_v0  ;;  %3538 = vmatprep.subr.bf16.mxu1 %v3537_v1  ;;  %v3553_v60 = vpack.c.bf16 %v1641_v57, %v1637_v56  ;;  %v1126_v1 = vld [vmem:[#allocation10 + $0xe0] sm:$0xff]  ;;  %v1672_v56 = vld [vmem:[#allocation11 + $0x5f0] sm:$0xff]  ;;  %v1183_v25 = vld [vmem:[#allocation10 + $0x2a8] sm:$0xff] }
 0x22e   :  { %v3683_v10 = vpack.c.bf16 %v1126_v1, %v1122_v63  ;;  %v1154_v57 = vld [vmem:[#allocation10 + $0x1c0] sm:$0xff]  ;;  %v1676_v1 = vld [vmem:[#allocation11 + $0x610] sm:$0xff]  ;;  %v1191_v39 = vld [vmem:[#allocation10 + $0x2e8] sm:$0xff] }
 0x22f   :  { %v1729_v21 = vld [vmem:[#allocation11 + $0x7b8] sm:$0xff] }
 0x230   :  { %3476 = vmatpush1.bf16.msra.mxu0 %v3475_v12  ;;  %3540 = vmatpush1.bf16.msra.mxu1 %v3539_v13  ;;  %v1644_v12 = vld [vmem:[#allocation11 + $0x510] sm:$0xff] }
 0x231   :  { %3542 = vmatprep.subr.bf16.mxu1 %v3541_v15  ;;  %3670 = vmatprep.subr.bf16.mxu0 %v3669_v16  ;;  %v1648_v13 = vld [vmem:[#allocation11 + $0x530] sm:$0xff]  ;;  %v3685_v15 = vpack.c.bf16 %v1135_v7, %v1131_v6  ;;  %v1134_v16 = vld [vmem:[#allocation10 + $0x120] sm:$0xff] }
 0x232   :  { %v3559_v22 = vpack.c.bf16 %v1648_v13, %v1644_v12  ;;  %v3687_v23 = vpack.c.bf16 %v1134_v16, %v1130_v14  ;;  %v1166_v7 = vld [vmem:[#allocation10 + $0x220] sm:$0xff]  ;;  %v1175_v12 = vld [vmem:[#allocation10 + $0x268] sm:$0xff]  ;;  %v3575_v13 = vpack.c.bf16 %v1680_v2, %v1676_v1  ;;  %v1684_v16 = vld [vmem:[#allocation11 + $0x650] sm:$0xff] }
 0x233   :  { %2082 = vmatmul.mubr.f32.vlgmr.msra.gmra.mrb[24].mxu0 %v4899_v33  ;;  %2153 = vmatmul.mubr.f32.vlgmr.msra.gmra.mrb[26].mxu1 %v4895_v32  ;;  %v1123_v32 = vld [vmem:[#allocation10 + $0xc8] sm:$0xff]  ;;  %v3703_v14 = vpack.c.bf16 %v1166_v7, %v1162_v5  ;;  %v3579_v26 = vpack.c.bf16 %v1688_v17, %v1684_v16  ;;  %v1202_v16 = vld [vmem:[#allocation10 + $0x340] sm:$0xff] }
 0x234   :  { %3544 = vmatpush1.bf16.msra.mxu1 %v3543_v30  ;;  %2223 = vmatprep.mubr.f32.mxu1 %v4906_v40  ;;  %v3679_v40 = vpack.c.bf16 %v1118_v55, %v1114_v52  ;;  %v3681_v0 = vpack.c.bf16 %v1127_v58, %v1123_v32  ;;  %v1661_v30 = vld [vmem:[#allocation11 + $0x598] sm:$0xff]  ;;  %v3695_v52 = vpack.c.bf16 %v1150_v45, %v1146_v42  ;;  %v1668_v55 = vld [vmem:[#allocation11 + $0x5d0] sm:$0xff]  ;;  %v1158_v58 = vld [vmem:[#allocation10 + $0x1e0] sm:$0xff] }
 0x235   :  { %3672 = vmatpush1.bf16.msra.mxu0 %v3671_v31  ;;  %3546 = vmatprep.subr.bf16.mxu1 %v3545_v37  ;;  %v1665_v31 = vld [vmem:[#allocation11 + $0x5b8] sm:$0xff]  ;;  %v1147_v37 = vld [vmem:[#allocation10 + $0x188] sm:$0xff]  ;;  %v3571_v62 = vpack.c.bf16 %v1672_v56, %v1668_v55  ;;  %v3699_v63 = vpack.c.bf16 %v1158_v58, %v1154_v57  ;;  %v1700_v45 = vld [vmem:[#allocation11 + $0x6d0] sm:$0xff] }
 0x236   :  { %3674 = vmatprep.subr.bf16.mxu0 %v3673_v38  ;;  %2374 = vmatprep.mubr.f32.mxu0 %v4932_v43  ;;  %v3565_v38 = vpack.c.bf16 %v1665_v31, %v1661_v30  ;;  %v3693_v44 = vpack.c.bf16 %v1151_v34, %v1147_v37  ;;  %v1696_v30 = vld [vmem:[#allocation11 + $0x6b0] sm:$0xff]  ;;  %v1178_v31 = vld [vmem:[#allocation10 + $0x280] sm:$0xff]  ;;  %v1199_v55 = vld [vmem:[#allocation10 + $0x328] sm:$0xff] }
 0x237   :  { %v1182_v34 = vld [vmem:[#allocation10 + $0x2a0] sm:$0xff]  ;;  %v3583_v41 = vpack.c.bf16 %v1696_v30, %v1692_v48  ;;  %v1708_v58 = vld [vmem:[#allocation11 + $0x710] sm:$0xff]  ;;  %v1203_v2 = vld [vmem:[#allocation10 + $0x348] sm:$0xff]  ;;  %v3723_v30 = vpack.c.bf16 %v1206_v18, %v1202_v16 }
 0x238   :  { %3548 = vmatpush1.bf16.msra.mxu1 %v3547_v46  ;;  %v1669_v46 = vld [vmem:[#allocation11 + $0x5d8] sm:$0xff]  ;;  %v3711_v42 = vpack.c.bf16 %v1182_v34, %v1178_v31  ;;  %v1207_v5 = vld [vmem:[#allocation10 + $0x368] sm:$0xff]  ;;  %v1728_v34 = vld [vmem:[#allocation11 + $0x7b0] sm:$0xff] }
 0x239   :  { %3676 = vmatpush1.bf16.msra.mxu0 %v3675_v47  ;;  %3550 = vmatprep.subr.bf16.mxu1 %v3549_v49  ;;  %v1673_v47 = vld [vmem:[#allocation11 + $0x5f8] sm:$0xff]  ;;  %v1155_v49 = vld [vmem:[#allocation10 + $0x1c8] sm:$0xff]  ;;  %v3721_v17 = vpack.c.bf16 %v1207_v5, %v1203_v2  ;;  %v1230_v16 = vld [vmem:[#allocation10 + $0x420] sm:$0xff] }
 0x23a   :  { %3678 = vmatprep.subr.bf16.mxu0 %v3677_v53  ;;  %v3569_v53 = vpack.c.bf16 %v1673_v47, %v1669_v46  ;;  %v3697_v32 = vpack.c.bf16 %v1159_v50, %v1155_v49  ;;  %v1704_v46 = vld [vmem:[#allocation11 + $0x6f0] sm:$0xff]  ;;  %v1186_v47 = vld [vmem:[#allocation10 + $0x2c0] sm:$0xff] }
 0x23b   :  { %v1190_v50 = vld [vmem:[#allocation10 + $0x2e0] sm:$0xff]  ;;  %v3587_v56 = vpack.c.bf16 %v1704_v46, %v1700_v45  ;;  %v1737_v45 = vld [vmem:[#allocation11 + $0x7f8] sm:$0xff]  ;;  %v1219_v46 = vld [vmem:[#allocation10 + $0x3c8] sm:$0xff] }
 0x23c   :  { %3552 = vmatpush1.bf16.msra.mxu1 %v3551_v59  ;;  %v1677_v59 = vld [vmem:[#allocation11 + $0x618] sm:$0xff]  ;;  %v3715_v57 = vpack.c.bf16 %v1190_v50, %v1186_v47  ;;  %v1223_v47 = vld [vmem:[#allocation10 + $0x3e8] sm:$0xff] }
 0x23d   :  { %3680 = vmatpush1.bf16.msra.mxu0 %v3679_v40  ;;  %3554 = vmatprep.subr.bf16.mxu1 %v3553_v60  ;;  %v1681_v40 = vld [vmem:[#allocation11 + $0x638] sm:$0xff]  ;;  %v1163_v60 = vld [vmem:[#allocation10 + $0x208] sm:$0xff] }
 0x23e   :  { %3682 = vmatprep.subr.bf16.mxu0 %v3681_v0  ;;  %v3573_v0 = vpack.c.bf16 %v1681_v40, %v1677_v59  ;;  %v3701_v6 = vpack.c.bf16 %v1167_v61, %v1163_v60  ;;  %v1712_v59 = vld [vmem:[#allocation11 + $0x730] sm:$0xff]  ;;  %v1194_v40 = vld [vmem:[#allocation10 + $0x300] sm:$0xff] }
 0x23f   :  { %v1198_v61 = vld [vmem:[#allocation10 + $0x320] sm:$0xff]  ;;  %v3591_v7 = vpack.c.bf16 %v1712_v59, %v1708_v58  ;;  %v3729_v58 = vpack.c.bf16 %v1223_v47, %v1219_v46 }
 0x240   :  { %3556 = vmatpush1.bf16.msra.mxu1 %v3555_v8  ;;  %v1685_v8 = vld [vmem:[#allocation11 + $0x658] sm:$0xff]  ;;  %v1222_v59 = vld [vmem:[#allocation10 + $0x3e0] sm:$0xff] }
 0x241   :  { %3684 = vmatpush1.bf16.msra.mxu0 %v3683_v10  ;;  %3558 = vmatprep.subr.bf16.mxu1 %v3557_v11  ;;  %v1689_v10 = vld [vmem:[#allocation11 + $0x678] sm:$0xff]  ;;  %v1171_v11 = vld [vmem:[#allocation10 + $0x248] sm:$0xff]  ;;  %v1242_v46 = vld [vmem:[#allocation10 + $0x480] sm:$0xff] }
 0x242   :  { %3686 = vmatprep.subr.bf16.mxu0 %v3685_v15  ;;  %v3577_v15 = vpack.c.bf16 %v1689_v10, %v1685_v8  ;;  %v3705_v20 = vpack.c.bf16 %v1175_v12, %v1171_v11  ;;  %v4275_v8 = vld [vmem:[#allocation5 + $0x50] sm:$0xff]  ;;  %v3719_v12 = vpack.c.bf16 %v1198_v61, %v1194_v40  ;;  %v1741_v40 = vld [vmem:[#allocation11 + $0x818] sm:$0xff]  ;;  %v1246_v47 = vld [vmem:[#allocation10 + $0x4a0] sm:$0xff] }
 0x243   :  { %v217_v10 = vunpack.c.l.bf16 %v4275_v8  ;;  %v218_v11 = vunpack.c.h.bf16 %v4275_v8  ;;  %v1744_v8 = vld [vmem:[#allocation11 + $0x830] sm:$0xff] }
 0x244   :  { %3560 = vmatpush1.bf16.msra.mxu1 %v3559_v22  ;;  %v1693_v22 = vld [vmem:[#allocation11 + $0x698] sm:$0xff] }
 0x245   :  { %3688 = vmatpush1.bf16.msra.mxu0 %v3687_v23  ;;  %3562 = vmatprep.subr.bf16.mxu1 %v3561_v24  ;;  %v1697_v23 = vld [vmem:[#allocation11 + $0x6b8] sm:$0xff]  ;;  %v1179_v24 = vld [vmem:[#allocation10 + $0x288] sm:$0xff]  ;;  %v255_v48 = vcombine.low %v217_v10, %v218_v11 }
 0x246   :  { %3690 = vmatprep.subr.bf16.mxu0 %v3689_v28  ;;  %v3581_v28 = vpack.c.bf16 %v1697_v23, %v1693_v22  ;;  %v3709_v37 = vpack.c.bf16 %v1183_v25, %v1179_v24  ;;  %v4276_v22 = vld [vmem:[#allocation5 + $0x10] sm:$0xff] }
 0x247   :  { %v201_v23 = vunpack.c.l.bf16 %v4276_v22  ;;  %v1211_v24 = vld [vmem:[#allocation10 + $0x388] sm:$0xff] }
 0x248   :  { %3564 = vmatpush1.bf16.msra.mxu1 %v3563_v35  ;;  %v1701_v35 = vld [vmem:[#allocation11 + $0x6d8] sm:$0xff]  ;;  %v1215_v25 = vld [vmem:[#allocation10 + $0x3a8] sm:$0xff] }
 0x249   :  { %3692 = vmatpush1.bf16.msra.mxu0 %v3691_v36  ;;  %3566 = vmatprep.subr.bf16.mxu1 %v3565_v38  ;;  %v1705_v36 = vld [vmem:[#allocation11 + $0x6f8] sm:$0xff]  ;;  %v1187_v38 = vld [vmem:[#allocation10 + $0x2c8] sm:$0xff] }
 0x24a   :  { %3694 = vmatprep.subr.bf16.mxu0 %v3693_v44  ;;  %v3585_v44 = vpack.c.bf16 %v1705_v36, %v1701_v35  ;;  %v3713_v49 = vpack.c.bf16 %v1191_v39, %v1187_v38  ;;  %v1210_v35 = vld [vmem:[#allocation10 + $0x380] sm:$0xff] }
 0x24b   :  { %v4277_v36 = vld [vmem:[#allocation5 + $0x40] sm:$0xff] }
 0x24c   :  { %3568 = vmatpush1.bf16.msra.mxu1 %v3567_v51  ;;  %v1709_v51 = vld [vmem:[#allocation11 + $0x718] sm:$0xff]  ;;  %v213_v38 = vunpack.c.l.bf16 %v4277_v36  ;;  %v214_v39 = vunpack.c.h.bf16 %v4277_v36  ;;  %v1247_v36 = vld [vmem:[#allocation10 + $0x4a8] sm:$0xff] }
 0x24d   :  { %3696 = vmatpush1.bf16.msra.mxu0 %v3695_v52  ;;  %3570 = vmatprep.subr.bf16.mxu1 %v3569_v53  ;;  %v1713_v52 = vld [vmem:[#allocation11 + $0x738] sm:$0xff]  ;;  %v1195_v53 = vld [vmem:[#allocation10 + $0x308] sm:$0xff] }
 0x24e   :  { %3698 = vmatprep.subr.bf16.mxu0 %v3697_v32  ;;  %v3589_v32 = vpack.c.bf16 %v1713_v52, %v1709_v51  ;;  %v3717_v60 = vpack.c.bf16 %v1199_v55, %v1195_v53  ;;  %v278_v52 = vrot.slane %v255_v48, 5  ;;  %v253_v61 = vcombine.low %v213_v38, %v214_v39  ;;  %v1756_v39 = vld [vmem:[#allocation11 + $0x890] sm:$0xff] }
 0x250   :  { %3572 = vmatpush1.bf16.msra.mxu1 %v3571_v62  ;;  %v1717_v62 = vld [vmem:[#allocation11 + $0x758] sm:$0xff]  ;;  %v284_v11 = vrot.slane %v253_v61, 6  ;;  %v1263_v61 = vld [vmem:[#allocation10 + $0x528] sm:$0xff] }
 0x251   :  { %3700 = vmatpush1.bf16.msra.mxu0 %v3699_v63  ;;  %3574 = vmatprep.subr.bf16.mxu1 %v3573_v0  ;;  %v1721_v63 = vld [vmem:[#allocation11 + $0x778] sm:$0xff]  ;;  %v4274_v0 = vld [vmem:[#allocation5 + $0x28] sm:$0xff] }
 0x252   :  { %3702 = vmatprep.subr.bf16.mxu0 %v3701_v6  ;;  %v207_v1 = vunpack.c.l.bf16 %v4274_v0  ;;  %v208_v6 = vunpack.c.h.bf16 %v4274_v0 }
 0x254   :  { %3576 = vmatpush1.bf16.msra.mxu1 %v3575_v13  ;;  %v3593_v13 = vpack.c.bf16 %v1721_v63, %v1717_v62  ;;  %v1227_v62 = vld [vmem:[#allocation10 + $0x408] sm:$0xff] }
 0x255   :  { %3704 = vmatpush1.bf16.msra.mxu0 %v3703_v14  ;;  %3578 = vmatprep.subr.bf16.mxu1 %v3577_v15  ;;  %v1716_v14 = vld [vmem:[#allocation11 + $0x750] sm:$0xff]  ;;  %v1231_v63 = vld [vmem:[#allocation10 + $0x428] sm:$0xff] }
 0x256   :  { %3706 = vmatprep.subr.bf16.mxu0 %v3705_v20  ;;  %v1720_v15 = vld [vmem:[#allocation11 + $0x770] sm:$0xff]  ;;  %v1725_v20 = vld [vmem:[#allocation11 + $0x798] sm:$0xff] }
 0x257   :  { %v3597_v31 = vpack.c.bf16 %v1729_v21, %v1725_v20  ;;  %v1235_v20 = vld [vmem:[#allocation10 + $0x448] sm:$0xff] }
 0x258   :  { %3580 = vmatpush1.bf16.msra.mxu1 %v3579_v26  ;;  %v202_v26 = vunpack.c.h.bf16 %v4276_v22  ;;  %v1239_v21 = vld [vmem:[#allocation10 + $0x468] sm:$0xff] }
 0x259   :  { %3708 = vmatpush1.bf16.msra.mxu0 %v3707_v27  ;;  %3582 = vmatprep.subr.bf16.mxu1 %v3581_v28  ;;  %v250_v27 = vcombine.low %v207_v1, %v208_v6  ;;  %v3595_v28 = vpack.c.bf16 %v1720_v15, %v1716_v14  ;;  %v279_v1 = vsel %vm268_vm8, %v278_v52, %v4928_v9  ;;  %v1753_v14 = vld [vmem:[#allocation11 + $0x878] sm:$0xff]  ;;  %v1226_v15 = vld [vmem:[#allocation10 + $0x400] sm:$0xff] }
 0x25a   :  { %3710 = vmatprep.subr.bf16.mxu0 %v3709_v37  ;;  %v1724_v37 = vld [vmem:[#allocation11 + $0x790] sm:$0xff] }
 0x25b   :  { %v281_v50 = vrot.slane %v250_v27, 7  ;;  %v3599_v51 = vpack.c.bf16 %v1728_v34, %v1724_v37  ;;  %v1757_v27 = vld [vmem:[#allocation11 + $0x898] sm:$0xff]  ;;  %v1238_v37 = vld [vmem:[#allocation10 + $0x460] sm:$0xff] }
 0x25c   :  { %3584 = vmatpush1.bf16.msra.mxu1 %v3583_v41  ;;  %v3725_v41 = vpack.c.bf16 %v1215_v25, %v1211_v24  ;;  %v1748_v24 = vld [vmem:[#allocation11 + $0x850] sm:$0xff] }
 0x25d   :  { %3712 = vmatpush1.bf16.msra.mxu0 %v3711_v42  ;;  %3586 = vmatprep.subr.bf16.mxu1 %v3585_v44  ;;  %v1214_v42 = vld [vmem:[#allocation10 + $0x3a0] sm:$0xff]  ;;  %v1733_v44 = vld [vmem:[#allocation11 + $0x7d8] sm:$0xff]  ;;  %v1752_v25 = vld [vmem:[#allocation11 + $0x870] sm:$0xff] }
 0x25e   :  { %3714 = vmatprep.subr.bf16.mxu0 %v3713_v49  ;;  %v247_v49 = vcombine.low %v201_v23, %v202_v26  ;;  %v3727_v53 = vpack.c.bf16 %v1214_v42, %v1210_v35  ;;  %v3601_v55 = vpack.c.bf16 %v1737_v45, %v1733_v44  ;;  %v3735_v26 = vpack.c.bf16 %v1230_v16, %v1226_v15  ;;  %v1243_v35 = vld [vmem:[#allocation10 + $0x488] sm:$0xff]  ;;  %v1765_v44 = vld [vmem:[#allocation11 + $0x8d8] sm:$0xff]  ;;  %v1784_v15 = vld [vmem:[#allocation11 + $0x970] sm:$0xff] }
 0x25f   :  { %v3611_v34 = vpack.c.bf16 %v1752_v25, %v1748_v24  ;;  %v1769_v45 = vld [vmem:[#allocation11 + $0x8f8] sm:$0xff]  ;;  %v1275_v25 = vld [vmem:[#allocation10 + $0x588] sm:$0xff] }
 0x260   :  { %3588 = vmatpush1.bf16.msra.mxu1 %v3587_v56  ;;  %v1732_v56 = vld [vmem:[#allocation11 + $0x7d0] sm:$0xff]  ;;  %v282_v2 = vsel %vm258_vm4, %v281_v50, %v247_v49  ;;  %v1251_v49 = vld [vmem:[#allocation10 + $0x4c8] sm:$0xff] }
 0x261   :  { %3716 = vmatpush1.bf16.msra.mxu0 %v3715_v57  ;;  %3590 = vmatprep.subr.bf16.mxu1 %v3589_v32  ;;  %v1736_v57 = vld [vmem:[#allocation11 + $0x7f0] sm:$0xff]  ;;  %v1218_v32 = vld [vmem:[#allocation10 + $0x3c0] sm:$0xff]  ;;  %v283_v10 = vsel %vm260_vm5, %v281_v50, %v282_v2  ;;  %v1255_v50 = vld [vmem:[#allocation10 + $0x4e8] sm:$0xff] }
 0x262   :  { %3718 = vmatprep.subr.bf16.mxu0 %v3717_v60  ;;  %v1745_v60 = vld [vmem:[#allocation11 + $0x838] sm:$0xff]  ;;  %v3603_v0 = vpack.c.bf16 %v1736_v57, %v1732_v56  ;;  %v3731_v5 = vpack.c.bf16 %v1222_v59, %v1218_v32  ;;  %v285_v9 = vsel %vm263_vm6, %v284_v11, %v283_v10  ;;  %v3745_v32 = vpack.c.bf16 %v1255_v50, %v1251_v49  ;;  %v1254_v59 = vld [vmem:[#allocation10 + $0x4e0] sm:$0xff] }
 0x263   :  { %v3605_v6 = vpack.c.bf16 %v1745_v60, %v1741_v40  ;;  %v4947_v22 = vsel %vm265_vm7, %v284_v11, %v285_v9  ;;  %v1773_v56 = vld [vmem:[#allocation11 + $0x918] sm:$0xff]  ;;  %v1259_v60 = vld [vmem:[#allocation10 + $0x508] sm:$0xff]  ;;  %v1282_v50 = vld [vmem:[#allocation10 + $0x5c0] sm:$0xff] }
 0x264   :  { %3592 = vmatpush1.bf16.msra.mxu1 %v3591_v7  ;;  %v1740_v7 = vld [vmem:[#allocation11 + $0x810] sm:$0xff]  ;;  %v1777_v57 = vld [vmem:[#allocation11 + $0x938] sm:$0xff]  ;;  %v1267_v11 = vld [vmem:[#allocation10 + $0x548] sm:$0xff] }
 0x265   :  { %3720 = vmatpush1.bf16.msra.mxu0 %v3719_v12  ;;  %3594 = vmatprep.subr.bf16.mxu1 %v3593_v13  ;;  %v3733_v12 = vpack.c.bf16 %v1231_v63, %v1227_v62  ;;  %v1749_v13 = vld [vmem:[#allocation11 + $0x858] sm:$0xff]  ;;  %v3607_v18 = vpack.c.bf16 %v1744_v8, %v1740_v7  ;;  %v3621_v62 = vpack.c.bf16 %v1777_v57, %v1773_v56  ;;  %v1772_v63 = vld [vmem:[#allocation11 + $0x910] sm:$0xff]  ;;  %v1258_v7 = vld [vmem:[#allocation10 + $0x500] sm:$0xff] }
 0x266   :  { %3722 = vmatprep.subr.bf16.mxu0 %v3721_v17  ;;  %v4943_v17 = vsel %vm270_vm9, %v278_v52, %v279_v1  ;;  %v3609_v23 = vpack.c.bf16 %v1753_v14, %v1749_v13  ;;  %v1764_v52 = vld [vmem:[#allocation11 + $0x8d0] sm:$0xff]  ;;  %v1781_v2 = vld [vmem:[#allocation11 + $0x958] sm:$0xff]  ;;  %v1262_v8 = vld [vmem:[#allocation10 + $0x520] sm:$0xff] }
 0x267   :  { %v4951_v48 = vcombine.high %v4943_v17, %v4943_v17  ;;  %v1780_v14 = vld [vmem:[#allocation11 + $0x950] sm:$0xff]  ;;  %v3751_v16 = vpack.c.bf16 %v1262_v8, %v1258_v7  ;;  %v1789_v9 = vld [vmem:[#allocation11 + $0x998] sm:$0xff] }
 0x268   :  { %3596 = vmatpush1.bf16.msra.mxu1 %v3595_v28  ;;  %v1761_v28 = vld [vmem:[#allocation11 + $0x8b8] sm:$0xff]  ;;  %v3627_v24 = vpack.c.bf16 %v1784_v15, %v1780_v14  ;;  %v1804_v57 = vld [vmem:[#allocation11 + $0xa10] sm:$0xff]  ;;  %v1307_v15 = vld [vmem:[#allocation10 + $0x688] sm:$0xff] }
 0x269   :  { %3724 = vmatpush1.bf16.msra.mxu0 %v3723_v30  ;;  %3598 = vmatprep.subr.bf16.mxu1 %v3597_v31  ;;  %v3737_v30 = vpack.c.bf16 %v1239_v21, %v1235_v20  ;;  %v1234_v31 = vld [vmem:[#allocation10 + $0x440] sm:$0xff]  ;;  %v3613_v38 = vpack.c.bf16 %v1761_v28, %v1757_v27  ;;  %v1788_v28 = vld [vmem:[#allocation11 + $0x990] sm:$0xff]  ;;  %v1821_v8 = vld [vmem:[#allocation11 + $0xa98] sm:$0xff] }
 0x26a   :  { %3726 = vmatprep.subr.bf16.mxu0 %v3725_v41  ;;  %v1760_v41 = vld [vmem:[#allocation11 + $0x8b0] sm:$0xff]  ;;  %v3739_v42 = vpack.c.bf16 %v1238_v37, %v1234_v31  ;;  %v1266_v21 = vld [vmem:[#allocation10 + $0x540] sm:$0xff]  ;;  %v1797_v37 = vld [vmem:[#allocation11 + $0x9d8] sm:$0xff] }
 0x26c   :  { %3600 = vmatpush1.bf16.msra.mxu1 %v3599_v51  ;;  %v3617_v51 = vpack.c.bf16 %v1769_v45, %v1765_v44  ;;  %v1796_v45 = vld [vmem:[#allocation11 + $0x9d0] sm:$0xff] }
 0x26d   :  { %3728 = vmatpush1.bf16.msra.mxu0 %v3727_v53  ;;  %3602 = vmatprep.subr.bf16.mxu1 %v3601_v55  ;;  %v1768_v53 = vld [vmem:[#allocation11 + $0x8f0] sm:$0xff]  ;;  %v3743_v55 = vpack.c.bf16 %v1246_v47, %v1242_v46  ;;  %v1805_v47 = vld [vmem:[#allocation11 + $0xa18] sm:$0xff] }
 0x26e   :  { %3730 = vmatprep.subr.bf16.mxu0 %v3729_v58  ;;  %v1250_v58 = vld [vmem:[#allocation10 + $0x4c0] sm:$0xff]  ;;  %v3619_v40 = vpack.c.bf16 %v1768_v53, %v1764_v52  ;;  %v1291_v53 = vld [vmem:[#allocation10 + $0x608] sm:$0xff] }
 0x26f   :  { %v3747_v1 = vpack.c.bf16 %v1254_v59, %v1250_v58  ;;  %v1813_v59 = vld [vmem:[#allocation11 + $0xa58] sm:$0xff] }
 0x270   :  { %3604 = vmatpush1.bf16.msra.mxu1 %v3603_v0  ;;  %v1776_v0 = vld [vmem:[#allocation11 + $0x930] sm:$0xff] }
 0x271   :  { %3732 = vmatpush1.bf16.msra.mxu0 %v3731_v5  ;;  %3606 = vmatprep.subr.bf16.mxu1 %v3605_v6  ;;  %v1785_v5 = vld [vmem:[#allocation11 + $0x978] sm:$0xff]  ;;  %v3749_v6 = vpack.c.bf16 %v1263_v61, %v1259_v60  ;;  %v3623_v10 = vpack.c.bf16 %v1776_v0, %v1772_v63  ;;  %v1290_v61 = vld [vmem:[#allocation10 + $0x600] sm:$0xff]  ;;  %v1299_v0 = vld [vmem:[#allocation10 + $0x648] sm:$0xff] }
 0x272   :  { %3734 = vmatprep.subr.bf16.mxu0 %v3733_v12  ;;  %v1271_v12 = vld [vmem:[#allocation10 + $0x568] sm:$0xff]  ;;  %v3625_v13 = vpack.c.bf16 %v1785_v5, %v1781_v2  ;;  %v1812_v5 = vld [vmem:[#allocation11 + $0xa50] sm:$0xff] }
 0x273   :  { %2224 = vmatmul.mubr.f32.vlgmr.msra.gmra.mrb[26].mxu1 %v4897_v4  ;;  %v3741_v4 = vpack.c.bf16 %v1247_v36, %v1243_v35  ;;  %v3753_v20 = vpack.c.bf16 %v1271_v12, %v1267_v11  ;;  %v1274_v36 = vld [vmem:[#allocation10 + $0x580] sm:$0xff] }
 0x274   :  { %3608 = vmatpush1.bf16.msra.mxu1 %v3607_v18  ;;  %2294 = vmatprep.mubr.f32.mxu1 %v4916_v54  ;;  %v3615_v54 = vpack.c.bf16 %v1760_v41, %v1756_v39  ;;  %v1793_v18 = vld [vmem:[#allocation11 + $0x9b8] sm:$0xff]  ;;  %v1283_v41 = vld [vmem:[#allocation10 + $0x5c8] sm:$0xff]  ;;  %v1298_v12 = vld [vmem:[#allocation10 + $0x640] sm:$0xff] }
 0x275   :  { %2375 = vmatmul.mubr.f32.vlgmr.msra.gmra.mrb[24].mxu0 %v4924_v29  ;;  %3610 = vmatprep.subr.bf16.mxu1 %v3609_v23  ;;  %v1270_v23 = vld [vmem:[#allocation10 + $0x560] sm:$0xff]  ;;  %v3629_v27 = vpack.c.bf16 %v1793_v18, %v1789_v9  ;;  %v1820_v18 = vld [vmem:[#allocation11 + $0xa90] sm:$0xff] }
 0x276   :  { %3736 = vmatpush1.bf16.msra.mxu0 %v3735_v26  ;;  %2445 = vmatprep.mubr.f32.mxu0 %v4951_v48  ;;  %v1279_v26 = vld [vmem:[#allocation10 + $0x5a8] sm:$0xff]  ;;  %v3755_v31 = vpack.c.bf16 %v1270_v23, %v1266_v21  ;;  %v1829_v23 = vld [vmem:[#allocation11 + $0xad8] sm:$0xff] }
 0x277   :  { %3738 = vmatprep.subr.bf16.mxu0 %v3737_v30  ;;  %v1792_v30 = vld [vmem:[#allocation11 + $0x9b0] sm:$0xff]  ;;  %v3757_v35 = vpack.c.bf16 %v1279_v26, %v1275_v25  ;;  %v1306_v26 = vld [vmem:[#allocation10 + $0x680] sm:$0xff] }
 0x278   :  { %3612 = vmatpush1.bf16.msra.mxu1 %v3611_v34  ;;  %v1801_v34 = vld [vmem:[#allocation11 + $0x9f8] sm:$0xff]  ;;  %v3631_v39 = vpack.c.bf16 %v1792_v30, %v1788_v28  ;;  %v1315_v30 = vld [vmem:[#allocation10 + $0x6c8] sm:$0xff] }
 0x279   :  { %3614 = vmatprep.subr.bf16.mxu1 %v3613_v38  ;;  %v1278_v38 = vld [vmem:[#allocation10 + $0x5a0] sm:$0xff]  ;;  %v3633_v44 = vpack.c.bf16 %v1801_v34, %v1797_v37  ;;  %v1828_v34 = vld [vmem:[#allocation11 + $0xad0] sm:$0xff] }
 0x27a   :  { %3740 = vmatpush1.bf16.msra.mxu0 %v3739_v42  ;;  %v1287_v42 = vld [vmem:[#allocation10 + $0x5e8] sm:$0xff]  ;;  %v3759_v46 = vpack.c.bf16 %v1278_v38, %v1274_v36  ;;  %v1837_v38 = vld [vmem:[#allocation11 + $0xb18] sm:$0xff] }
 0x27b   :  { %3742 = vmatprep.subr.bf16.mxu0 %v3741_v4  ;;  %v1800_v4 = vld [vmem:[#allocation11 + $0x9f0] sm:$0xff]  ;;  %v3761_v49 = vpack.c.bf16 %v1287_v42, %v1283_v41  ;;  %v1314_v42 = vld [vmem:[#allocation10 + $0x6c0] sm:$0xff] }
 0x27c   :  { %3616 = vmatpush1.bf16.msra.mxu1 %v3615_v54  ;;  %v1809_v54 = vld [vmem:[#allocation11 + $0xa38] sm:$0xff]  ;;  %v3635_v52 = vpack.c.bf16 %v1800_v4, %v1796_v45  ;;  %v1323_v4 = vld [vmem:[#allocation10 + $0x708] sm:$0xff] }
 0x27d   :  { %3618 = vmatprep.subr.bf16.mxu1 %v3617_v51  ;;  %v1286_v51 = vld [vmem:[#allocation10 + $0x5e0] sm:$0xff]  ;;  %v3637_v56 = vpack.c.bf16 %v1809_v54, %v1805_v47  ;;  %v1836_v54 = vld [vmem:[#allocation11 + $0xb10] sm:$0xff] }
 0x27e   :  { %3744 = vmatpush1.bf16.msra.mxu0 %v3743_v55  ;;  %v1295_v55 = vld [vmem:[#allocation10 + $0x628] sm:$0xff]  ;;  %v3763_v58 = vpack.c.bf16 %v1286_v51, %v1282_v50  ;;  %v1845_v51 = vld [vmem:[#allocation11 + $0xb58] sm:$0xff] }
 0x27f   :  { %3746 = vmatprep.subr.bf16.mxu0 %v3745_v32  ;;  %v1808_v32 = vld [vmem:[#allocation11 + $0xa30] sm:$0xff]  ;;  %v3765_v60 = vpack.c.bf16 %v1295_v55, %v1291_v53  ;;  %v1322_v55 = vld [vmem:[#allocation10 + $0x700] sm:$0xff] }
 0x280   :  { %3620 = vmatpush1.bf16.msra.mxu1 %v3619_v40  ;;  %v1817_v40 = vld [vmem:[#allocation11 + $0xa78] sm:$0xff]  ;;  %v3639_v63 = vpack.c.bf16 %v1808_v32, %v1804_v57  ;;  %v1331_v32 = vld [vmem:[#allocation10 + $0x748] sm:$0xff] }
 0x281   :  { %3622 = vmatprep.subr.bf16.mxu1 %v3621_v62  ;;  %v1294_v62 = vld [vmem:[#allocation10 + $0x620] sm:$0xff]  ;;  %v3641_v2 = vpack.c.bf16 %v1817_v40, %v1813_v59  ;;  %v4278_v59 = vld [vmem:[#allocation5 + $0x58] sm:$0xff] }
 0x282   :  { %3748 = vmatpush1.bf16.msra.mxu0 %v3747_v1  ;;  %v1303_v1 = vld [vmem:[#allocation10 + $0x668] sm:$0xff]  ;;  %v3767_v7 = vpack.c.bf16 %v1294_v62, %v1290_v61  ;;  %v219_v40 = vunpack.c.l.bf16 %v4278_v59  ;;  %v1844_v62 = vld [vmem:[#allocation11 + $0xb50] sm:$0xff] }
 0x283   :  { %3750 = vmatprep.subr.bf16.mxu0 %v3749_v6  ;;  %v1816_v6 = vld [vmem:[#allocation11 + $0xa70] sm:$0xff]  ;;  %v3769_v11 = vpack.c.bf16 %v1303_v1, %v1299_v0  ;;  %v1853_v1 = vld [vmem:[#allocation11 + $0xb98] sm:$0xff] }
 0x284   :  { %3624 = vmatpush1.bf16.msra.mxu1 %v3623_v10  ;;  %v1825_v10 = vld [vmem:[#allocation11 + $0xab8] sm:$0xff]  ;;  %v3643_v14 = vpack.c.bf16 %v1816_v6, %v1812_v5  ;;  %v1330_v6 = vld [vmem:[#allocation10 + $0x740] sm:$0xff] }
 0x285   :  { %3626 = vmatprep.subr.bf16.mxu1 %v3625_v13  ;;  %v1302_v13 = vld [vmem:[#allocation10 + $0x660] sm:$0xff]  ;;  %v3645_v9 = vpack.c.bf16 %v1825_v10, %v1821_v8  ;;  %v1339_v10 = vld [vmem:[#allocation10 + $0x788] sm:$0xff] }
 0x286   :  { %3752 = vmatpush1.bf16.msra.mxu0 %v3751_v16  ;;  %v1311_v16 = vld [vmem:[#allocation10 + $0x6a8] sm:$0xff]  ;;  %v3771_v21 = vpack.c.bf16 %v1302_v13, %v1298_v12 }
 0x287   :  { %3754 = vmatprep.subr.bf16.mxu0 %v3753_v20  ;;  %v1824_v20 = vld [vmem:[#allocation11 + $0xab0] sm:$0xff]  ;;  %v3773_v25 = vpack.c.bf16 %v1311_v16, %v1307_v15 }
 0x288   :  { %3628 = vmatpush1.bf16.msra.mxu1 %v3627_v24  ;;  %v1833_v24 = vld [vmem:[#allocation11 + $0xaf8] sm:$0xff]  ;;  %v3647_v28 = vpack.c.bf16 %v1824_v20, %v1820_v18  ;;  %v1856_v15 = vld [vmem:[#allocation11 + $0xbb0] sm:$0xff] }
 0x289   :  { %3630 = vmatprep.subr.bf16.mxu1 %v3629_v27  ;;  %v1310_v27 = vld [vmem:[#allocation10 + $0x6a0] sm:$0xff]  ;;  %v3649_v37 = vpack.c.bf16 %v1833_v24, %v1829_v23  ;;  %v1865_v18 = vld [vmem:[#allocation11 + $0xbf8] sm:$0xff] }
 0x28a   :  { %3756 = vmatpush1.bf16.msra.mxu0 %v3755_v31  ;;  %v1319_v31 = vld [vmem:[#allocation10 + $0x6e8] sm:$0xff]  ;;  %v3775_v36 = vpack.c.bf16 %v1310_v27, %v1306_v26  ;;  %v1342_v23 = vld [vmem:[#allocation10 + $0x7a0] sm:$0xff] }
 0x28b   :  { %3758 = vmatprep.subr.bf16.mxu0 %v3757_v35  ;;  %v1832_v35 = vld [vmem:[#allocation11 + $0xaf0] sm:$0xff]  ;;  %v3777_v41 = vpack.c.bf16 %v1319_v31, %v1315_v30  ;;  %v1351_v26 = vld [vmem:[#allocation10 + $0x7e8] sm:$0xff] }
 0x28c   :  { %3632 = vmatpush1.bf16.msra.mxu1 %v3631_v39  ;;  %v1841_v39 = vld [vmem:[#allocation11 + $0xb38] sm:$0xff]  ;;  %v3651_v45 = vpack.c.bf16 %v1832_v35, %v1828_v34  ;;  %v1860_v30 = vld [vmem:[#allocation11 + $0xbd0] sm:$0xff] }
 0x28d   :  { %3634 = vmatprep.subr.bf16.mxu1 %v3633_v44  ;;  %v1318_v44 = vld [vmem:[#allocation10 + $0x6e0] sm:$0xff]  ;;  %v3653_v47 = vpack.c.bf16 %v1841_v39, %v1837_v38  ;;  %v1864_v31 = vld [vmem:[#allocation11 + $0xbf0] sm:$0xff]  ;;  %v1101_v34 = vld [vmem:[#allocation10 + $0x18] sm:$0xff] }
 0x28e   :  { %3760 = vmatpush1.bf16.msra.mxu0 %v3759_v46  ;;  %v1327_v46 = vld [vmem:[#allocation10 + $0x728] sm:$0xff]  ;;  %v3779_v50 = vpack.c.bf16 %v1318_v44, %v1314_v42  ;;  %v1105_v35 = vld [vmem:[#allocation10 + $0x38] sm:$0xff]  ;;  %v1346_v38 = vld [vmem:[#allocation10 + $0x7c0] sm:$0xff] }
 0x28f   :  { %3762 = vmatprep.subr.bf16.mxu0 %v3761_v49  ;;  %v1840_v49 = vld [vmem:[#allocation11 + $0xb30] sm:$0xff]  ;;  %v3781_v53 = vpack.c.bf16 %v1327_v46, %v1323_v4  ;;  %v1350_v39 = vld [vmem:[#allocation10 + $0x7e0] sm:$0xff]  ;;  %v1355_v42 = vld [vmem:[#allocation10 + $0x808] sm:$0xff]  ;;  %v3861_v4 = vpack.c.bf16 %v1105_v35, %v1101_v34 }
 0x290   :  { %3636 = vmatpush1.bf16.msra.mxu1 %v3635_v52  ;;  %v1849_v52 = vld [vmem:[#allocation11 + $0xb78] sm:$0xff]  ;;  %v3655_v57 = vpack.c.bf16 %v1840_v49, %v1836_v54  ;;  %v1359_v44 = vld [vmem:[#allocation10 + $0x828] sm:$0xff]  ;;  %v1100_v46 = vld [vmem:[#allocation10 + $0x10] sm:$0xff]  ;;  %v3795_v54 = vpack.c.bf16 %v1350_v39, %v1346_v38 }
 0x291   :  { %3638 = vmatprep.subr.bf16.mxu1 %v3637_v56  ;;  %v1326_v56 = vld [vmem:[#allocation10 + $0x720] sm:$0xff]  ;;  %v3657_v61 = vpack.c.bf16 %v1849_v52, %v1845_v51  ;;  %v1109_v49 = vld [vmem:[#allocation10 + $0x58] sm:$0xff]  ;;  %v3797_v51 = vpack.c.bf16 %v1359_v44, %v1355_v42  ;;  %v1132_v35 = vld [vmem:[#allocation10 + $0x110] sm:$0xff] }
 0x292   :  { %3764 = vmatpush1.bf16.msra.mxu0 %v3763_v58  ;;  %v1335_v58 = vld [vmem:[#allocation10 + $0x768] sm:$0xff]  ;;  %v3783_v0 = vpack.c.bf16 %v1326_v56, %v1322_v55  ;;  %v1354_v52 = vld [vmem:[#allocation10 + $0x800] sm:$0xff]  ;;  %v1141_v39 = vld [vmem:[#allocation10 + $0x158] sm:$0xff] }
 0x293   :  { %3766 = vmatprep.subr.bf16.mxu0 %v3765_v60  ;;  %v220_v60 = vunpack.c.h.bf16 %v4278_v59  ;;  %v3785_v5 = vpack.c.bf16 %v1335_v58, %v1331_v32  ;;  %v1367_v32 = vld [vmem:[#allocation10 + $0x868] sm:$0xff]  ;;  %v1108_v58 = vld [vmem:[#allocation10 + $0x50] sm:$0xff]  ;;  %v1386_v44 = vld [vmem:[#allocation10 + $0x900] sm:$0xff] }
 0x294   :  { %3640 = vmatpush1.bf16.msra.mxu1 %v3639_v63  ;;  %v1848_v63 = vld [vmem:[#allocation11 + $0xb70] sm:$0xff] }
 0x295   :  { %3642 = vmatprep.subr.bf16.mxu1 %v3641_v2  ;;  %v1857_v2 = vld [vmem:[#allocation11 + $0xbb8] sm:$0xff]  ;;  %v3659_v8 = vpack.c.bf16 %v1848_v63, %v1844_v62  ;;  %v256_v12 = vcombine.low %v219_v40, %v220_v60  ;;  %v1112_v59 = vld [vmem:[#allocation10 + $0x70] sm:$0xff] }
 0x296   :  { %3768 = vmatpush1.bf16.msra.mxu0 %v3767_v7  ;;  %v1334_v7 = vld [vmem:[#allocation10 + $0x760] sm:$0xff]  ;;  %v3661_v13 = vpack.c.bf16 %v1857_v2, %v1853_v1  ;;  %v1117_v60 = vld [vmem:[#allocation10 + $0x98] sm:$0xff]  ;;  %v3867_v2 = vpack.c.bf16 %v1112_v59, %v1108_v58  ;;  %v1403_v58 = vld [vmem:[#allocation10 + $0x988] sm:$0xff] }
 0x297   :  { %3770 = vmatprep.subr.bf16.mxu0 %v3769_v11  ;;  %v1343_v11 = vld [vmem:[#allocation10 + $0x7a8] sm:$0xff]  ;;  %v3787_v16 = vpack.c.bf16 %v1334_v7, %v1330_v6  ;;  %v287_v27 = vrot.slane %v256_v12, 5  ;;  %v1366_v1 = vld [vmem:[#allocation10 + $0x860] sm:$0xff]  ;;  %v1125_v12 = vld [vmem:[#allocation10 + $0xd8] sm:$0xff] }
 0x298   :  { %3644 = vmatpush1.bf16.msra.mxu1 %v3643_v14  ;;  %v1852_v14 = vld [vmem:[#allocation11 + $0xb90] sm:$0xff]  ;;  %v3789_v20 = vpack.c.bf16 %v1343_v11, %v1339_v10  ;;  %v1375_v6 = vld [vmem:[#allocation10 + $0x8a8] sm:$0xff] }
 0x299   :  { %3646 = vmatprep.subr.bf16.mxu1 %v3645_v9  ;;  %v1861_v9 = vld [vmem:[#allocation11 + $0xbd8] sm:$0xff]  ;;  %v3663_v24 = vpack.c.bf16 %v1856_v15, %v1852_v14  ;;  %v1120_v10 = vld [vmem:[#allocation10 + $0xb0] sm:$0xff]  ;;  %v1370_v14 = vld [vmem:[#allocation10 + $0x880] sm:$0xff] }
 0x29a   :  { %3772 = vmatpush1.bf16.msra.mxu0 %v3771_v21  ;;  %v1338_v21 = vld [vmem:[#allocation10 + $0x780] sm:$0xff]  ;;  %v1407_v59 = vld [vmem:[#allocation10 + $0x9a8] sm:$0xff] }
 0x29b   :  { %3774 = vmatprep.subr.bf16.mxu0 %v3773_v25  ;;  %v1347_v25 = vld [vmem:[#allocation10 + $0x7c8] sm:$0xff]  ;;  %v1374_v15 = vld [vmem:[#allocation10 + $0x8a0] sm:$0xff] }
 0x29c   :  { %3648 = vmatpush1.bf16.msra.mxu1 %v3647_v28  ;;  %v3665_v28 = vpack.c.bf16 %v1865_v18, %v1861_v9  ;;  %v1379_v9 = vld [vmem:[#allocation10 + $0x8c8] sm:$0xff] }
 0x29d   :  { %3650 = vmatprep.subr.bf16.mxu1 %v3649_v37  ;;  %v3791_v37 = vpack.c.bf16 %v1342_v23, %v1338_v21  ;;  %v1128_v21 = vld [vmem:[#allocation10 + $0xf0] sm:$0xff]  ;;  %v3807_v23 = vpack.c.bf16 %v1374_v15, %v1370_v14 }
 0x29e   :  { %3776 = vmatpush1.bf16.msra.mxu0 %v3775_v36  ;;  %v3793_v36 = vpack.c.bf16 %v1351_v26, %v1347_v25  ;;  %v1137_v25 = vld [vmem:[#allocation10 + $0x138] sm:$0xff]  ;;  %v1160_v14 = vld [vmem:[#allocation10 + $0x1f0] sm:$0xff] }
 0x29f   :  { %3778 = vmatprep.subr.bf16.mxu0 %v3777_v41  ;;  %v3667_v41 = vpack.c.bf16 %v1864_v31, %v1860_v30  ;;  %v1387_v31 = vld [vmem:[#allocation10 + $0x908] sm:$0xff] }
 0x2a0   :  { %3652 = vmatpush1.bf16.msra.mxu1 %v3651_v45  ;;  %v288_v45 = vsel %vm268_vm8, %v287_v27, %v4947_v22 }
 0x2a1   :  { %3654 = vmatprep.subr.bf16.mxu1 %v3653_v47  ;;  %v1104_v47 = vld [vmem:[#allocation10 + $0x30] sm:$0xff]  ;;  %v4960_v55 = vsel %vm270_vm9, %v287_v27, %v288_v45  ;;  %v1378_v27 = vld [vmem:[#allocation10 + $0x8c0] sm:$0xff] }
 0x2a2   :  { %3780 = vmatpush1.bf16.msra.mxu0 %v3779_v50  ;;  %v1113_v50 = vld [vmem:[#allocation10 + $0x78] sm:$0xff]  ;;  %v3863_v56 = vpack.c.bf16 %v1104_v47, %v1100_v46  ;;  %v4964_v62 = vcombine.high %v4960_v55, %v4960_v55  ;;  %v1390_v45 = vld [vmem:[#allocation10 + $0x920] sm:$0xff]  ;;  %v1395_v46 = vld [vmem:[#allocation10 + $0x948] sm:$0xff] }
 0x2a3   :  { %3782 = vmatprep.subr.bf16.mxu0 %v3781_v53  ;;  %v1358_v53 = vld [vmem:[#allocation10 + $0x820] sm:$0xff]  ;;  %v3865_v22 = vpack.c.bf16 %v1113_v50, %v1109_v49  ;;  %v1399_v47 = vld [vmem:[#allocation10 + $0x968] sm:$0xff]  ;;  %v1140_v49 = vld [vmem:[#allocation10 + $0x150] sm:$0xff] }
 0x2a4   :  { %3656 = vmatpush1.bf16.msra.mxu1 %v3655_v57  ;;  %v1363_v57 = vld [vmem:[#allocation10 + $0x848] sm:$0xff]  ;;  %v3799_v40 = vpack.c.bf16 %v1358_v53, %v1354_v52  ;;  %v1144_v50 = vld [vmem:[#allocation10 + $0x170] sm:$0xff]  ;;  %v1149_v52 = vld [vmem:[#allocation10 + $0x198] sm:$0xff] }
 0x2a5   :  { %3658 = vmatprep.subr.bf16.mxu1 %v3657_v61  ;;  %v1121_v61 = vld [vmem:[#allocation10 + $0xb8] sm:$0xff]  ;;  %v3801_v63 = vpack.c.bf16 %v1367_v32, %v1363_v57  ;;  %v1394_v57 = vld [vmem:[#allocation10 + $0x940] sm:$0xff] }
 0x2a6   :  { %3784 = vmatpush1.bf16.msra.mxu0 %v3783_v0  ;;  %v1362_v0 = vld [vmem:[#allocation10 + $0x840] sm:$0xff]  ;;  %v3869_v7 = vpack.c.bf16 %v1121_v61, %v1117_v60  ;;  %v1153_v53 = vld [vmem:[#allocation10 + $0x1b8] sm:$0xff]  ;;  %v1148_v60 = vld [vmem:[#allocation10 + $0x190] sm:$0xff] }
 0x2a7   :  { %3786 = vmatprep.subr.bf16.mxu0 %v3785_v5  ;;  %v1371_v5 = vld [vmem:[#allocation10 + $0x888] sm:$0xff]  ;;  %v3803_v11 = vpack.c.bf16 %v1366_v1, %v1362_v0  ;;  %v1398_v32 = vld [vmem:[#allocation10 + $0x960] sm:$0xff]  ;;  %v1152_v61 = vld [vmem:[#allocation10 + $0x1b0] sm:$0xff] }
 0x2a8   :  { %3660 = vmatpush1.bf16.msra.mxu1 %v3659_v8  ;;  %v1116_v8 = vld [vmem:[#allocation10 + $0x90] sm:$0xff]  ;;  %v3819_v0 = vpack.c.bf16 %v1398_v32, %v1394_v57  ;;  %v1157_v1 = vld [vmem:[#allocation10 + $0x1d8] sm:$0xff] }
 0x2a9   :  { %3662 = vmatprep.subr.bf16.mxu1 %v3661_v13  ;;  %v3805_v13 = vpack.c.bf16 %v1375_v6, %v1371_v5  ;;  %v3821_v6 = vpack.c.bf16 %v1407_v59, %v1403_v58  ;;  %v1184_v57 = vld [vmem:[#allocation10 + $0x2b0] sm:$0xff]  ;;  %v1193_v58 = vld [vmem:[#allocation10 + $0x2f8] sm:$0xff] }
 0x2aa   :  { %3788 = vmatpush1.bf16.msra.mxu0 %v3787_v16  ;;  %v3871_v16 = vpack.c.bf16 %v1120_v10, %v1116_v8  ;;  %v1406_v8 = vld [vmem:[#allocation10 + $0x9a0] sm:$0xff]  ;;  %v3887_v10 = vpack.c.bf16 %v1152_v61, %v1148_v60 }
 0x2ab   :  { %3790 = vmatprep.subr.bf16.mxu0 %v3789_v20  ;;  %v1124_v20 = vld [vmem:[#allocation10 + $0xd0] sm:$0xff]  ;;  %v1438_v60 = vld [vmem:[#allocation10 + $0xaa0] sm:$0xff] }
 0x2ac   :  { %3664 = vmatpush1.bf16.msra.mxu1 %v3663_v24  ;;  %v1133_v24 = vld [vmem:[#allocation10 + $0x118] sm:$0xff]  ;;  %v3875_v30 = vpack.c.bf16 %v1128_v21, %v1124_v20  ;;  %v1414_v20 = vld [vmem:[#allocation10 + $0x9e0] sm:$0xff] }
 0x2ad   :  { %3666 = vmatprep.subr.bf16.mxu1 %v3665_v28  ;;  %v1382_v28 = vld [vmem:[#allocation10 + $0x8e0] sm:$0xff]  ;;  %v3877_v34 = vpack.c.bf16 %v1137_v25, %v1133_v24  ;;  %v1423_v24 = vld [vmem:[#allocation10 + $0xa28] sm:$0xff] }
 0x2ae   :  { %3792 = vmatpush1.bf16.msra.mxu0 %v3791_v37  ;;  %v1391_v37 = vld [vmem:[#allocation10 + $0x928] sm:$0xff]  ;;  %v3811_v38 = vpack.c.bf16 %v1382_v28, %v1378_v27  ;;  %v1168_v27 = vld [vmem:[#allocation10 + $0x230] sm:$0xff] }
 0x2af   :  { %3794 = vmatprep.subr.bf16.mxu0 %v3793_v36  ;;  %v1136_v36 = vld [vmem:[#allocation10 + $0x130] sm:$0xff]  ;;  %v3813_v42 = vpack.c.bf16 %v1391_v37, %v1387_v31  ;;  %v1177_v31 = vld [vmem:[#allocation10 + $0x278] sm:$0xff] }
 0x2b0   :  { %3668 = vmatpush1.bf16.msra.mxu1 %v3667_v41  ;;  %v1145_v41 = vld [vmem:[#allocation10 + $0x178] sm:$0xff] }
 0x2b1   :  { %3862 = vmatprep.subr.bf16.mxu1 %v3861_v4  ;;  %v3879_v4 = vpack.c.bf16 %v1136_v36, %v1132_v35  ;;  %v1422_v35 = vld [vmem:[#allocation10 + $0xa20] sm:$0xff] }
 0x2b2   :  { %3796 = vmatpush1.bf16.msra.mxu0 %v3795_v54  ;;  %v3881_v54 = vpack.c.bf16 %v1145_v41, %v1141_v39  ;;  %v1431_v39 = vld [vmem:[#allocation10 + $0xa68] sm:$0xff] }
 0x2b3   :  { %2295 = vmatmul.mubr.f32.vlgmr.msra.gmra.mrb[26].mxu1 %v4899_v33  ;;  %3798 = vmatprep.subr.bf16.mxu0 %v3797_v51  ;;  %v1129_v33 = vld [vmem:[#allocation10 + $0xf8] sm:$0xff]  ;;  %v3815_v51 = vpack.c.bf16 %v1390_v45, %v1386_v44  ;;  %v1176_v44 = vld [vmem:[#allocation10 + $0x270] sm:$0xff] }
 0x2b4   :  { %3864 = vmatpush1.bf16.msra.mxu1 %v3863_v56  ;;  %2587 = vmatprep.mubr.f32.mxu1 %v4932_v43  ;;  %v1383_v43 = vld [vmem:[#allocation10 + $0x8e8] sm:$0xff]  ;;  %v3873_v18 = vpack.c.bf16 %v1129_v33, %v1125_v12  ;;  %v3817_v56 = vpack.c.bf16 %v1399_v47, %v1395_v46  ;;  %v1185_v46 = vld [vmem:[#allocation10 + $0x2b8] sm:$0xff] }
 0x2b5   :  { %2446 = vmatmul.mubr.f32.vlgmr.msra.gmra.mrb[24].mxu0 %v4943_v17  ;;  %3866 = vmatprep.subr.bf16.mxu1 %v3865_v22  ;;  %v3809_v26 = vpack.c.bf16 %v1383_v43, %v1379_v9  ;;  %v3883_v22 = vpack.c.bf16 %v1144_v50, %v1140_v49  ;;  %v1415_v12 = vld [vmem:[#allocation10 + $0x9e8] sm:$0xff]  ;;  %v1169_v9 = vld [vmem:[#allocation10 + $0x238] sm:$0xff]  ;;  %v1430_v49 = vld [vmem:[#allocation10 + $0xa60] sm:$0xff] }
 0x2b6   :  { %3800 = vmatpush1.bf16.msra.mxu0 %v3799_v40  ;;  %2516 = vmatprep.mubr.f32.mxu0 %v4964_v62  ;;  %v3885_v40 = vpack.c.bf16 %v1153_v53, %v1149_v52  ;;  %v1439_v52 = vld [vmem:[#allocation10 + $0xaa8] sm:$0xff] }
 0x2b7   :  { %3802 = vmatprep.subr.bf16.mxu0 %v3801_v63 }
 0x2b8   :  { %3868 = vmatpush1.bf16.msra.mxu1 %v3867_v2  ;;  %v1161_v2 = vld [vmem:[#allocation10 + $0x1f8] sm:$0xff] }
 0x2b9   :  { %3870 = vmatprep.subr.bf16.mxu1 %v3869_v7  ;;  %v1402_v7 = vld [vmem:[#allocation10 + $0x980] sm:$0xff]  ;;  %v3889_v33 = vpack.c.bf16 %v1161_v2, %v1157_v1  ;;  %v1447_v1 = vld [vmem:[#allocation10 + $0xae8] sm:$0xff] }
 0x2ba   :  { %3804 = vmatpush1.bf16.msra.mxu0 %v3803_v11  ;;  %v1411_v11 = vld [vmem:[#allocation10 + $0x9c8] sm:$0xff]  ;;  %v3823_v15 = vpack.c.bf16 %v1406_v8, %v1402_v7  ;;  %v1192_v7 = vld [vmem:[#allocation10 + $0x2f0] sm:$0xff] }
 0x2bb   :  { %3806 = vmatprep.subr.bf16.mxu0 %v3805_v13  ;;  %v1156_v13 = vld [vmem:[#allocation10 + $0x1d0] sm:$0xff]  ;;  %v3825_v43 = vpack.c.bf16 %v1415_v12, %v1411_v11  ;;  %v1201_v11 = vld [vmem:[#allocation10 + $0x338] sm:$0xff] }
 0x2bc   :  { %3872 = vmatpush1.bf16.msra.mxu1 %v3871_v16  ;;  %v1165_v16 = vld [vmem:[#allocation10 + $0x218] sm:$0xff]  ;;  %v3891_v21 = vpack.c.bf16 %v1160_v14, %v1156_v13  ;;  %v1446_v13 = vld [vmem:[#allocation10 + $0xae0] sm:$0xff] }
 0x2bd   :  { %3874 = vmatprep.subr.bf16.mxu1 %v3873_v18  ;;  %v1410_v18 = vld [vmem:[#allocation10 + $0x9c0] sm:$0xff]  ;;  %v3893_v25 = vpack.c.bf16 %v1169_v9, %v1165_v16  ;;  %v1455_v16 = vld [vmem:[#allocation10 + $0xb28] sm:$0xff] }
 0x2be   :  { %3808 = vmatpush1.bf16.msra.mxu0 %v3807_v23  ;;  %v1419_v23 = vld [vmem:[#allocation10 + $0xa08] sm:$0xff]  ;;  %v3827_v28 = vpack.c.bf16 %v1414_v20, %v1410_v18  ;;  %v1200_v18 = vld [vmem:[#allocation10 + $0x330] sm:$0xff] }
 0x2bf   :  { %3810 = vmatprep.subr.bf16.mxu0 %v3809_v26  ;;  %v1164_v26 = vld [vmem:[#allocation10 + $0x210] sm:$0xff]  ;;  %v3829_v37 = vpack.c.bf16 %v1423_v24, %v1419_v23  ;;  %v1209_v23 = vld [vmem:[#allocation10 + $0x378] sm:$0xff] }
 0x2c0   :  { %3876 = vmatpush1.bf16.msra.mxu1 %v3875_v30  ;;  %v1173_v30 = vld [vmem:[#allocation10 + $0x258] sm:$0xff]  ;;  %v3895_v36 = vpack.c.bf16 %v1168_v27, %v1164_v26  ;;  %v1454_v26 = vld [vmem:[#allocation10 + $0xb20] sm:$0xff] }
 0x2c1   :  { %3878 = vmatprep.subr.bf16.mxu1 %v3877_v34  ;;  %v1418_v34 = vld [vmem:[#allocation10 + $0xa00] sm:$0xff]  ;;  %v3897_v41 = vpack.c.bf16 %v1177_v31, %v1173_v30  ;;  %v1463_v30 = vld [vmem:[#allocation10 + $0xb68] sm:$0xff] }
 0x2c2   :  { %3812 = vmatpush1.bf16.msra.mxu0 %v3811_v38  ;;  %v1427_v38 = vld [vmem:[#allocation10 + $0xa48] sm:$0xff]  ;;  %v3831_v45 = vpack.c.bf16 %v1422_v35, %v1418_v34  ;;  %v1208_v34 = vld [vmem:[#allocation10 + $0x370] sm:$0xff] }
 0x2c3   :  { %3814 = vmatprep.subr.bf16.mxu0 %v3813_v42  ;;  %v1172_v42 = vld [vmem:[#allocation10 + $0x250] sm:$0xff]  ;;  %v3833_v47 = vpack.c.bf16 %v1431_v39, %v1427_v38  ;;  %v1217_v38 = vld [vmem:[#allocation10 + $0x3b8] sm:$0xff] }
 0x2c4   :  { %3880 = vmatpush1.bf16.msra.mxu1 %v3879_v4  ;;  %v1181_v4 = vld [vmem:[#allocation10 + $0x298] sm:$0xff]  ;;  %v3899_v50 = vpack.c.bf16 %v1176_v44, %v1172_v42  ;;  %v1462_v42 = vld [vmem:[#allocation10 + $0xb60] sm:$0xff] }
 0x2c5   :  { %3882 = vmatprep.subr.bf16.mxu1 %v3881_v54  ;;  %v1426_v54 = vld [vmem:[#allocation10 + $0xa40] sm:$0xff]  ;;  %v3901_v53 = vpack.c.bf16 %v1185_v46, %v1181_v4  ;;  %v1471_v4 = vld [vmem:[#allocation10 + $0xba8] sm:$0xff] }
 0x2c6   :  { %3816 = vmatpush1.bf16.msra.mxu0 %v3815_v51  ;;  %v4970_v63 = vpop.f32.mrb[24].mxu1  ;;  %v1435_v51 = vld [vmem:[#allocation10 + $0xa88] sm:$0xff]  ;;  %v3835_v32 = vpack.c.bf16 %v1430_v49, %v1426_v54  ;;  %v1216_v54 = vld [vmem:[#allocation10 + $0x3b0] sm:$0xff] }
 0x2c7   :  { %3818 = vmatprep.subr.bf16.mxu0 %v3817_v56  ;;  %v4972_v5 = vpop.f32.mrb[25].mxu1  ;;  %v1180_v56 = vld [vmem:[#allocation10 + $0x290] sm:$0xff]  ;;  %v3837_v59 = vpack.c.bf16 %v1439_v52, %v1435_v51  ;;  %v1225_v51 = vld [vmem:[#allocation10 + $0x3f8] sm:$0xff] }
 0x2c8   :  { %3884 = vmatpush1.bf16.msra.mxu1 %v3883_v22  ;;  %v1189_v22 = vld [vmem:[#allocation10 + $0x2d8] sm:$0xff]  ;;  %v3903_v61 = vpack.c.bf16 %v1184_v57, %v1180_v56  ;;  %v1470_v56 = vld [vmem:[#allocation10 + $0xba0] sm:$0xff] }
 0x2c9   :  { %3886 = vmatprep.subr.bf16.mxu1 %v3885_v40  ;;  %v1434_v40 = vld [vmem:[#allocation10 + $0xa80] sm:$0xff]  ;;  %v3905_v2 = vpack.c.bf16 %v1193_v58, %v1189_v22  ;;  %v1479_v22 = vld [vmem:[#allocation10 + $0xbe8] sm:$0xff] }
 0x2ca   :  { %3820 = vmatpush1.bf16.msra.mxu0 %v3819_v0  ;;  %v1443_v0 = vld [vmem:[#allocation10 + $0xac8] sm:$0xff]  ;;  %v3839_v8 = vpack.c.bf16 %v1438_v60, %v1434_v40  ;;  %v1224_v40 = vld [vmem:[#allocation10 + $0x3f0] sm:$0xff] }
 0x2cb   :  { %3822 = vmatprep.subr.bf16.mxu0 %v3821_v6  ;;  %v1188_v6 = vld [vmem:[#allocation10 + $0x2d0] sm:$0xff]  ;;  %v3841_v12 = vpack.c.bf16 %v1447_v1, %v1443_v0  ;;  %v1233_v0 = vld [vmem:[#allocation10 + $0x438] sm:$0xff] }
 0x2cc   :  { %3888 = vmatpush1.bf16.msra.mxu1 %v3887_v10  ;;  %v1197_v10 = vld [vmem:[#allocation10 + $0x318] sm:$0xff]  ;;  %v3907_v14 = vpack.c.bf16 %v1192_v7, %v1188_v6  ;;  %v1478_v6 = vld [vmem:[#allocation10 + $0xbe0] sm:$0xff] }
 0x2cd   :  { %3890 = vmatprep.subr.bf16.mxu1 %v3889_v33  ;;  %v1442_v33 = vld [vmem:[#allocation10 + $0xac0] sm:$0xff]  ;;  %v3909_v9 = vpack.c.bf16 %v1201_v11, %v1197_v10  ;;  %v1228_v10 = vld [vmem:[#allocation10 + $0x410] sm:$0xff] }
 0x2ce   :  { %3824 = vmatpush1.bf16.msra.mxu0 %v3823_v15  ;;  %v1451_v15 = vld [vmem:[#allocation10 + $0xb08] sm:$0xff]  ;;  %v3843_v20 = vpack.c.bf16 %v1446_v13, %v1442_v33  ;;  %v1232_v11 = vld [vmem:[#allocation10 + $0x430] sm:$0xff]  ;;  %v1237_v33 = vld [vmem:[#allocation10 + $0x458] sm:$0xff] }
 0x2cf   :  { %3826 = vmatprep.subr.bf16.mxu0 %v3825_v43  ;;  %v1196_v43 = vld [vmem:[#allocation10 + $0x310] sm:$0xff]  ;;  %v3845_v24 = vpack.c.bf16 %v1455_v16, %v1451_v15  ;;  %v1241_v13 = vld [vmem:[#allocation10 + $0x478] sm:$0xff] }
 0x2d0   :  { %3892 = vmatpush1.bf16.msra.mxu1 %v3891_v21  ;;  %v1205_v21 = vld [vmem:[#allocation10 + $0x358] sm:$0xff]  ;;  %v3911_v27 = vpack.c.bf16 %v1200_v18, %v1196_v43  ;;  %v3929_v15 = vpack.c.bf16 %v1241_v13, %v1237_v33  ;;  %v1236_v16 = vld [vmem:[#allocation10 + $0x450] sm:$0xff] }
 0x2d1   :  { %3894 = vmatprep.subr.bf16.mxu1 %v3893_v25  ;;  %v1450_v25 = vld [vmem:[#allocation10 + $0xb00] sm:$0xff]  ;;  %v3913_v31 = vpack.c.bf16 %v1209_v23, %v1205_v21  ;;  %v1245_v43 = vld [vmem:[#allocation10 + $0x498] sm:$0xff]  ;;  %v1244_v23 = vld [vmem:[#allocation10 + $0x490] sm:$0xff] }
 0x2d2   :  { %3828 = vmatpush1.bf16.msra.mxu0 %v3827_v28  ;;  %v1459_v28 = vld [vmem:[#allocation10 + $0xb48] sm:$0xff]  ;;  %v3847_v35 = vpack.c.bf16 %v1454_v26, %v1450_v25  ;;  %v1249_v18 = vld [vmem:[#allocation10 + $0x4b8] sm:$0xff]  ;;  %v1308_v13 = vld [vmem:[#allocation10 + $0x690] sm:$0xff] }
 0x2d3   :  { %3830 = vmatprep.subr.bf16.mxu0 %v3829_v37  ;;  %v1204_v37 = vld [vmem:[#allocation10 + $0x350] sm:$0xff]  ;;  %v3849_v39 = vpack.c.bf16 %v1463_v30, %v1459_v28  ;;  %v3933_v21 = vpack.c.bf16 %v1249_v18, %v1245_v43  ;;  %v1253_v25 = vld [vmem:[#allocation10 + $0x4d8] sm:$0xff] }
 0x2d4   :  { %3896 = vmatpush1.bf16.msra.mxu1 %v3895_v36  ;;  %v1213_v36 = vld [vmem:[#allocation10 + $0x398] sm:$0xff]  ;;  %v3915_v44 = vpack.c.bf16 %v1208_v34, %v1204_v37  ;;  %v1252_v30 = vld [vmem:[#allocation10 + $0x4d0] sm:$0xff] }
 0x2d5   :  { %3898 = vmatprep.subr.bf16.mxu1 %v3897_v41  ;;  %v1458_v41 = vld [vmem:[#allocation10 + $0xb40] sm:$0xff]  ;;  %v3917_v46 = vpack.c.bf16 %v1217_v38, %v1213_v36  ;;  %v1257_v26 = vld [vmem:[#allocation10 + $0x4f8] sm:$0xff]  ;;  %v1264_v36 = vld [vmem:[#allocation10 + $0x530] sm:$0xff] }
 0x2d6   :  { %3832 = vmatpush1.bf16.msra.mxu0 %v3831_v45  ;;  %v1467_v45 = vld [vmem:[#allocation10 + $0xb88] sm:$0xff]  ;;  %v3851_v49 = vpack.c.bf16 %v1462_v42, %v1458_v41  ;;  %v3937_v28 = vpack.c.bf16 %v1257_v26, %v1253_v25  ;;  %v1261_v37 = vld [vmem:[#allocation10 + $0x518] sm:$0xff]  ;;  %v1316_v18 = vld [vmem:[#allocation10 + $0x6d0] sm:$0xff] }
 0x2d7   :  { %3834 = vmatprep.subr.bf16.mxu0 %v3833_v47  ;;  %v1212_v47 = vld [vmem:[#allocation10 + $0x390] sm:$0xff]  ;;  %v3853_v52 = vpack.c.bf16 %v1471_v4, %v1467_v45  ;;  %v1269_v38 = vld [vmem:[#allocation10 + $0x558] sm:$0xff] }
 0x2d8   :  { %3900 = vmatpush1.bf16.msra.mxu1 %v3899_v50  ;;  %v1221_v50 = vld [vmem:[#allocation10 + $0x3d8] sm:$0xff]  ;;  %v3919_v57 = vpack.c.bf16 %v1216_v54, %v1212_v47  ;;  %v1272_v45 = vld [vmem:[#allocation10 + $0x570] sm:$0xff] }
 0x2d9   :  { %3902 = vmatprep.subr.bf16.mxu1 %v3901_v53  ;;  %v1466_v53 = vld [vmem:[#allocation10 + $0xb80] sm:$0xff]  ;;  %v3921_v58 = vpack.c.bf16 %v1225_v51, %v1221_v50  ;;  %v1277_v4 = vld [vmem:[#allocation10 + $0x598] sm:$0xff]  ;;  %v1280_v50 = vld [vmem:[#allocation10 + $0x5b0] sm:$0xff] }
 0x2da   :  { %3836 = vmatpush1.bf16.msra.mxu0 %v3835_v32  ;;  %v1475_v32 = vld [vmem:[#allocation10 + $0xbc8] sm:$0xff]  ;;  %v3855_v60 = vpack.c.bf16 %v1470_v56, %v1466_v53  ;;  %v1285_v51 = vld [vmem:[#allocation10 + $0x5d8] sm:$0xff]  ;;  %v1324_v26 = vld [vmem:[#allocation10 + $0x710] sm:$0xff] }
 0x2db   :  { %3838 = vmatprep.subr.bf16.mxu0 %v3837_v59  ;;  %v1220_v59 = vld [vmem:[#allocation10 + $0x3d0] sm:$0xff]  ;;  %v3857_v1 = vpack.c.bf16 %v1479_v22, %v1475_v32  ;;  %v1293_v22 = vld [vmem:[#allocation10 + $0x618] sm:$0xff] }
 0x2dc   :  { %3904 = vmatpush1.bf16.msra.mxu1 %v3903_v61  ;;  %v1229_v61 = vld [vmem:[#allocation10 + $0x418] sm:$0xff]  ;;  %v3923_v7 = vpack.c.bf16 %v1224_v40, %v1220_v59  ;;  %v1288_v32 = vld [vmem:[#allocation10 + $0x5f0] sm:$0xff] }
 0x2dd   :  { %3906 = vmatprep.subr.bf16.mxu1 %v3905_v2  ;;  %v1474_v2 = vld [vmem:[#allocation10 + $0xbc0] sm:$0xff] }
 0x2de   :  { %3840 = vmatpush1.bf16.msra.mxu0 %v3839_v8  ;;  %v3925_v8 = vpack.c.bf16 %v1233_v0, %v1229_v61  ;;  %v1296_v61 = vld [vmem:[#allocation10 + $0x630] sm:$0xff]  ;;  %v1301_v0 = vld [vmem:[#allocation10 + $0x658] sm:$0xff] }
 0x2df   :  { %3842 = vmatprep.subr.bf16.mxu0 %v3841_v12  ;;  %v3859_v12 = vpack.c.bf16 %v1478_v6, %v1474_v2 }
 0x2e0   :  { %3908 = vmatpush1.bf16.msra.mxu1 %v3907_v14  ;;  %v3927_v14 = vpack.c.bf16 %v1232_v11, %v1228_v10  ;;  %v1309_v10 = vld [vmem:[#allocation10 + $0x698] sm:$0xff] }
 0x2e1   :  { %3910 = vmatprep.subr.bf16.mxu1 %v3909_v9  ;;  %v1240_v9 = vld [vmem:[#allocation10 + $0x470] sm:$0xff]  ;;  %v1313_v11 = vld [vmem:[#allocation10 + $0x6b8] sm:$0xff] }
 0x2e2   :  { %3844 = vmatpush1.bf16.msra.mxu0 %v3843_v20  ;;  %v3931_v20 = vpack.c.bf16 %v1240_v9, %v1236_v16  ;;  %v3965_v33 = vpack.c.bf16 %v1313_v11, %v1309_v10  ;;  %v1321_v16 = vld [vmem:[#allocation10 + $0x6f8] sm:$0xff]  ;;  %v1380_v11 = vld [vmem:[#allocation10 + $0x8d0] sm:$0xff] }
 0x2e3   :  { %3846 = vmatprep.subr.bf16.mxu0 %v3845_v24  ;;  %v1248_v24 = vld [vmem:[#allocation10 + $0x4b0] sm:$0xff] }
 0x2e4   :  { %3912 = vmatpush1.bf16.msra.mxu1 %v3911_v27  ;;  %v3935_v27 = vpack.c.bf16 %v1248_v24, %v1244_v23  ;;  %v1329_v23 = vld [vmem:[#allocation10 + $0x738] sm:$0xff] }
 0x2e5   :  { %3914 = vmatprep.subr.bf16.mxu1 %v3913_v31  ;;  %v1256_v31 = vld [vmem:[#allocation10 + $0x4f0] sm:$0xff] }
 0x2e6   :  { %3848 = vmatpush1.bf16.msra.mxu0 %v3847_v35  ;;  %v3939_v34 = vpack.c.bf16 %v1256_v31, %v1252_v30  ;;  %v1260_v35 = vld [vmem:[#allocation10 + $0x510] sm:$0xff]  ;;  %v1337_v30 = vld [vmem:[#allocation10 + $0x778] sm:$0xff] }
 0x2e7   :  { %3850 = vmatprep.subr.bf16.mxu0 %v3849_v39  ;;  %v1273_v39 = vld [vmem:[#allocation10 + $0x578] sm:$0xff]  ;;  %v3943_v41 = vpack.c.bf16 %v1264_v36, %v1260_v35 }
 0x2e8   :  { %3916 = vmatpush1.bf16.msra.mxu1 %v3915_v44  ;;  %v3945_v42 = vpack.c.bf16 %v1273_v39, %v1269_v38  ;;  %v1268_v44 = vld [vmem:[#allocation10 + $0x550] sm:$0xff]  ;;  %v1345_v35 = vld [vmem:[#allocation10 + $0x7b8] sm:$0xff] }
 0x2e9   :  { %3918 = vmatprep.subr.bf16.mxu1 %v3917_v46  ;;  %v1281_v46 = vld [vmem:[#allocation10 + $0x5b8] sm:$0xff]  ;;  %v3947_v47 = vpack.c.bf16 %v1272_v45, %v1268_v44  ;;  %v1340_v39 = vld [vmem:[#allocation10 + $0x790] sm:$0xff] }
 0x2ea   :  { %3852 = vmatpush1.bf16.msra.mxu0 %v3851_v49  ;;  %v3949_v54 = vpack.c.bf16 %v1281_v46, %v1277_v4  ;;  %v1276_v49 = vld [vmem:[#allocation10 + $0x590] sm:$0xff]  ;;  %v1353_v44 = vld [vmem:[#allocation10 + $0x7f8] sm:$0xff] }
 0x2eb   :  { %3854 = vmatprep.subr.bf16.mxu0 %v3853_v52  ;;  %v1289_v52 = vld [vmem:[#allocation10 + $0x5f8] sm:$0xff]  ;;  %v3951_v53 = vpack.c.bf16 %v1280_v50, %v1276_v49  ;;  %v1348_v46 = vld [vmem:[#allocation10 + $0x7d0] sm:$0xff] }
 0x2ec   :  { %3920 = vmatpush1.bf16.msra.mxu1 %v3919_v57  ;;  %v3953_v56 = vpack.c.bf16 %v1289_v52, %v1285_v51  ;;  %v1284_v57 = vld [vmem:[#allocation10 + $0x5d0] sm:$0xff]  ;;  %v1361_v49 = vld [vmem:[#allocation10 + $0x838] sm:$0xff] }
 0x2ed   :  { %3922 = vmatprep.subr.bf16.mxu1 %v3921_v58  ;;  %v1297_v58 = vld [vmem:[#allocation10 + $0x638] sm:$0xff]  ;;  %v3955_v59 = vpack.c.bf16 %v1288_v32, %v1284_v57  ;;  %v1356_v52 = vld [vmem:[#allocation10 + $0x810] sm:$0xff] }
 0x2ee   :  { %3856 = vmatpush1.bf16.msra.mxu0 %v3855_v60  ;;  %v3957_v40 = vpack.c.bf16 %v1297_v58, %v1293_v22  ;;  %v1292_v60 = vld [vmem:[#allocation10 + $0x610] sm:$0xff]  ;;  %v1369_v57 = vld [vmem:[#allocation10 + $0x878] sm:$0xff] }
 0x2ef   :  { %3858 = vmatprep.subr.bf16.mxu0 %v3857_v1  ;;  %v1305_v1 = vld [vmem:[#allocation10 + $0x678] sm:$0xff]  ;;  %v3959_v2 = vpack.c.bf16 %v1296_v61, %v1292_v60  ;;  %v1364_v58 = vld [vmem:[#allocation10 + $0x850] sm:$0xff] }
 0x2f0   :  { %3924 = vmatpush1.bf16.msra.mxu1 %v3923_v7  ;;  %v3961_v6 = vpack.c.bf16 %v1305_v1, %v1301_v0  ;;  %v1300_v7 = vld [vmem:[#allocation10 + $0x650] sm:$0xff]  ;;  %v1377_v60 = vld [vmem:[#allocation10 + $0x8b8] sm:$0xff] }
 0x2f1   :  { %3926 = vmatprep.subr.bf16.mxu1 %v3925_v8  ;;  %v1304_v8 = vld [vmem:[#allocation10 + $0x670] sm:$0xff] }
 0x2f2   :  { %3860 = vmatpush1.bf16.msra.mxu0 %v3859_v12  ;;  %v3963_v12 = vpack.c.bf16 %v1304_v8, %v1300_v7  ;;  %v1372_v1 = vld [vmem:[#allocation10 + $0x890] sm:$0xff]  ;;  %v1385_v7 = vld [vmem:[#allocation10 + $0x8f8] sm:$0xff] }
 0x2f3   :  { %2588 = vmatmul.mubr.f32.vlgmr.msra.gmra.mrb[26].mxu1 %v4924_v29  ;;  %v1265_v29 = vld [vmem:[#allocation10 + $0x538] sm:$0xff] }
 0x2f4   :  { %3928 = vmatpush1.bf16.msra.mxu1 %v3927_v14  ;;  %2658 = vmatprep.mubr.f32.mxu1 %v4951_v48  ;;  %v3941_v48 = vpack.c.bf16 %v1265_v29, %v1261_v37  ;;  %v1312_v14 = vld [vmem:[#allocation10 + $0x6b0] sm:$0xff] }
 0x2f5   :  { %2517 = vmatmul.mubr.f32.vlgmr.msra.gmra.mrb[24].mxu0 %v4960_v55  ;;  %3930 = vmatprep.subr.bf16.mxu1 %v3929_v15  ;;  %v1317_v15 = vld [vmem:[#allocation10 + $0x6d8] sm:$0xff]  ;;  %v3967_v9 = vpack.c.bf16 %v1312_v14, %v1308_v13  ;;  %v1332_v29 = vld [vmem:[#allocation10 + $0x750] sm:$0xff] }
 0x2f6   :  { %v3969_v43 = vpack.c.bf16 %v1321_v16, %v1317_v15  ;;  %v1393_v13 = vld [vmem:[#allocation10 + $0x938] sm:$0xff]  ;;  %v1388_v15 = vld [vmem:[#allocation10 + $0x910] sm:$0xff] }
 0x2f7   :  { %v1397_v16 = vld [vmem:[#allocation10 + $0x958] sm:$0xff] }
 0x2f8   :  { %3932 = vmatpush1.bf16.msra.mxu1 %v3931_v20  ;;  %v1320_v20 = vld [vmem:[#allocation10 + $0x6f0] sm:$0xff] }
 0x2f9   :  { %3934 = vmatprep.subr.bf16.mxu1 %v3933_v21  ;;  %v1325_v21 = vld [vmem:[#allocation10 + $0x718] sm:$0xff]  ;;  %v3971_v24 = vpack.c.bf16 %v1320_v20, %v1316_v18  ;;  %v1396_v20 = vld [vmem:[#allocation10 + $0x950] sm:$0xff] }
 0x2fa   :  { %v3973_v25 = vpack.c.bf16 %v1329_v23, %v1325_v21  ;;  %v1400_v21 = vld [vmem:[#allocation10 + $0x970] sm:$0xff]  ;;  %v1405_v23 = vld [vmem:[#allocation10 + $0x998] sm:$0xff] }
 0x2fc   :  { %3936 = vmatpush1.bf16.msra.mxu1 %v3935_v27  ;;  %v1328_v27 = vld [vmem:[#allocation10 + $0x730] sm:$0xff] }
 0x2fd   :  { %3938 = vmatprep.subr.bf16.mxu1 %v3937_v28  ;;  %v1333_v28 = vld [vmem:[#allocation10 + $0x758] sm:$0xff]  ;;  %v3975_v31 = vpack.c.bf16 %v1328_v27, %v1324_v26  ;;  %v1404_v27 = vld [vmem:[#allocation10 + $0x990] sm:$0xff] }
 0x2fe   :  { %v3977_v37 = vpack.c.bf16 %v1337_v30, %v1333_v28  ;;  %v1408_v28 = vld [vmem:[#allocation10 + $0x9b0] sm:$0xff]  ;;  %v1413_v30 = vld [vmem:[#allocation10 + $0x9d8] sm:$0xff] }
 0x300   :  { %3940 = vmatpush1.bf16.msra.mxu1 %v3939_v34  ;;  %v1336_v34 = vld [vmem:[#allocation10 + $0x770] sm:$0xff] }
 0x301   :  { %3942 = vmatprep.subr.bf16.mxu1 %v3941_v48  ;;  %v1341_v48 = vld [vmem:[#allocation10 + $0x798] sm:$0xff]  ;;  %v3979_v36 = vpack.c.bf16 %v1336_v34, %v1332_v29  ;;  %v1412_v34 = vld [vmem:[#allocation10 + $0x9d0] sm:$0xff] }
 0x302   :  { %v3981_v38 = vpack.c.bf16 %v1345_v35, %v1341_v48  ;;  %v1416_v48 = vld [vmem:[#allocation10 + $0x9f0] sm:$0xff]  ;;  %v1421_v35 = vld [vmem:[#allocation10 + $0xa18] sm:$0xff] }
 0x304   :  { %3944 = vmatpush1.bf16.msra.mxu1 %v3943_v41  ;;  %v1344_v41 = vld [vmem:[#allocation10 + $0x7b0] sm:$0xff] }
 0x305   :  { %3946 = vmatprep.subr.bf16.mxu1 %v3945_v42  ;;  %v1349_v42 = vld [vmem:[#allocation10 + $0x7d8] sm:$0xff]  ;;  %v3983_v45 = vpack.c.bf16 %v1344_v41, %v1340_v39  ;;  %v1420_v41 = vld [vmem:[#allocation10 + $0xa10] sm:$0xff] }
 0x306   :  { %v3985_v4 = vpack.c.bf16 %v1353_v44, %v1349_v42  ;;  %v1424_v42 = vld [vmem:[#allocation10 + $0xa30] sm:$0xff]  ;;  %v1429_v44 = vld [vmem:[#allocation10 + $0xa58] sm:$0xff] }
 0x308   :  { %3948 = vmatpush1.bf16.msra.mxu1 %v3947_v47  ;;  %v1352_v47 = vld [vmem:[#allocation10 + $0x7f0] sm:$0xff] }
 0x309   :  { %3950 = vmatprep.subr.bf16.mxu1 %v3949_v54  ;;  %v1357_v54 = vld [vmem:[#allocation10 + $0x818] sm:$0xff]  ;;  %v3987_v50 = vpack.c.bf16 %v1352_v47, %v1348_v46  ;;  %v1428_v47 = vld [vmem:[#allocation10 + $0xa50] sm:$0xff] }
 0x30a   :  { %v3989_v51 = vpack.c.bf16 %v1361_v49, %v1357_v54  ;;  %v1432_v54 = vld [vmem:[#allocation10 + $0xa70] sm:$0xff]  ;;  %v1437_v49 = vld [vmem:[#allocation10 + $0xa98] sm:$0xff] }
 0x30c   :  { %3952 = vmatpush1.bf16.msra.mxu1 %v3951_v53  ;;  %v1360_v53 = vld [vmem:[#allocation10 + $0x830] sm:$0xff] }
 0x30d   :  { %3954 = vmatprep.subr.bf16.mxu1 %v3953_v56  ;;  %v1365_v56 = vld [vmem:[#allocation10 + $0x858] sm:$0xff]  ;;  %v3991_v32 = vpack.c.bf16 %v1360_v53, %v1356_v52  ;;  %v1436_v53 = vld [vmem:[#allocation10 + $0xa90] sm:$0xff] }
 0x30e   :  { %v3993_v22 = vpack.c.bf16 %v1369_v57, %v1365_v56  ;;  %v1440_v56 = vld [vmem:[#allocation10 + $0xab0] sm:$0xff]  ;;  %v1445_v57 = vld [vmem:[#allocation10 + $0xad8] sm:$0xff] }
 0x310   :  { %3956 = vmatpush1.bf16.msra.mxu1 %v3955_v59  ;;  %v1368_v59 = vld [vmem:[#allocation10 + $0x870] sm:$0xff] }
 0x311   :  { %3958 = vmatprep.subr.bf16.mxu1 %v3957_v40  ;;  %v1373_v40 = vld [vmem:[#allocation10 + $0x898] sm:$0xff]  ;;  %v3995_v61 = vpack.c.bf16 %v1368_v59, %v1364_v58  ;;  %v1444_v59 = vld [vmem:[#allocation10 + $0xad0] sm:$0xff] }
 0x312   :  { %v3997_v0 = vpack.c.bf16 %v1377_v60, %v1373_v40  ;;  %v1448_v40 = vld [vmem:[#allocation10 + $0xaf0] sm:$0xff]  ;;  %v1453_v60 = vld [vmem:[#allocation10 + $0xb18] sm:$0xff] }
 0x314   :  { %3960 = vmatpush1.bf16.msra.mxu1 %v3959_v2  ;;  %v1376_v2 = vld [vmem:[#allocation10 + $0x8b0] sm:$0xff] }
 0x315   :  { %3962 = vmatprep.subr.bf16.mxu1 %v3961_v6  ;;  %v1381_v6 = vld [vmem:[#allocation10 + $0x8d8] sm:$0xff]  ;;  %v3999_v8 = vpack.c.bf16 %v1376_v2, %v1372_v1  ;;  %v1452_v2 = vld [vmem:[#allocation10 + $0xb10] sm:$0xff] }
 0x316   :  { %v4001_v10 = vpack.c.bf16 %v1385_v7, %v1381_v6  ;;  %v1456_v6 = vld [vmem:[#allocation10 + $0xb30] sm:$0xff]  ;;  %v1461_v7 = vld [vmem:[#allocation10 + $0xb58] sm:$0xff] }
 0x318   :  { %3964 = vmatpush1.bf16.msra.mxu1 %v3963_v12  ;;  %v1384_v12 = vld [vmem:[#allocation10 + $0x8f0] sm:$0xff] }
 0x319   :  { %3966 = vmatprep.subr.bf16.mxu1 %v3965_v33  ;;  %v1389_v33 = vld [vmem:[#allocation10 + $0x918] sm:$0xff] }
 0x31a   :  { %v4005_v14 = vpack.c.bf16 %v1393_v13, %v1389_v33  ;;  %v1464_v33 = vld [vmem:[#allocation10 + $0xb70] sm:$0xff]  ;;  %v1469_v13 = vld [vmem:[#allocation10 + $0xb98] sm:$0xff] }
 0x31c   :  { %3968 = vmatpush1.bf16.msra.mxu1 %v3967_v9  ;;  %v1401_v9 = vld [vmem:[#allocation10 + $0x978] sm:$0xff] }
 0x31d   :  { %3970 = vmatprep.subr.bf16.mxu1 %v3969_v43  ;;  %v4009_v18 = vpack.c.bf16 %v1401_v9, %v1397_v16  ;;  %v1472_v16 = vld [vmem:[#allocation10 + $0xbb0] sm:$0xff]  ;;  %v1477_v9 = vld [vmem:[#allocation10 + $0xbd8] sm:$0xff] }
 0x320   :  { %3972 = vmatpush1.bf16.msra.mxu1 %v3971_v24  ;;  %v1409_v24 = vld [vmem:[#allocation10 + $0x9b8] sm:$0xff] }
 0x321   :  { %3974 = vmatprep.subr.bf16.mxu1 %v3973_v25  ;;  %v4011_v25 = vpack.c.bf16 %v1400_v21, %v1396_v20  ;;  %v4013_v26 = vpack.c.bf16 %v1409_v24, %v1405_v23  ;;  %v1476_v21 = vld [vmem:[#allocation10 + $0xbd0] sm:$0xff] }
 0x322   :  { %v1480_v23 = vld [vmem:[#allocation10 + $0xbf0] sm:$0xff] }
 0x323   :  { %v4051_v24 = vpack.c.bf16 %v1480_v23, %v1476_v21  ;;  %v2894_v21 = vld [vmem:[#allocation17 + $0xc8] sm:$0xff]  ;;  %v2896_v23 = vld [vmem:[#allocation17 + $0xd8] sm:$0xff] }
 0x324   :  { %3976 = vmatpush1.bf16.msra.mxu1 %v3975_v31  ;;  %v1417_v31 = vld [vmem:[#allocation10 + $0x9f8] sm:$0xff] }
 0x325   :  { %3978 = vmatprep.subr.bf16.mxu1 %v3977_v37  ;;  %v4015_v37 = vpack.c.bf16 %v1408_v28, %v1404_v27  ;;  %v4017_v29 = vpack.c.bf16 %v1417_v31, %v1413_v30  ;;  %v4983_v30 = vsub.s32 1, %v4784_v3  ;;  %v2736_v31 = vld [vmem:[#allocation13] sm:$0xf] }
 0x328   :  { %3980 = vmatpush1.bf16.msra.mxu1 %v3979_v36  ;;  %v1425_v36 = vld [vmem:[#allocation10 + $0xa38] sm:$0xff] }
 0x329   :  { %3982 = vmatprep.subr.bf16.mxu1 %v3981_v38  ;;  %v4019_v38 = vpack.c.bf16 %v1416_v48, %v1412_v34  ;;  %v4021_v39 = vpack.c.bf16 %v1425_v36, %v1421_v35  ;;  %v4988_v34 = vsub.s32 2, %v4784_v3  ;;  %v4991_v48 = vsub.s32 3, %v4784_v3 }
 0x32b   :  { %v2753_v35 = vrot.slane %v2736_v31, %v4991_v48 }
 0x32c   :  { %3984 = vmatpush1.bf16.msra.mxu1 %v3983_v45  ;;  %v1433_v45 = vld [vmem:[#allocation10 + $0xa78] sm:$0xff] }
 0x32d   :  { %3986 = vmatprep.subr.bf16.mxu1 %v3985_v4  ;;  %v4023_v4 = vpack.c.bf16 %v1424_v42, %v1420_v41  ;;  %v4025_v46 = vpack.c.bf16 %v1433_v45, %v1429_v44 }
 0x330   :  { %3988 = vmatpush1.bf16.msra.mxu1 %v3987_v50  ;;  %v1441_v50 = vld [vmem:[#allocation10 + $0xab8] sm:$0xff] }
 0x331   :  { %3990 = vmatprep.subr.bf16.mxu1 %v3989_v51  ;;  %v4027_v51 = vpack.c.bf16 %v1432_v54, %v1428_v47  ;;  %v4029_v52 = vpack.c.bf16 %v1441_v50, %v1437_v49  ;;  %v2870_v54 = vld [vmem:[#allocation17 + $0x8] sm:$0xff]  ;;  %v2872_v49 = vld [vmem:[#allocation17 + $0x18] sm:$0xff]  ;;  %v2869_v50 = vld [vmem:[#allocation17] sm:$0xff] }
 0x333   :  { %2659 = vmatmul.mubr.f32.vlgmr.msra.gmra.mrb[26].mxu1 %v4943_v17  ;;  %v4003_v17 = vpack.c.bf16 %v1384_v12, %v1380_v11  ;;  %v1460_v12 = vld [vmem:[#allocation10 + $0xb50] sm:$0xff] }
 0x334   :  { %3992 = vmatpush1.bf16.msra.mxu1 %v3991_v32  ;;  %2729 = vmatprep.mubr.f32.mxu1 %v4964_v62  ;;  %v1392_v62 = vld [vmem:[#allocation10 + $0x930] sm:$0xff]  ;;  %v1449_v32 = vld [vmem:[#allocation10 + $0xaf8] sm:$0xff] }
 0x335   :  { %3994 = vmatprep.subr.bf16.mxu1 %v3993_v22  ;;  %v4007_v43 = vpack.c.bf16 %v1392_v62, %v1388_v15  ;;  %v4031_v22 = vpack.c.bf16 %v1440_v56, %v1436_v53  ;;  %v4033_v58 = vpack.c.bf16 %v1449_v32, %v1445_v57  ;;  %v1468_v62 = vld [vmem:[#allocation10 + $0xb90] sm:$0xff]  ;;  %v2876_v56 = vld [vmem:[#allocation17 + $0x38] sm:$0xff] }
 0x336   :  { %v2874_v53 = vld [vmem:[#allocation17 + $0x28] sm:$0xff] }
 0x337   :  { %v4057_v32 = vpack.c.bf16 %v2876_v56, %v2874_v53  ;;  %v2902_v53 = vld [vmem:[#allocation17 + $0x108] sm:$0xff]  ;;  %v2904_v56 = vld [vmem:[#allocation17 + $0x118] sm:$0xff] }
 0x338   :  { %3996 = vmatpush1.bf16.msra.mxu1 %v3995_v61  ;;  %v1457_v61 = vld [vmem:[#allocation10 + $0xb38] sm:$0xff] }
 0x339   :  { %3998 = vmatprep.subr.bf16.mxu1 %v3997_v0  ;;  %v4035_v0 = vpack.c.bf16 %v1448_v40, %v1444_v59  ;;  %v4037_v1 = vpack.c.bf16 %v1457_v61, %v1453_v60  ;;  %v2878_v59 = vld [vmem:[#allocation17 + $0x48] sm:$0xff]  ;;  %v2880_v40 = vld [vmem:[#allocation17 + $0x58] sm:$0xff] }
 0x33a   :  { %v4061_v61 = vpack.c.bf16 %v2880_v40, %v2878_v59  ;;  %v2908_v59 = vld [vmem:[#allocation17 + $0x138] sm:$0xff] }
 0x33c   :  { %4000 = vmatpush1.bf16.msra.mxu1 %v3999_v8  ;;  %v1465_v8 = vld [vmem:[#allocation10 + $0xb78] sm:$0xff] }
 0x33d   :  { %4002 = vmatprep.subr.bf16.mxu1 %v4001_v10  ;;  %v4039_v10 = vpack.c.bf16 %v1456_v6, %v1452_v2  ;;  %v4041_v11 = vpack.c.bf16 %v1465_v8, %v1461_v7  ;;  %v2882_v2 = vld [vmem:[#allocation17 + $0x68] sm:$0xff]  ;;  %v2884_v6 = vld [vmem:[#allocation17 + $0x78] sm:$0xff] }
 0x33e   :  { %v4065_v8 = vpack.c.bf16 %v2884_v6, %v2882_v2  ;;  %v2912_v2 = vld [vmem:[#allocation17 + $0x158] sm:$0xff] }
 0x340   :  { %4004 = vmatpush1.bf16.msra.mxu1 %v4003_v17  ;;  %v1473_v17 = vld [vmem:[#allocation10 + $0xbb8] sm:$0xff] }
 0x341   :  { %4006 = vmatprep.subr.bf16.mxu1 %v4005_v14  ;;  %v4043_v14 = vpack.c.bf16 %v1464_v33, %v1460_v12  ;;  %v4045_v15 = vpack.c.bf16 %v1473_v17, %v1469_v13  ;;  %v2886_v12 = vld [vmem:[#allocation17 + $0x88] sm:$0xff]  ;;  %v2888_v33 = vld [vmem:[#allocation17 + $0x98] sm:$0xff] }
 0x342   :  { %v4069_v17 = vpack.c.bf16 %v2888_v33, %v2886_v12  ;;  %v2916_v12 = vld [vmem:[#allocation17 + $0x178] sm:$0xff] }
 0x344   :  { %4008 = vmatpush1.bf16.msra.mxu1 %v4007_v43  ;;  %v1481_v43 = vld [vmem:[#allocation10 + $0xbf8] sm:$0xff] }
 0x345   :  { %4010 = vmatprep.subr.bf16.mxu1 %v4009_v18  ;;  %v4047_v18 = vpack.c.bf16 %v1472_v16, %v1468_v62  ;;  %v4049_v20 = vpack.c.bf16 %v1481_v43, %v1477_v9  ;;  %v2890_v62 = vld [vmem:[#allocation17 + $0xa8] sm:$0xff]  ;;  %v2892_v16 = vld [vmem:[#allocation17 + $0xb8] sm:$0xff] }
 0x346   :  { %v4073_v43 = vpack.c.bf16 %v2892_v16, %v2890_v62  ;;  %v2920_v62 = vld [vmem:[#allocation17 + $0x198] sm:$0xff] }
 0x348   :  { %4012 = vmatpush1.bf16.msra.mxu1 %v4011_v25 }
 0x349   :  { %4014 = vmatprep.subr.bf16.mxu1 %v4013_v26 }
 0x34c   :  { %4016 = vmatpush1.bf16.msra.mxu1 %v4015_v37  ;;  %v2741_v37 = vrot.slane %v2736_v31, %v4803_v19 }
 0x34d   :  { %4018 = vmatprep.subr.bf16.mxu1 %v4017_v29  ;;  %v2745_v29 = vrot.slane %v2736_v31, %v4983_v30 }
 0x350   :  { %4020 = vmatpush1.bf16.msra.mxu1 %v4019_v38 }
 0x351   :  { %4022 = vmatprep.subr.bf16.mxu1 %v4021_v39 }
 0x354   :  { %4024 = vmatpush1.bf16.msra.mxu1 %v4023_v4 }
 0x355   :  { %4026 = vmatprep.subr.bf16.mxu1 %v4025_v46 }
 0x358   :  { %4028 = vmatpush1.bf16.msra.mxu1 %v4027_v51  ;;  %v4053_v51 = vpack.c.bf16 %v2872_v49, %v2870_v54  ;;  %v2900_v54 = vld [vmem:[#allocation17 + $0xf8] sm:$0xff] }
 0x359   :  { %4030 = vmatprep.subr.bf16.mxu1 %v4029_v52  ;;  %v2871_v52 = vld [vmem:[#allocation17 + $0x10] sm:$0xff] }
 0x35a   :  { %v4055_v57 = vpack.c.bf16 %v2871_v52, %v2869_v50  ;;  %4054 = vmatprep.subr.bf16.mxu0 %v4053_v51  ;;  %v2897_v50 = vld [vmem:[#allocation17 + $0xe0] sm:$0xff]  ;;  %v2899_v51 = vld [vmem:[#allocation17 + $0xf0] sm:$0xff] }
 0x35b   :  { %v4083_v52 = vpack.c.bf16 %v2899_v51, %v2897_v50  ;;  %v2762_v51 = vld [vmem:[#allocation14] sm:$0xf] }
 0x35c   :  { %4032 = vmatpush1.bf16.msra.mxu1 %v4031_v22  ;;  %v2873_v22 = vld [vmem:[#allocation17 + $0x20] sm:$0xff]  ;;  %4056 = vmatpush1.bf16.msra.mxu0 %v4055_v57 }
 0x35d   :  { %4034 = vmatprep.subr.bf16.mxu1 %v4033_v58  ;;  %v2875_v58 = vld [vmem:[#allocation17 + $0x30] sm:$0xff]  ;;  %4058 = vmatprep.subr.bf16.mxu0 %v4057_v32  ;;  %v2901_v57 = vld [vmem:[#allocation17 + $0x100] sm:$0xff]  ;;  %v4085_v32 = vpack.c.bf16 %v2904_v56, %v2902_v53  ;;  %v2811_v53 = vrot.slane %v2762_v51, %v4988_v34  ;;  %v2815_v56 = vrot.slane %v2762_v51, %v4991_v48 }
 0x35e   :  { %v4059_v60 = vpack.c.bf16 %v2875_v58, %v2873_v22  ;;  %v2903_v22 = vld [vmem:[#allocation17 + $0x110] sm:$0xff]  ;;  %v2906_v58 = vld [vmem:[#allocation17 + $0x128] sm:$0xff] }
 0x35f   :  { %v4087_v40 = vpack.c.bf16 %v2903_v22, %v2901_v57  ;;  %v2807_v57 = vrot.slane %v2762_v51, %v4983_v30 }
 0x360   :  { %4036 = vmatpush1.bf16.msra.mxu1 %v4035_v0  ;;  %v2877_v0 = vld [vmem:[#allocation17 + $0x40] sm:$0xff]  ;;  %4060 = vmatpush1.bf16.msra.mxu0 %v4059_v60  ;;  %v4089_v60 = vpack.c.bf16 %v2908_v59, %v2906_v58 }
 0x361   :  { %4038 = vmatprep.subr.bf16.mxu1 %v4037_v1  ;;  %v2879_v1 = vld [vmem:[#allocation17 + $0x50] sm:$0xff]  ;;  %4062 = vmatprep.subr.bf16.mxu0 %v4061_v61  ;;  %v2905_v61 = vld [vmem:[#allocation17 + $0x120] sm:$0xff] }
 0x362   :  { %v4063_v7 = vpack.c.bf16 %v2879_v1, %v2877_v0  ;;  %v2907_v0 = vld [vmem:[#allocation17 + $0x130] sm:$0xff]  ;;  %v2910_v1 = vld [vmem:[#allocation17 + $0x148] sm:$0xff] }
 0x363   :  { %v4091_v6 = vpack.c.bf16 %v2907_v0, %v2905_v61 }
 0x364   :  { %4040 = vmatpush1.bf16.msra.mxu1 %v4039_v10  ;;  %v2881_v10 = vld [vmem:[#allocation17 + $0x60] sm:$0xff]  ;;  %4064 = vmatpush1.bf16.msra.mxu0 %v4063_v7  ;;  %v4093_v7 = vpack.c.bf16 %v2912_v2, %v2910_v1 }
 0x365   :  { %4042 = vmatprep.subr.bf16.mxu1 %v4041_v11  ;;  %v2883_v11 = vld [vmem:[#allocation17 + $0x70] sm:$0xff]  ;;  %4066 = vmatprep.subr.bf16.mxu0 %v4065_v8  ;;  %v2909_v8 = vld [vmem:[#allocation17 + $0x140] sm:$0xff] }
 0x366   :  { %v4067_v13 = vpack.c.bf16 %v2883_v11, %v2881_v10  ;;  %v2911_v10 = vld [vmem:[#allocation17 + $0x150] sm:$0xff]  ;;  %v2914_v11 = vld [vmem:[#allocation17 + $0x168] sm:$0xff] }
 0x367   :  { %v4095_v33 = vpack.c.bf16 %v2911_v10, %v2909_v8 }
 0x368   :  { %4044 = vmatpush1.bf16.msra.mxu1 %v4043_v14  ;;  %v2885_v14 = vld [vmem:[#allocation17 + $0x80] sm:$0xff]  ;;  %4068 = vmatpush1.bf16.msra.mxu0 %v4067_v13  ;;  %v4097_v13 = vpack.c.bf16 %v2916_v12, %v2914_v11 }
 0x369   :  { %4046 = vmatprep.subr.bf16.mxu1 %v4045_v15  ;;  %v2887_v15 = vld [vmem:[#allocation17 + $0x90] sm:$0xff]  ;;  %4070 = vmatprep.subr.bf16.mxu0 %v4069_v17  ;;  %v2913_v17 = vld [vmem:[#allocation17 + $0x160] sm:$0xff] }
 0x36a   :  { %v4071_v9 = vpack.c.bf16 %v2887_v15, %v2885_v14  ;;  %v2915_v14 = vld [vmem:[#allocation17 + $0x170] sm:$0xff]  ;;  %v2918_v15 = vld [vmem:[#allocation17 + $0x188] sm:$0xff] }
 0x36b   :  { %v4099_v16 = vpack.c.bf16 %v2915_v14, %v2913_v17 }
 0x36c   :  { %4048 = vmatpush1.bf16.msra.mxu1 %v4047_v18  ;;  %v2889_v18 = vld [vmem:[#allocation17 + $0xa0] sm:$0xff]  ;;  %4072 = vmatpush1.bf16.msra.mxu0 %v4071_v9  ;;  %v4101_v9 = vpack.c.bf16 %v2920_v62, %v2918_v15  ;;  %v2938_v62 = vld [vmem:[#allocation17 + $0x228] sm:$0xff] }
 0x36d   :  { %4050 = vmatprep.subr.bf16.mxu1 %v4049_v20  ;;  %v2891_v20 = vld [vmem:[#allocation17 + $0xb0] sm:$0xff]  ;;  %4074 = vmatprep.subr.bf16.mxu0 %v4073_v43  ;;  %v2917_v43 = vld [vmem:[#allocation17 + $0x180] sm:$0xff] }
 0x370   :  { %4052 = vmatpush1.bf16.msra.mxu1 %v4051_v24  ;;  %v4075_v24 = vpack.c.bf16 %v2891_v20, %v2889_v18  ;;  %v2919_v18 = vld [vmem:[#allocation17 + $0x190] sm:$0xff]  ;;  %v2922_v20 = vld [vmem:[#allocation17 + $0x1a8] sm:$0xff] }
 0x372   :  { %4076 = vmatpush1.bf16.msra.mxu0 %v4075_v24 }
 0x373   :  { %2730 = vmatmul.mubr.f32.vlgmr.msra.gmra.mrb[26].mxu1 %v4960_v55 }
 0x3c8   :  { %v2518_v25 = vpop.f32.mrb[24].mxu0 }
 0x3c9   :  { %v4181_v26 = vadd.f32 %v2518_v25, %v4970_v63  ;;  %v2520_v27 = vpop.f32.mrb[25].mxu0  ;;  %v4077_v25 = vpack.c.bf16 %v2896_v23, %v2894_v21  ;;  %v2924_v21 = vld [vmem:[#allocation17 + $0x1b8] sm:$0xff]  ;;  %v4103_v23 = vpack.c.bf16 %v2919_v18, %v2917_v43 }
 0x3ca   :  { %v4182_v28 = vadd.f32 %v2520_v27, %v4972_v5  ;;  %v2749_v5 = vrot.slane %v2736_v31, %v4988_v34  ;;  %v2895_v27 = vld [vmem:[#allocation17 + $0xd0] sm:$0xff]  ;;  %v4105_v24 = vpack.c.bf16 %v2924_v21, %v2922_v20 }
 0x3cb   :  { %v4993_v55 = vadd.f32 %v4181_v26, %v2741_v37  ;;  %v2893_v26 = vld [vmem:[#allocation17 + $0xc0] sm:$0xff]  ;;  %4078 = vmatprep.subr.bf16.mxu0 %v4077_v25 }
 0x3cc   :  { %v4995_v63 = vadd.f32 %v4182_v28, %v2745_v29  ;;  %v4079_v28 = vpack.c.bf16 %v2895_v27, %v2893_v26  ;;  %v2921_v25 = vld [vmem:[#allocation17 + $0x1a0] sm:$0xff]  ;;  %v2923_v26 = vld [vmem:[#allocation17 + $0x1b0] sm:$0xff]  ;;  %v2926_v27 = vld [vmem:[#allocation17 + $0x1c8] sm:$0xff] }
 0x3cd   :  { %v2764_v36 = vsel %vm348_vm2, %v4993_v55, 0.0 }
 0x3ce   :  { %v2765_v38 = vsel %vm348_vm2, %v4995_v63, 0.0  ;;  %4080 = vmatpush1.bf16.msra.mxu0 %v4079_v28  ;;  %v2928_v28 = vld [vmem:[#allocation17 + $0x1d8] sm:$0xff] }
 0x3cf   :  { %v2766_v44 = vadd.f32 %v2765_v38, %v2764_v36 }
 0x446   :  { %v2731_v39 = vpop.f32.mrb[26].mxu1 }
 0x447   :  { %v5003_v41 = vadd.f32 %v2749_v5, %v2731_v39  ;;  %v2733_v42 = vpop.f32.mrb[27].mxu1 }
 0x448   :  { %v5005_v3 = vadd.f32 %v2753_v35, %v2733_v42 }
 0x449   :  { %v2767_v45 = vsel %vm348_vm2, %v5003_v41, 0.0 }
 0x44a   :  { %v2768_v4 = vadd.f32 %v2767_v45, %v2766_v44  ;;  %v2769_v46 = vsel %vm348_vm2, %v5005_v3, 0.0 }
 0x44c   :  { %v2770_v47 = vadd.f32 %v2769_v46, %v2768_v4 }
 0x44e   :  { %2771 = vadd.xlane.f32.xlu1 %v2770_v47  ;;  %v2898_v47 = vld [vmem:[#allocation17 + $0xe8] sm:$0xff] }
 0x44f   :  { %v4081_v49 = vpack.c.bf16 %v2900_v54, %v2898_v47 }
 0x451   :  { %4082 = vmatprep.subr.bf16.mxu0 %v4081_v49 }
 0x452   :  { %4084 = vmatpush1.bf16.msra.mxu0 %v4083_v52  ;;  %v2763_v52 = vld [vmem:[#allocation16] sm:$0xf] }
 0x453   :  { %4086 = vmatprep.subr.bf16.mxu0 %v4085_v32  ;;  %v2803_v32 = vrot.slane %v2762_v51, %v4803_v19  ;;  %v2836_v58 = vrot.slane %v2763_v52, %v4988_v34  ;;  %v2832_v59 = vrot.slane %v2763_v52, %v4983_v30  ;;  %v2949_v51 = vld [vmem:[#allocation17 + $0x280] sm:$0xff] }
 0x456   :  { %4088 = vmatpush1.bf16.msra.mxu0 %v4087_v40  ;;  %v2828_v40 = vrot.slane %v2763_v52, %v4803_v19 }
 0x457   :  { %4090 = vmatprep.subr.bf16.mxu0 %v4089_v60  ;;  %v2840_v60 = vrot.slane %v2763_v52, %v4991_v48  ;;  %v2951_v52 = vld [vmem:[#allocation17 + $0x290] sm:$0xff] }
 0x45a   :  { %4092 = vmatpush1.bf16.msra.mxu0 %v4091_v6 }
 0x45b   :  { %4094 = vmatprep.subr.bf16.mxu0 %v4093_v7 }
 0x45e   :  { %4096 = vmatpush1.bf16.msra.mxu0 %v4095_v33 }
 0x45f   :  { %4098 = vmatprep.subr.bf16.mxu0 %v4097_v13 }
 0x462   :  { %4100 = vmatpush1.bf16.msra.mxu0 %v4099_v16  ;;  %v2940_v16 = vld [vmem:[#allocation17 + $0x238] sm:$0xff] }
 0x463   :  { %4102 = vmatprep.subr.bf16.mxu0 %v4101_v9 }
 0x466   :  { %4104 = vmatpush1.bf16.msra.mxu0 %v4103_v23 }
 0x467   :  { %4106 = vmatprep.subr.bf16.mxu0 %v4105_v24 }
 0x4db   :  { %v2772_v31 = vpop.xlane.xlu1 %2771 }
 0x4dc   :  { %v2774_v37 = vmul.f32 0.001953125, %v2772_v31  ;;  %v4107_v31 = vpack.c.bf16 %v2923_v26, %v2921_v25  ;;  %v4121_v26 = vpack.c.bf16 %v2940_v16, %v2938_v62  ;;  %v2971_v62 = vld [vmem:[#allocation17 + $0x330] sm:$0xff]  ;;  %v2974_v16 = vld [vmem:[#allocation17 + $0x348] sm:$0xff] }
 0x4de   :  { %v5012_v29 = vsub.f32 %v4993_v55, %v2774_v37  ;;  %v5015_v5 = vsub.f32 %v4995_v63, %v2774_v37  ;;  %v5018_v35 = vsub.f32 %v5003_v41, %v2774_v37  ;;  %v5021_v36 = vsub.f32 %v5005_v3, %v2774_v37  ;;  %4108 = vmatpush1.bf16.msra.mxu0 %v4107_v31 }
 0x4df   :  { %v4109_v37 = vpack.c.bf16 %v2928_v28, %v2926_v27  ;;  %v2937_v27 = vld [vmem:[#allocation17 + $0x220] sm:$0xff]  ;;  %v2939_v28 = vld [vmem:[#allocation17 + $0x230] sm:$0xff] }
 0x4e0   :  { %v2779_v38 = vmul.f32 %v5012_v29, %v5012_v29  ;;  %v2780_v39 = vmul.f32 %v5015_v5, %v5015_v5  ;;  %v2781_v42 = vmul.f32 %v5018_v35, %v5018_v35  ;;  %v2782_v55 = vmul.f32 %v5021_v36, %v5021_v36 }
 0x4e1   :  { %4110 = vmatprep.subr.bf16.mxu0 %v4109_v37  ;;  %v2942_v37 = vld [vmem:[#allocation17 + $0x248] sm:$0xff] }
 0x4e2   :  { %v2783_v63 = vsel %vm348_vm2, %v2779_v38, 0.0  ;;  %v2784_v41 = vsel %vm348_vm2, %v2780_v39, 0.0  ;;  %v2786_v3 = vsel %vm348_vm2, %v2781_v42, 0.0  ;;  %v2788_v4 = vsel %vm348_vm2, %v2782_v55, 0.0  ;;  %v2925_v38 = vld [vmem:[#allocation17 + $0x1c0] sm:$0xff]  ;;  %v2927_v39 = vld [vmem:[#allocation17 + $0x1d0] sm:$0xff] }
 0x4e3   :  { %v2785_v44 = vadd.f32 %v2784_v41, %v2783_v63  ;;  %v2930_v42 = vld [vmem:[#allocation17 + $0x1e8] sm:$0xff]  ;;  %v2932_v55 = vld [vmem:[#allocation17 + $0x1f8] sm:$0xff]  ;;  %v4111_v63 = vpack.c.bf16 %v2927_v39, %v2925_v38  ;;  %v4123_v39 = vpack.c.bf16 %v2939_v28, %v2937_v27  ;;  %v2977_v27 = vld [vmem:[#allocation17 + $0x360] sm:$0xff] }
 0x4e4   :  { %v4113_v41 = vpack.c.bf16 %v2932_v55, %v2930_v42  ;;  %v2944_v38 = vld [vmem:[#allocation17 + $0x258] sm:$0xff]  ;;  %v2941_v55 = vld [vmem:[#allocation17 + $0x240] sm:$0xff]  ;;  %v2979_v28 = vld [vmem:[#allocation17 + $0x370] sm:$0xff] }
 0x4e5   :  { %v2787_v45 = vadd.f32 %v2786_v3, %v2785_v44  ;;  %v2929_v44 = vld [vmem:[#allocation17 + $0x1e0] sm:$0xff]  ;;  %v2931_v3 = vld [vmem:[#allocation17 + $0x1f0] sm:$0xff]  ;;  %4112 = vmatpush1.bf16.msra.mxu0 %v4111_v63  ;;  %v4125_v42 = vpack.c.bf16 %v2944_v38, %v2942_v37  ;;  %v2984_v37 = vld [vmem:[#allocation17 + $0x398] sm:$0xff]  ;;  %v4163_v38 = vpack.c.bf16 %v2979_v28, %v2977_v27 }
 0x4e6   :  { %4114 = vmatprep.subr.bf16.mxu0 %v4113_v41  ;;  %v2943_v63 = vld [vmem:[#allocation17 + $0x250] sm:$0xff]  ;;  %v2946_v41 = vld [vmem:[#allocation17 + $0x268] sm:$0xff] }
 0x4e7   :  { %v2789_v46 = vadd.f32 %v2788_v4, %v2787_v45  ;;  %v4115_v45 = vpack.c.bf16 %v2931_v3, %v2929_v44  ;;  %v2934_v4 = vld [vmem:[#allocation17 + $0x208] sm:$0xff]  ;;  %v2948_v44 = vld [vmem:[#allocation17 + $0x278] sm:$0xff]  ;;  %v4127_v3 = vpack.c.bf16 %v2943_v63, %v2941_v55  ;;  %v2981_v55 = vld [vmem:[#allocation17 + $0x380] sm:$0xff] }
 0x4e8   :  { %v2983_v63 = vld [vmem:[#allocation17 + $0x390] sm:$0xff] }
 0x4e9   :  { %2790 = vadd.xlane.f32.xlu1 %v2789_v46  ;;  %4116 = vmatpush1.bf16.msra.mxu0 %v4115_v45  ;;  %v2936_v46 = vld [vmem:[#allocation17 + $0x218] sm:$0xff]  ;;  %v4129_v45 = vpack.c.bf16 %v2948_v44, %v2946_v41  ;;  %v2986_v41 = vld [vmem:[#allocation17 + $0x3a8] sm:$0xff] }
 0x4ea   :  { %v4117_v47 = vpack.c.bf16 %v2936_v46, %v2934_v4  ;;  %v2945_v4 = vld [vmem:[#allocation17 + $0x260] sm:$0xff]  ;;  %v2947_v46 = vld [vmem:[#allocation17 + $0x270] sm:$0xff]  ;;  %v2988_v44 = vld [vmem:[#allocation17 + $0x3b8] sm:$0xff] }
 0x4ec   :  { %4118 = vmatprep.subr.bf16.mxu0 %v4117_v47  ;;  %v2950_v47 = vld [vmem:[#allocation17 + $0x288] sm:$0xff] }
 0x576   :  { %v2791_v54 = vpop.xlane.xlu1 %2790 }
 0x577   :  { %v2792_v49 = vmul.f32 0.001953125, %v2791_v54  ;;  %v2952_v54 = vld [vmem:[#allocation17 + $0x298] sm:$0xff] }
 0x579   :  { %v2793_v50 = vadd.f32 1e-05, %v2792_v49  ;;  %v4131_v49 = vpack.c.bf16 %v2947_v46, %v2945_v4  ;;  %v2985_v4 = vld [vmem:[#allocation17 + $0x3a0] sm:$0xff]  ;;  %v2987_v46 = vld [vmem:[#allocation17 + $0x3b0] sm:$0xff] }
 0x57b   :  { %4254 = vrsqrt.f32 %v2793_v50  ;;  %v4133_v50 = vpack.c.bf16 %v2952_v54, %v2950_v47  ;;  %v2990_v47 = vld [vmem:[#allocation17 + $0x3c8] sm:$0xff]  ;;  %v2992_v54 = vld [vmem:[#allocation17 + $0x3d8] sm:$0xff] }
 0x585   :  { %v4255_v22 = vpop.eup %4254 }
 0x586   :  { %v2796_v61 = vmul.f32 %v4255_v22, %v5015_v5  ;;  %v2795_v0 = vmul.f32 %v4255_v22, %v5012_v29  ;;  %v2798_v1 = vmul.f32 %v4255_v22, %v5021_v36  ;;  %v2797_v2 = vmul.f32 %v4255_v22, %v5018_v35  ;;  %v2933_v5 = vld [vmem:[#allocation17 + $0x200] sm:$0xff]  ;;  %v2935_v36 = vld [vmem:[#allocation17 + $0x210] sm:$0xff] }
 0x587   :  { %v4119_v21 = vpack.c.bf16 %v2935_v36, %v2933_v5  ;;  %v2953_v22 = vld [vmem:[#allocation17 + $0x2a0] sm:$0xff]  ;;  %v2970_v5 = vld [vmem:[#allocation17 + $0x328] sm:$0xff]  ;;  %v2972_v36 = vld [vmem:[#allocation17 + $0x338] sm:$0xff] }
 0x588   :  { %v2821_v6 = vmul.f32 %v2807_v57, %v2796_v61  ;;  %v2820_v7 = vmul.f32 %v2803_v32, %v2795_v0  ;;  %v2823_v8 = vmul.f32 %v2815_v56, %v2798_v1  ;;  %v2822_v10 = vmul.f32 %v2811_v53, %v2797_v2  ;;  %v2954_v53 = vld [vmem:[#allocation17 + $0x2a8] sm:$0xff]  ;;  %v2956_v56 = vld [vmem:[#allocation17 + $0x2b8] sm:$0xff]  ;;  %v2957_v0 = vld [vmem:[#allocation17 + $0x2c0] sm:$0xff] }
 0x589   :  { %v4135_v57 = vpack.c.bf16 %v2951_v52, %v2949_v51  ;;  %v4137_v32 = vpack.c.bf16 %v2956_v56, %v2954_v53  ;;  %v2959_v1 = vld [vmem:[#allocation17 + $0x2d0] sm:$0xff]  ;;  %v2962_v2 = vld [vmem:[#allocation17 + $0x2e8] sm:$0xff]  ;;  %v2989_v51 = vld [vmem:[#allocation17 + $0x3c0] sm:$0xff] }
 0x58a   :  { %v2846_v11 = vadd.f32 %v2832_v59, %v2821_v6  ;;  %v2845_v34 = vadd.f32 %v2828_v40, %v2820_v7  ;;  %v2848_v12 = vadd.f32 %v2840_v60, %v2823_v8  ;;  %v5047_v33 = vadd.f32 %v2836_v58, %v2822_v10  ;;  %v2955_v58 = vld [vmem:[#allocation17 + $0x2b0] sm:$0xff]  ;;  %v2958_v59 = vld [vmem:[#allocation17 + $0x2c8] sm:$0xff]  ;;  %v2960_v40 = vld [vmem:[#allocation17 + $0x2d8] sm:$0xff] }
 0x58b   :  { %v4139_v60 = vpack.c.bf16 %v2955_v58, %v2953_v22  ;;  %v4141_v61 = vpack.c.bf16 %v2960_v40, %v2958_v59  ;;  %v2964_v6 = vld [vmem:[#allocation17 + $0x2f8] sm:$0xff]  ;;  %v4143_v7 = vpack.c.bf16 %v2959_v1, %v2957_v0  ;;  %v2961_v10 = vld [vmem:[#allocation17 + $0x2e0] sm:$0xff]  ;;  %v2991_v52 = vld [vmem:[#allocation17 + $0x3d0] sm:$0xff] }
 0x58c   :  { %v2854_v13 = vmul.f32 0.70710677, %v2846_v11  ;;  %v2853_v17 = vmul.f32 0.70710677, %v2845_v34  ;;  %v2856_v48 = vmul.f32 0.70710677, %v2848_v12  ;;  %v4145_v8 = vpack.c.bf16 %v2964_v6, %v2962_v2 }
 0x58d   :  { %v2850_v35 = vmul.f32 0.5, %v2846_v11  ;;  %v2849_v43 = vmul.f32 0.5, %v2845_v34  ;;  %v2852_v23 = vmul.f32 0.5, %v2848_v12  ;;  %v2963_v11 = vld [vmem:[#allocation17 + $0x2f0] sm:$0xff]  ;;  %v2966_v34 = vld [vmem:[#allocation17 + $0x308] sm:$0xff]  ;;  %v2968_v12 = vld [vmem:[#allocation17 + $0x318] sm:$0xff] }
 0x58e   :  { %4256 = verf.f32 %v2854_v13  ;;  %v4147_v13 = vpack.c.bf16 %v2963_v11, %v2961_v10  ;;  %v2994_v53 = vld [vmem:[#allocation17 + $0x3e8] sm:$0xff]  ;;  %v2996_v56 = vld [vmem:[#allocation17 + $0x3f8] sm:$0xff]  ;;  %v2993_v22 = vld [vmem:[#allocation17 + $0x3e0] sm:$0xff] }
 0x58f   :  { %4258 = verf.f32 %v2853_v17  ;;  %v4149_v17 = vpack.c.bf16 %v2968_v12, %v2966_v34  ;;  %v2995_v58 = vld [vmem:[#allocation17 + $0x3f0] sm:$0xff]  ;;  %v2997_v1 = vld [vmem:[#allocation19] sm:$0x3] }
 0x590   :  { %4260 = verf.f32 %v2856_v48  ;;  %v2965_v48 = vld [vmem:[#allocation17 + $0x300] sm:$0xff]  ;;  %v4179_v40 = vpack.c.bf16 %v2995_v58, %v2993_v22  ;;  %v3002_v2 = vrot.slane %v2997_v1, %v4803_v19  ;;  %v3006_v6 = vrot.slane %v2997_v1, %v4983_v30 }
 0x598   :  { %v4257_v29 = vpop.eup %4256 }
 0x599   :  { %v4259_v14 = vpop.eup %4258  ;;  %v2862_v15 = vadd.f32 1.0, %v4257_v29  ;;  %v2967_v29 = vld [vmem:[#allocation17 + $0x310] sm:$0xff] }
 0x59a   :  { %v4261_v9 = vpop.eup %4260  ;;  %v2861_v18 = vadd.f32 1.0, %v4259_v14  ;;  %v4151_v14 = vpack.c.bf16 %v2967_v29, %v2965_v48 }
 0x59b   :  { %v2866_v20 = vmul.f32 %v2862_v15, %v2850_v35  ;;  %v2864_v24 = vadd.f32 1.0, %v4261_v9  ;;  %v4153_v35 = vpack.c.bf16 %v2972_v36, %v2970_v5  ;;  %v2969_v15 = vld [vmem:[#allocation17 + $0x320] sm:$0xff]  ;;  %v2976_v9 = vld [vmem:[#allocation17 + $0x358] sm:$0xff] }
 0x59c   :  { %v2865_v25 = vmul.f32 %v2861_v18, %v2849_v43  ;;  %v4155_v43 = vpack.c.bf16 %v2971_v62, %v2969_v15  ;;  %v4157_v18 = vpack.c.bf16 %v2976_v9, %v2974_v16 }
 0x59d   :  { %3073 = vmatprep.mubr.f32.mxu0 %v2866_v20  ;;  %v2868_v31 = vmul.f32 %v2864_v24, %v2852_v23  ;;  %v2973_v20 = vld [vmem:[#allocation17 + $0x340] sm:$0xff]  ;;  %v2978_v23 = vld [vmem:[#allocation17 + $0x368] sm:$0xff]  ;;  %v2980_v24 = vld [vmem:[#allocation17 + $0x378] sm:$0xff] }
 0x59e   :  { %3074 = vmatmul.mubr.f32.vlgmr.msra.gmra.mrb[26].mxu0 %v2865_v25 }
 0x59f   :  { %4120 = vmatpush1.bf16.msra.mxu0 %v4119_v21  ;;  %3144 = vmatprep.mubr.f32.mxu0 %v2868_v31  ;;  %v2975_v21 = vld [vmem:[#allocation17 + $0x350] sm:$0xff]  ;;  %v2982_v31 = vld [vmem:[#allocation17 + $0x388] sm:$0xff] }
 0x5a0   :  { %4122 = vmatprep.subr.bf16.mxu0 %v4121_v26  ;;  %v4159_v25 = vpack.c.bf16 %v2975_v21, %v2973_v20  ;;  %v4161_v26 = vpack.c.bf16 %v2980_v24, %v2978_v23 }
 0x5a3   :  { %4124 = vmatpush1.bf16.msra.mxu0 %v4123_v39  ;;  %v2855_v39 = vmul.f32 0.70710677, %v5047_v33 }
 0x5a4   :  { %4126 = vmatprep.subr.bf16.mxu0 %v4125_v42  ;;  %v4165_v42 = vpack.c.bf16 %v2984_v37, %v2982_v31 }
 0x5a5   :  { %4262 = verf.f32 %v2855_v39 }
 0x5a7   :  { %4128 = vmatpush1.bf16.msra.mxu0 %v4127_v3  ;;  %v4167_v3 = vpack.c.bf16 %v2983_v63, %v2981_v55 }
 0x5a8   :  { %4130 = vmatprep.subr.bf16.mxu0 %v4129_v45  ;;  %v4169_v45 = vpack.c.bf16 %v2988_v44, %v2986_v41 }
 0x5ab   :  { %4132 = vmatpush1.bf16.msra.mxu0 %v4131_v49  ;;  %v4171_v49 = vpack.c.bf16 %v2987_v46, %v2985_v4 }
 0x5ac   :  { %4134 = vmatprep.subr.bf16.mxu0 %v4133_v50  ;;  %v4173_v50 = vpack.c.bf16 %v2992_v54, %v2990_v47 }
 0x5af   :  { %4136 = vmatpush1.bf16.msra.mxu0 %v4135_v57  ;;  %v4175_v57 = vpack.c.bf16 %v2991_v52, %v2989_v51  ;;  %v4263_v59 = vpop.eup %4262 }
 0x5b0   :  { %4138 = vmatprep.subr.bf16.mxu0 %v4137_v32  ;;  %v4177_v32 = vpack.c.bf16 %v2996_v56, %v2994_v53 }
 0x5b3   :  { %4140 = vmatpush1.bf16.msra.mxu0 %v4139_v60  ;;  %v2863_v60 = vadd.f32 1.0, %v4263_v59 }
 0x5b4   :  { %4142 = vmatprep.subr.bf16.mxu0 %v4141_v61  ;;  %v2851_v61 = vmul.f32 0.5, %v5047_v33 }
 0x5b6   :  { %v2867_v0 = vmul.f32 %v2863_v60, %v2851_v61 }
 0x5b7   :  { %4144 = vmatpush1.bf16.msra.mxu0 %v4143_v7 }
 0x5b8   :  { %4146 = vmatprep.subr.bf16.mxu0 %v4145_v8 }
 0x5bb   :  { %4148 = vmatpush1.bf16.msra.mxu0 %v4147_v13 }
 0x5bc   :  { %4150 = vmatprep.subr.bf16.mxu0 %v4149_v17 }
 0x5bf   :  { %4152 = vmatpush1.bf16.msra.mxu0 %v4151_v14 }
 0x5c0   :  { %4154 = vmatprep.subr.bf16.mxu0 %v4153_v35 }
 0x5c3   :  { %4156 = vmatpush1.bf16.msra.mxu0 %v4155_v43  ;;  %v3151_v43 = vld [vmem:[#allocation20] sm:$0x3] }
 0x5c4   :  { %4158 = vmatprep.subr.bf16.mxu0 %v4157_v18  ;;  %v3152_v18 = vld [vmem:[#allocation22] sm:$0x3]  ;;  %v3178_v20 = vrot.slane %v3151_v43, %v4803_v19  ;;  %v3182_v21 = vrot.slane %v3151_v43, %v4983_v30 }
 0x5c5   :  { %v3195_v27 = vrot.slane %v3152_v18, %v4983_v30 }
 0x5c7   :  { %4160 = vmatpush1.bf16.msra.mxu0 %v4159_v25 }
 0x5c8   :  { %4162 = vmatprep.subr.bf16.mxu0 %v4161_v26  ;;  %v3191_v26 = vrot.slane %v3152_v18, %v4803_v19 }
 0x5cb   :  { %4164 = vmatpush1.bf16.msra.mxu0 %v4163_v38 }
 0x5cc   :  { %4166 = vmatprep.subr.bf16.mxu0 %v4165_v42 }
 0x5cf   :  { %4168 = vmatpush1.bf16.msra.mxu0 %v4167_v3 }
 0x5d0   :  { %4170 = vmatprep.subr.bf16.mxu0 %v4169_v45 }
 0x5d3   :  { %4172 = vmatpush1.bf16.msra.mxu0 %v4171_v49 }
 0x5d4   :  { %4174 = vmatprep.subr.bf16.mxu0 %v4173_v50 }
 0x5d7   :  { %4176 = vmatpush1.bf16.msra.mxu0 %v4175_v57 }
 0x5d8   :  { %4178 = vmatprep.subr.bf16.mxu0 %v4177_v32 }
 0x5db   :  { %4180 = vmatpush1.bf16.msra.mxu0 %v4179_v40 }
 0x5de   :  { %3145 = vmatmul.mubr.f32.vlgmr.msra.gmra.mrb[26].mxu0 %v2867_v0 }
 0x6b1   :  { %v3146_v7 = vpop.f32.mrb[26].mxu0 }
 0x6b2   :  { %v4183_v8 = vadd.f32 %v3146_v7, %v3002_v2  ;;  %v3148_v10 = vpop.f32.mrb[27].mxu0 }
 0x6b3   :  { %v4184_v11 = vadd.f32 %v3148_v10, %v3006_v6 }
 0x6b4   :  { %v3153_v34 = vsel %vm348_vm2, %v4183_v8, 0.0 }
 0x6b5   :  { %v3154_v12 = vsel %vm348_vm2, %v4184_v11, 0.0 }
 0x6b6   :  { %v3155_v13 = vadd.f32 %v3154_v12, %v3153_v34 }
 0x6b8   :  { %3156 = vadd.xlane.f32.xlu1 %v3155_v13 }
 0x745   :  { %v3157_v17 = vpop.xlane.xlu1 %3156 }
 0x746   :  { %v3159_v33 = vmul.f32 0.00390625, %v3157_v17 }
 0x748   :  { %v3160_v48 = vsub.f32 %v4183_v8, %v3159_v33  ;;  %v3161_v29 = vsub.f32 %v4184_v11, %v3159_v33 }
 0x74a   :  { %v3162_v5 = vmul.f32 %v3160_v48, %v3160_v48  ;;  %v3163_v36 = vmul.f32 %v3161_v29, %v3161_v29 }
 0x74c   :  { %v3164_v14 = vsel %vm348_vm2, %v3162_v5, 0.0  ;;  %v3165_v35 = vsel %vm348_vm2, %v3163_v36, 0.0 }
 0x74d   :  { %v3166_v15 = vadd.f32 %v3165_v35, %v3164_v14 }
 0x74f   :  { %3167 = vadd.xlane.f32.xlu1 %v3166_v15 }
 0x7dc   :  { %v3168_v62 = vpop.xlane.xlu1 %3167 }
 0x7dd   :  { %v3169_v16 = vmul.f32 0.00390625, %v3168_v62 }
 0x7df   :  { %v3170_v9 = vadd.f32 1e-05, %v3169_v16 }
 0x7e1   :  { %4264 = vrsqrt.f32 %v3170_v9 }
 0x7eb   :  { %v4265_v23 = vpop.eup %4264 }
 0x7ec   :  { %v3172_v24 = vmul.f32 %v4265_v23, %v3160_v48  ;;  %v3173_v25 = vmul.f32 %v4265_v23, %v3161_v29 }
 0x7ee   :  { %v3185_v28 = vmul.f32 %v3178_v20, %v3172_v24  ;;  %v3186_v31 = vmul.f32 %v3182_v21, %v3173_v25 }
 0x7f0   :  { %v3198_v37 = vadd.f32 %v3191_v26, %v3185_v28  ;;  %v3199_v38 = vadd.f32 %v3195_v27, %v3186_v31 }
 0x7f2   :  { %v3202_v39 = vmul.f32 0.70710677, %v3198_v37  ;;  %v3203_v42 = vmul.f32 0.70710677, %v3199_v38  ;;  %v3200_v41 = vmul.f32 0.5, %v3198_v37  ;;  %v3201_v3 = vmul.f32 0.5, %v3199_v38 }
 0x7f4   :  { %4266 = verf.f32 %v3202_v39 }
 0x7f5   :  { %4268 = verf.f32 %v3203_v42 }
 0x7fe   :  { %v4267_v55 = vpop.eup %4266 }
 0x7ff   :  { %v4269_v63 = vpop.eup %4268  ;;  %v3206_v44 = vadd.f32 1.0, %v4267_v55 }
 0x800   :  { %v3207_v45 = vadd.f32 1.0, %v4269_v63 }
 0x801   :  { %v3208_v4 = vmul.f32 %v3206_v44, %v3200_v41 }
 0x802   :  { %v3209_v19 = vmul.f32 %v3207_v45, %v3201_v3 }
 0x804   :  { %v3212_v46 = vcombine.low %v3208_v4, %v3209_v19 }
 0x806   :  { %3214 = vst [vmem:[#allocation23] sm:$0xff] %v3212_v46 }
 0x807   :  { %4532 = shalt.err (!%p4529_p8)
}
 0x808   :  { %s4533_s4 = scalar_lea.hbm %s5084_s11, 128 }
 0x809   :  { %p4534_p9 = scmp.ne.s32.totalorder %s5084_s11, %s4533_s4  ;;  %p4537_p10 = scmp.lt.u32.totalorder %s4533_s4, %s5084_s11 }
 0x80b   :  { %p4539_p11 = pnand %p4537_p10, %p4534_p9 }
 0x80d   :  { %4542 = shalt.err (!%p4539_p11)
}
 0x80e   :  { %3224 = dma.vmem_to_hbm [thread:$0]  %s3222_s7, 128, %s5084_s11, [#allocation7]  }
 0x80f   :  { %4555 = dma.done.wait [#allocation7], 128  }
 0x810   :  { %4556 = vsyncadd [#allocation7], 4294967168 }
 0x811   :  { %3228 = vsyncpa [#allocation6], 1 }
 0x812   :  { %3229 = vsyncpa [#allocation9], 1 }
 0x813   :  { %3230 = vsyncpa [#allocation12], 1 }
 0x814   :  { %3231 = vsyncpa [#allocation15], 1 }
 0x815   :  { %3232 = vsyncpa [#allocation18], 1 }
 0x816   :  { %3233 = vsyncpa [#allocation21], 1 }
 0x817   :  { %3234 = vsyncpa [#allocation7], 1 }

</bundles_post_ra>
